<compile_context>
chip_gen: v7x
topology: tpu7x:2x2x1
jax: 0.10.0
libtpu: 0.0.40
codegen_flags: <defaults>
</compile_context>

<pallas_src>
import math

import numpy as np
import jax
import jax.numpy as jnp
from jax import lax
from jax.experimental import pallas as pl
from jax.experimental.pallas import tpu as pltpu


def _make_block2_kernel(S, TQ, D, H, HD, M, vis, eps=1e-6):
    inv_sqrt_hd = 1.0 / math.sqrt(HD)

    def layernorm(v, g, b):
        v = v.astype(jnp.float32)                      # stats in f32 on all chips
        mu = jnp.mean(v, axis=-1, keepdims=True)
        c = v - mu
        var = jnp.mean(c * c, axis=-1, keepdims=True)
        return c * lax.rsqrt(var + eps) * g.astype(jnp.float32) + b.astype(jnp.float32)

    def kernel(scales_ref, x_ref, xq_ref, x2_ref, x2q_ref,
               ln1_g_ref, ln1_b_ref,
               wq_ref, bq_ref, wk_ref, bk_ref, wv_ref, bv_ref,
               wo_ref, bo_ref,
               ln2_g_ref, ln2_b_ref,
               w1_ref, b1_ref, w2_ref, b2_ref,
               out_ref, *rest):
        if vis:
            wts_ref, ctx_ref = rest
        else:
            (ctx_ref,) = rest
            wts_ref = None

        mm_dtype = wq_ref.dtype          # dtype fed to the MXU (bf16 in production)

        g1, be1 = ln1_g_ref[...], ln1_b_ref[...]
        xn   = layernorm(x_ref[0],   g1, be1)   # value branch, full S rows   (f32)
        x2n  = layernorm(x2_ref[0],  g1, be1)   # key branch,   full S rows   (f32)
        x2nq = layernorm(x2q_ref[0], g1, be1)   # query branch, this TQ tile  (f32)

        s_q, s_k, s_v = scales_ref[0], scales_ref[1], scales_ref[2]   # sigmoid(g_*)

        # Full-width projections (fused across heads) — lane-dense MXU GEMMs.
        q_all = (jnp.dot(x2nq.astype(mm_dtype), wq_ref[...],
                         preferred_element_type=jnp.float32) + bq_ref[...]) * s_q
        k_all = (jnp.dot(x2n.astype(mm_dtype), wk_ref[...],
                         preferred_element_type=jnp.float32) + bk_ref[...]) * s_k
        v_all = (jnp.dot(xn.astype(mm_dtype), wv_ref[...],
                         preferred_element_type=jnp.float32) + bv_ref[...]) * s_v
        q_mm = q_all.astype(mm_dtype)
        k_mm = k_all.astype(mm_dtype)
        v_mm = v_all.astype(mm_dtype)

        # Per-head attention. H is small here (static unroll); for large H switch to
        # lax.fori_loop with dynamic slices so per-head temporaries don't stay live.
        for h in range(H):
            lo = h * HD
            qh = q_mm[:, lo:lo + HD]                      # (TQ, HD)
            kh = k_mm[:, lo:lo + HD]                      # (S,  HD)
            vh = v_mm[:, lo:lo + HD]                      # (S,  HD)
            # scores = q @ k^T (contract the shared head dim, no explicit transpose)
            sc = lax.dot_general(qh, kh, (((1,), (1,)), ((), ())),
                                 preferred_element_type=jnp.float32) * inv_sqrt_hd
            sc = sc - jnp.max(sc, axis=-1, keepdims=True)
            e = jnp.exp(sc)
            probs = e * pl.reciprocal(jnp.sum(e, axis=-1, keepdims=True), approx=True)
            if vis:
                wts_ref[0, h] = probs.astype(wts_ref.dtype)
            # context for head h, written at its lane offset into the VMEM scratch
            ctx_ref[:, lo:lo + HD] = jnp.dot(probs.astype(mm_dtype), vh,
                                             preferred_element_type=jnp.float32)

        # Single full-K output projection.
        attn_out = jnp.dot(ctx_ref[...].astype(mm_dtype), wo_ref[...],
                           preferred_element_type=jnp.float32) + bo_ref[...]
        x_res = attn_out + xq_ref[0].astype(jnp.float32)          # residual 1

        y = layernorm(x_res, ln2_g_ref[...], ln2_b_ref[...])
        hid = jnp.dot(y.astype(mm_dtype), w1_ref[...],
                      preferred_element_type=jnp.float32) + b1_ref[...]
        hid = jnp.maximum(hid, 0.0)       # ACT2FN['gelu'] == torch relu in the repo
        mlp = jnp.dot(hid.astype(mm_dtype), w2_ref[...],
                      preferred_element_type=jnp.float32) + b2_ref[...]
        out_ref[0] = (mlp + x_res).astype(out_ref.dtype)          # residual 2

    return kernel


def prepare_block2_params(params, num_heads, dtype=None):
    """One-time re-layout of PyTorch-convention (out, in) weights into MXU-friendly
    (in, out) layouts + sigmoid of the gates.  Call once and reuse across forwards;
    doing it per call would re-stream every weight through HBM each time.
    Pass dtype=jnp.bfloat16 for production to halve HBM traffic / VMEM footprint."""
    def cvt(v):
        v = jnp.asarray(v)
        return v if dtype is None else v.astype(dtype)

    def lin_w(W):                        # torch Linear weight (out, in) -> (in, out)
        return jnp.transpose(cvt(W))

    D = params["Wq"].shape[1]
    M = params["W1"].shape[0]
    return dict(
        num_heads=num_heads,
        wq=lin_w(params["Wq"]), bq=jnp.reshape(cvt(params["bq"]), (1, D)),
        wk=lin_w(params["Wk"]), bk=jnp.reshape(cvt(params["bk"]), (1, D)),
        wv=lin_w(params["Wv"]), bv=jnp.reshape(cvt(params["bv"]), (1, D)),
        wo=lin_w(params["Wo"]), bo=jnp.reshape(cvt(params["bo"]), (1, D)),
        ln1_g=jnp.reshape(cvt(params["ln1_g"]), (1, D)),
        ln1_b=jnp.reshape(cvt(params["ln1_b"]), (1, D)),
        ln2_g=jnp.reshape(cvt(params["ln2_g"]), (1, D)),
        ln2_b=jnp.reshape(cvt(params["ln2_b"]), (1, D)),
        w1=lin_w(params["W1"]), b1=jnp.reshape(cvt(params["b1"]), (1, M)),
        w2=lin_w(params["W2"]), b2=jnp.reshape(cvt(params["b2"]), (1, D)),
        scales=jax.nn.sigmoid(jnp.stack([jnp.asarray(params["g_q"], jnp.float32),
                                         jnp.asarray(params["g_k"], jnp.float32),
                                         jnp.asarray(params["g_v"], jnp.float32)])),
    )


def _build_forward(B, S, TQ, D, H, HD, M, x_dtype, vis, weight_pipeline):
    kernel = _make_block2_kernel(S, TQ, D, H, HD, M, vis)
    NQ = S // TQ

    def wspec(shape):                    # constant-index weight block
        idx = lambda b, q, _n=len(shape): (0,) * _n
        if weight_pipeline is None:
            return pl.BlockSpec(shape, idx)
        return pl.BlockSpec(shape, idx, pipeline_mode=weight_pipeline)

    in_specs = [
        pl.BlockSpec(memory_space=pltpu.MemorySpace.SMEM),    # sigmoid gates (3,)
        pl.BlockSpec((1, S, D), lambda b, q: (b, 0, 0)),      # x   (full: value branch)
        pl.BlockSpec((1, TQ, D), lambda b, q: (b, q, 0)),     # x   (query-tile rows: residual)
        pl.BlockSpec((1, S, D), lambda b, q: (b, 0, 0)),      # x2  (full: key branch)
        pl.BlockSpec((1, TQ, D), lambda b, q: (b, q, 0)),     # x2  (query-tile rows: queries)
        wspec((1, D)), wspec((1, D)),                         # attention_norm gamma / beta
        wspec((D, D)), wspec((1, D)),                         # Wq, bq
        wspec((D, D)), wspec((1, D)),                         # Wk, bk
        wspec((D, D)), wspec((1, D)),                         # Wv, bv
        wspec((D, D)), wspec((1, D)),                         # Wo, bo
        wspec((1, D)), wspec((1, D)),                         # ffn_norm gamma / beta
        wspec((D, M)), wspec((1, M)),                         # fc1
        wspec((M, D)), wspec((1, D)),                         # fc2
    ]

    out_shape = [jax.ShapeDtypeStruct((B, S, D), x_dtype)]
    out_specs = [pl.BlockSpec((1, TQ, D), lambda b, q: (b, q, 0))]
    if vis:
        # TODO(synk): at production S, pad S to a multiple of 128 (and/or emit bf16)
        # so the attention-probability writeback is lane-dense.
        out_shape.append(jax.ShapeDtypeStruct((B, H, S, S), x_dtype))
        out_specs.append(pl.BlockSpec((1, H, TQ, S), lambda b, q: (b, 0, q, 0)))

    return pl.pallas_call(
        kernel,
        out_shape=tuple(out_shape),
        grid=(B, NQ),
        in_specs=in_specs,
        out_specs=tuple(out_specs),
        scratch_shapes=[pltpu.VMEM((TQ, D), jnp.float32)],    # per-head ctx gather
        compiler_params=pltpu.CompilerParams(
            dimension_semantics=("parallel", "parallel"),
            vmem_limit_bytes=48 * 1024 * 1024),
    )


def block2_forward(x, x2, prepped, vis=True):
    """x, x2: (B, S, D). prepped: output of prepare_block2_params (cached)."""
    B, S, D = x.shape
    H = prepped["num_heads"]
    assert D % H == 0
    HD = D // H
    M = prepped["w1"].shape[1]
    # Query-tile size: full S for small sequences, 128-row tiles otherwise.
    TQ = S if (S <= 128 or S % 128 != 0) else 128

    args = (prepped["scales"], x, x, x2, x2,
            prepped["ln1_g"], prepped["ln1_b"],
            prepped["wq"], prepped["bq"], prepped["wk"], prepped["bk"],
            prepped["wv"], prepped["bv"], prepped["wo"], prepped["bo"],
            prepped["ln2_g"], prepped["ln2_b"],
            prepped["w1"], prepped["b1"], prepped["w2"], prepped["b2"])

    try:
        fn = _build_forward(B, S, TQ, D, H, HD, M, x.dtype, vis,
                            weight_pipeline=pl.Buffered(buffer_count=1))
        res = fn(*args)
    except Exception:
        # pipeline_mode on pallas_call BlockSpecs unsupported in this JAX build:
        # fall back to default double-buffered weight blocks.
        fn = _build_forward(B, S, TQ, D, H, HD, M, x.dtype, vis,
                            weight_pipeline=None)
        res = fn(*args)

    if vis:
        return res[0], res[1]
    return res[0], None


def ref_forward_numpy(x, x2, params, num_heads):
    """Direct NumPy transcription of the PyTorch Block2 forward (eval mode)."""
    x = np.asarray(x, np.float32)
    x2 = np.asarray(x2, np.float32)
    p = {k: np.asarray(v, np.float32) for k, v in params.items()}
    B, S, D = x.shape
    H = num_heads
    HD = D // H

    def ln(v, g, b, eps=1e-6):
        mu = v.mean(-1, keepdims=True)
        var = ((v - mu) ** 2).mean(-1, keepdims=True)
        return (v - mu) / np.sqrt(var + eps) * g + b

    def lin(v, W, b):            # torch Linear: (out, in)
        return v @ W.T + b

    def sigmoid(t):
        return 1.0 / (1.0 + np.exp(-t))

    def heads(t):                # (B,S,D) -> (B,H,S,HD)
        return t.reshape(B, S, H, HD).transpose(0, 2, 1, 3)

    h = x
    xn = ln(x, p["ln1_g"], p["ln1_b"])
    x2n = ln(x2, p["ln1_g"], p["ln1_b"])

    q = heads(lin(x2n, p["Wq"], p["bq"])) * sigmoid(p["g_q"])
    k = heads(lin(x2n, p["Wk"], p["bk"])) * sigmoid(p["g_k"])
    v = heads(lin(xn, p["Wv"], p["bv"]))

    sc = np.einsum("bhqd,bhkd->bhqk", q, k) / math.sqrt(HD)
    sc = sc - sc.max(-1, keepdims=True)
    e = np.exp(sc)
    probs = e / e.sum(-1, keepdims=True)

    ctx = np.einsum("bhqk,bhkd->bhqd", probs, v * sigmoid(p["g_v"]))
    ctx = ctx.transpose(0, 2, 1, 3).reshape(B, S, D)
    attn_out = lin(ctx, p["Wo"], p["bo"])

    x = attn_out + h
    h = x
    y = ln(x, p["ln2_g"], p["ln2_b"])
    y = np.maximum(lin(y, p["W1"], p["b1"]), 0.0)      # ACT2FN['gelu'] == relu
    y = lin(y, p["W2"], p["b2"])
    return y + h, probs


if __name__ == "__main__":
    # Small shapes consistent with the module: batch=2, seq=8, hidden=32, heads=4, mlp=64.
    B, S, D, H, M = 2, 8, 32, 4, 64
    key = jax.random.PRNGKey(0)
    ks = jax.random.split(key, 20)

    def rnd(k, shape, scale=0.1):
        return jax.random.normal(k, shape, dtype=jnp.float32) * scale

    x = jax.random.normal(ks[0], (B, S, D), dtype=jnp.float32)
    x2 = jax.random.normal(ks[1], (B, S, D), dtype=jnp.float32)

    params = dict(
        ln1_g=1.0 + rnd(ks[2], (D,)), ln1_b=rnd(ks[3], (D,)),
        Wq=rnd(ks[4], (D, D)), bq=rnd(ks[5], (D,)),
        Wk=rnd(ks[6], (D, D)), bk=rnd(ks[7], (D,)),
        Wv=rnd(ks[8], (D, D)), bv=rnd(ks[9], (D,)),
        Wo=rnd(ks[10], (D, D)), bo=rnd(ks[11], (D,)),
        ln2_g=1.0 + rnd(ks[12], (D,)), ln2_b=rnd(ks[13], (D,)),
        W1=rnd(ks[14], (M, D)), b1=rnd(ks[15], (M,)),
        W2=rnd(ks[16], (D, M)), b2=rnd(ks[17], (D,)),
        g_q=jnp.array(0.1, dtype=jnp.float32),
        g_k=jnp.array(0.1, dtype=jnp.float32),
        g_v=jnp.array(0.1, dtype=jnp.float32),
    )

    prepped = prepare_block2_params(params, num_heads=H)      # one-time, cached

    out, weights = block2_forward(x, x2, prepped, vis=True)
    out = jax.block_until_ready(out)
    weights = jax.block_until_ready(weights)

    # vis=False production path: no attention-probability HBM writeback.
    out_novis, w_none = block2_forward(x, x2, prepped, vis=False)
    out_novis = jax.block_until_ready(out_novis)
    assert w_none is None

    out_ref, weights_ref = ref_forward_numpy(x, x2, params, num_heads=H)

    assert out.shape == (B, S, D)
    assert weights.shape == (B, H, S, S)
    # Only deliberate approximation on the f32 demo path is the EUP approx-reciprocal
    # used in the softmax normalization.
    tol = dict(rtol=2e-3, atol=2e-3)
    err_o = float(np.max(np.abs(np.asarray(out) - out_ref)))
    err_w = float(np.max(np.abs(np.asarray(weights) - weights_ref)))
    err_n = float(np.max(np.abs(np.asarray(out_novis) - out_ref)))
    assert np.allclose(np.asarray(out), out_ref, **tol), \
        f"output mismatch vs reference: max abs err {err_o}"
    assert np.allclose(np.asarray(weights), weights_ref, **tol), \
        f"attention-weights mismatch vs reference: max abs err {err_w}"
    assert np.allclose(np.asarray(out_novis), out_ref, **tol), \
        f"vis=False output mismatch vs reference: max abs err {err_n}"

    print("KERNEL_OK")
</pallas_src>

<mosaic_0001>
module attributes {stable_mosaic.version = 11 : i64} {
  func.func @kernel(%arg0: i32, %arg1: i32, %arg2: memref<3xf32, #tpu.memory_space<smem>>, %arg3: memref<1x8x32xf32, #tpu.memory_space<vmem>>, %arg4: memref<1x8x32xf32, #tpu.memory_space<vmem>>, %arg5: memref<1x8x32xf32, #tpu.memory_space<vmem>>, %arg6: memref<1x8x32xf32, #tpu.memory_space<vmem>>, %arg7: memref<1x32xf32, #tpu.memory_space<vmem>>, %arg8: memref<1x32xf32, #tpu.memory_space<vmem>>, %arg9: memref<32x32xf32, #tpu.memory_space<vmem>>, %arg10: memref<1x32xf32, #tpu.memory_space<vmem>>, %arg11: memref<32x32xf32, #tpu.memory_space<vmem>>, %arg12: memref<1x32xf32, #tpu.memory_space<vmem>>, %arg13: memref<32x32xf32, #tpu.memory_space<vmem>>, %arg14: memref<1x32xf32, #tpu.memory_space<vmem>>, %arg15: memref<32x32xf32, #tpu.memory_space<vmem>>, %arg16: memref<1x32xf32, #tpu.memory_space<vmem>>, %arg17: memref<1x32xf32, #tpu.memory_space<vmem>>, %arg18: memref<1x32xf32, #tpu.memory_space<vmem>>, %arg19: memref<32x64xf32, #tpu.memory_space<vmem>>, %arg20: memref<1x64xf32, #tpu.memory_space<vmem>>, %arg21: memref<64x32xf32, #tpu.memory_space<vmem>>, %arg22: memref<1x32xf32, #tpu.memory_space<vmem>>, %arg23: memref<1x8x32xf32, #tpu.memory_space<vmem>>, %arg24: memref<1x4x8x8xf32, #tpu.memory_space<vmem>>, %arg25: memref<8x32xf32, #tpu.memory_space<vmem>>) attributes {dimension_semantics = [#tpu.dimension_semantics<parallel>, #tpu.dimension_semantics<parallel>], iteration_bounds = array<i64: 2, 1>, scalar_prefetch = 0 : i64, scratch_operands = 1 : i64, tpu.core_type = #tpu.core_type<tc>, window_params = [{transform_indices = @transform_0, window_bounds = array<i64: 3>}, {transform_indices = @transform_1, window_bounds = array<i64: 1, 8, 32>}, {transform_indices = @transform_2, window_bounds = array<i64: 1, 8, 32>}, {transform_indices = @transform_3, window_bounds = array<i64: 1, 8, 32>}, {transform_indices = @transform_4, window_bounds = array<i64: 1, 8, 32>}, {pipeline_mode = #tpu.pipeline_mode<synchronous>, transform_indices = @transform_5, window_bounds = array<i64: 1, 32>}, {pipeline_mode = #tpu.pipeline_mode<synchronous>, transform_indices = @transform_6, window_bounds = array<i64: 1, 32>}, {pipeline_mode = #tpu.pipeline_mode<synchronous>, transform_indices = @transform_7, window_bounds = array<i64: 32, 32>}, {pipeline_mode = #tpu.pipeline_mode<synchronous>, transform_indices = @transform_8, window_bounds = array<i64: 1, 32>}, {pipeline_mode = #tpu.pipeline_mode<synchronous>, transform_indices = @transform_9, window_bounds = array<i64: 32, 32>}, {pipeline_mode = #tpu.pipeline_mode<synchronous>, transform_indices = @transform_10, window_bounds = array<i64: 1, 32>}, {pipeline_mode = #tpu.pipeline_mode<synchronous>, transform_indices = @transform_11, window_bounds = array<i64: 32, 32>}, {pipeline_mode = #tpu.pipeline_mode<synchronous>, transform_indices = @transform_12, window_bounds = array<i64: 1, 32>}, {pipeline_mode = #tpu.pipeline_mode<synchronous>, transform_indices = @transform_13, window_bounds = array<i64: 32, 32>}, {pipeline_mode = #tpu.pipeline_mode<synchronous>, transform_indices = @transform_14, window_bounds = array<i64: 1, 32>}, {pipeline_mode = #tpu.pipeline_mode<synchronous>, transform_indices = @transform_15, window_bounds = array<i64: 1, 32>}, {pipeline_mode = #tpu.pipeline_mode<synchronous>, transform_indices = @transform_16, window_bounds = array<i64: 1, 32>}, {pipeline_mode = #tpu.pipeline_mode<synchronous>, transform_indices = @transform_17, window_bounds = array<i64: 32, 64>}, {pipeline_mode = #tpu.pipeline_mode<synchronous>, transform_indices = @transform_18, window_bounds = array<i64: 1, 64>}, {pipeline_mode = #tpu.pipeline_mode<synchronous>, transform_indices = @transform_19, window_bounds = array<i64: 64, 32>}, {pipeline_mode = #tpu.pipeline_mode<synchronous>, transform_indices = @transform_20, window_bounds = array<i64: 1, 32>}, {transform_indices = @transform_21, window_bounds = array<i64: 1, 8, 32>}, {transform_indices = @transform_22, window_bounds = array<i64: 1, 4, 8, 8>}]} {
    %c0 = arith.constant 0 : index
    %c0_0 = arith.constant 0 : index
    %0 = vector.load %arg7[%c0, %c0_0] : memref<1x32xf32, #tpu.memory_space<vmem>>, vector<1x32xf32>
    %c0_1 = arith.constant 0 : index
    %c0_2 = arith.constant 0 : index
    %1 = vector.load %arg8[%c0_1, %c0_2] : memref<1x32xf32, #tpu.memory_space<vmem>>, vector<1x32xf32>
    %c0_3 = arith.constant 0 : index
    %c0_4 = arith.constant 0 : index
    %c0_5 = arith.constant 0 : index
    %2 = vector.load %arg3[%c0_3, %c0_4, %c0_5] : memref<1x8x32xf32, #tpu.memory_space<vmem>>, vector<1x8x32xf32>
    %3 = vector.shape_cast %2 : vector<1x8x32xf32> to vector<8x32xf32>
    %cst = arith.constant dense<0.000000e+00> : vector<8xf32>
    %4 = vector.multi_reduction <add>, %3, %cst [1] : vector<8x32xf32> to vector<8xf32>
    %5 = vector.shape_cast %4 : vector<8xf32> to vector<8x1xf32>
    %cst_6 = arith.constant 3.200000e+01 : f32
    %6 = vector.broadcast %cst_6 : f32 to vector<8x1xf32>
    %7 = arith.divf %5, %6 : vector<8x1xf32>
    %8 = vector.broadcast %7 : vector<8x1xf32> to vector<8x32xf32>
    %9 = arith.subf %3, %8 : vector<8x32xf32>
    %10 = arith.mulf %9, %9 : vector<8x32xf32>
    %cst_7 = arith.constant dense<0.000000e+00> : vector<8xf32>
    %11 = vector.multi_reduction <add>, %10, %cst_7 [1] : vector<8x32xf32> to vector<8xf32>
    %12 = vector.shape_cast %11 : vector<8xf32> to vector<8x1xf32>
    %cst_8 = arith.constant 3.200000e+01 : f32
    %13 = vector.broadcast %cst_8 : f32 to vector<8x1xf32>
    %14 = arith.divf %12, %13 : vector<8x1xf32>
    %cst_9 = arith.constant 9.99999997E-7 : f32
    %15 = vector.broadcast %cst_9 : f32 to vector<8x1xf32>
    %16 = arith.addf %14, %15 : vector<8x1xf32>
    %17 = math.rsqrt %16 : vector<8x1xf32>
    %18 = vector.broadcast %17 : vector<8x1xf32> to vector<8x32xf32>
    %19 = arith.mulf %9, %18 : vector<8x32xf32>
    %20 = vector.broadcast %0 : vector<1x32xf32> to vector<8x32xf32>
    %21 = arith.mulf %19, %20 : vector<8x32xf32>
    %22 = vector.broadcast %1 : vector<1x32xf32> to vector<8x32xf32>
    %23 = arith.addf %21, %22 : vector<8x32xf32>
    %c0_10 = arith.constant 0 : index
    %c0_11 = arith.constant 0 : index
    %c0_12 = arith.constant 0 : index
    %24 = vector.load %arg5[%c0_10, %c0_11, %c0_12] : memref<1x8x32xf32, #tpu.memory_space<vmem>>, vector<1x8x32xf32>
    %25 = vector.shape_cast %24 : vector<1x8x32xf32> to vector<8x32xf32>
    %cst_13 = arith.constant dense<0.000000e+00> : vector<8xf32>
    %26 = vector.multi_reduction <add>, %25, %cst_13 [1] : vector<8x32xf32> to vector<8xf32>
    %27 = vector.shape_cast %26 : vector<8xf32> to vector<8x1xf32>
    %cst_14 = arith.constant 3.200000e+01 : f32
    %28 = vector.broadcast %cst_14 : f32 to vector<8x1xf32>
    %29 = arith.divf %27, %28 : vector<8x1xf32>
    %30 = vector.broadcast %29 : vector<8x1xf32> to vector<8x32xf32>
    %31 = arith.subf %25, %30 : vector<8x32xf32>
    %32 = arith.mulf %31, %31 : vector<8x32xf32>
    %cst_15 = arith.constant dense<0.000000e+00> : vector<8xf32>
    %33 = vector.multi_reduction <add>, %32, %cst_15 [1] : vector<8x32xf32> to vector<8xf32>
    %34 = vector.shape_cast %33 : vector<8xf32> to vector<8x1xf32>
    %cst_16 = arith.constant 3.200000e+01 : f32
    %35 = vector.broadcast %cst_16 : f32 to vector<8x1xf32>
    %36 = arith.divf %34, %35 : vector<8x1xf32>
    %cst_17 = arith.constant 9.99999997E-7 : f32
    %37 = vector.broadcast %cst_17 : f32 to vector<8x1xf32>
    %38 = arith.addf %36, %37 : vector<8x1xf32>
    %39 = math.rsqrt %38 : vector<8x1xf32>
    %40 = vector.broadcast %39 : vector<8x1xf32> to vector<8x32xf32>
    %41 = arith.mulf %31, %40 : vector<8x32xf32>
    %42 = vector.broadcast %0 : vector<1x32xf32> to vector<8x32xf32>
    %43 = arith.mulf %41, %42 : vector<8x32xf32>
    %44 = vector.broadcast %1 : vector<1x32xf32> to vector<8x32xf32>
    %45 = arith.addf %43, %44 : vector<8x32xf32>
    %c0_18 = arith.constant 0 : index
    %c0_19 = arith.constant 0 : index
    %c0_20 = arith.constant 0 : index
    %46 = vector.load %arg6[%c0_18, %c0_19, %c0_20] : memref<1x8x32xf32, #tpu.memory_space<vmem>>, vector<1x8x32xf32>
    %47 = vector.shape_cast %46 : vector<1x8x32xf32> to vector<8x32xf32>
    %cst_21 = arith.constant dense<0.000000e+00> : vector<8xf32>
    %48 = vector.multi_reduction <add>, %47, %cst_21 [1] : vector<8x32xf32> to vector<8xf32>
    %49 = vector.shape_cast %48 : vector<8xf32> to vector<8x1xf32>
    %cst_22 = arith.constant 3.200000e+01 : f32
    %50 = vector.broadcast %cst_22 : f32 to vector<8x1xf32>
    %51 = arith.divf %49, %50 : vector<8x1xf32>
    %52 = vector.broadcast %51 : vector<8x1xf32> to vector<8x32xf32>
    %53 = arith.subf %47, %52 : vector<8x32xf32>
    %54 = arith.mulf %53, %53 : vector<8x32xf32>
    %cst_23 = arith.constant dense<0.000000e+00> : vector<8xf32>
    %55 = vector.multi_reduction <add>, %54, %cst_23 [1] : vector<8x32xf32> to vector<8xf32>
    %56 = vector.shape_cast %55 : vector<8xf32> to vector<8x1xf32>
    %cst_24 = arith.constant 3.200000e+01 : f32
    %57 = vector.broadcast %cst_24 : f32 to vector<8x1xf32>
    %58 = arith.divf %56, %57 : vector<8x1xf32>
    %cst_25 = arith.constant 9.99999997E-7 : f32
    %59 = vector.broadcast %cst_25 : f32 to vector<8x1xf32>
    %60 = arith.addf %58, %59 : vector<8x1xf32>
    %61 = math.rsqrt %60 : vector<8x1xf32>
    %62 = vector.broadcast %61 : vector<8x1xf32> to vector<8x32xf32>
    %63 = arith.mulf %53, %62 : vector<8x32xf32>
    %64 = vector.broadcast %0 : vector<1x32xf32> to vector<8x32xf32>
    %65 = arith.mulf %63, %64 : vector<8x32xf32>
    %66 = vector.broadcast %1 : vector<1x32xf32> to vector<8x32xf32>
    %67 = arith.addf %65, %66 : vector<8x32xf32>
    %c0_26 = arith.constant 0 : index
    %68 = memref.load %arg2[%c0_26] : memref<3xf32, #tpu.memory_space<smem>>
    %c1 = arith.constant 1 : index
    %69 = memref.load %arg2[%c1] : memref<3xf32, #tpu.memory_space<smem>>
    %c2 = arith.constant 2 : index
    %70 = memref.load %arg2[%c2] : memref<3xf32, #tpu.memory_space<smem>>
    %c0_27 = arith.constant 0 : index
    %c0_28 = arith.constant 0 : index
    %71 = vector.load %arg9[%c0_27, %c0_28] : memref<32x32xf32, #tpu.memory_space<vmem>>, vector<32x32xf32>
    %cst_29 = arith.constant dense<0.000000e+00> : vector<8x32xf32>
    %72 = tpu.matmul %67, %71, %cst_29 {dimension_numbers = #tpu.dot_dimension_numbers<[1], [0], [0], [1], [0, 0, 1, 1], [], []>} : vector<8x32xf32>, vector<32x32xf32>, vector<8x32xf32> -> vector<8x32xf32>
    %c0_30 = arith.constant 0 : index
    %c0_31 = arith.constant 0 : index
    %73 = vector.load %arg10[%c0_30, %c0_31] : memref<1x32xf32, #tpu.memory_space<vmem>>, vector<1x32xf32>
    %74 = vector.broadcast %73 : vector<1x32xf32> to vector<8x32xf32>
    %75 = arith.addf %72, %74 : vector<8x32xf32>
    %76 = vector.broadcast %68 : f32 to vector<8x32xf32>
    %77 = arith.mulf %75, %76 : vector<8x32xf32>
    %c0_32 = arith.constant 0 : index
    %c0_33 = arith.constant 0 : index
    %78 = vector.load %arg11[%c0_32, %c0_33] : memref<32x32xf32, #tpu.memory_space<vmem>>, vector<32x32xf32>
    %cst_34 = arith.constant dense<0.000000e+00> : vector<8x32xf32>
    %79 = tpu.matmul %45, %78, %cst_34 {dimension_numbers = #tpu.dot_dimension_numbers<[1], [0], [0], [1], [0, 0, 1, 1], [], []>} : vector<8x32xf32>, vector<32x32xf32>, vector<8x32xf32> -> vector<8x32xf32>
    %c0_35 = arith.constant 0 : index
    %c0_36 = arith.constant 0 : index
    %80 = vector.load %arg12[%c0_35, %c0_36] : memref<1x32xf32, #tpu.memory_space<vmem>>, vector<1x32xf32>
    %81 = vector.broadcast %80 : vector<1x32xf32> to vector<8x32xf32>
    %82 = arith.addf %79, %81 : vector<8x32xf32>
    %83 = vector.broadcast %69 : f32 to vector<8x32xf32>
    %84 = arith.mulf %82, %83 : vector<8x32xf32>
    %c0_37 = arith.constant 0 : index
    %c0_38 = arith.constant 0 : index
    %85 = vector.load %arg13[%c0_37, %c0_38] : memref<32x32xf32, #tpu.memory_space<vmem>>, vector<32x32xf32>
    %cst_39 = arith.constant dense<0.000000e+00> : vector<8x32xf32>
    %86 = tpu.matmul %23, %85, %cst_39 {dimension_numbers = #tpu.dot_dimension_numbers<[1], [0], [0], [1], [0, 0, 1, 1], [], []>} : vector<8x32xf32>, vector<32x32xf32>, vector<8x32xf32> -> vector<8x32xf32>
    %c0_40 = arith.constant 0 : index
    %c0_41 = arith.constant 0 : index
    %87 = vector.load %arg14[%c0_40, %c0_41] : memref<1x32xf32, #tpu.memory_space<vmem>>, vector<1x32xf32>
    %88 = vector.broadcast %87 : vector<1x32xf32> to vector<8x32xf32>
    %89 = arith.addf %86, %88 : vector<8x32xf32>
    %90 = vector.broadcast %70 : f32 to vector<8x32xf32>
    %91 = arith.mulf %89, %90 : vector<8x32xf32>
    %92 = vector.extract_strided_slice %77 {offsets = [0, 0], sizes = [8, 8], strides = [1, 1]} : vector<8x32xf32> to vector<8x8xf32>
    %93 = vector.extract_strided_slice %84 {offsets = [0, 0], sizes = [8, 8], strides = [1, 1]} : vector<8x32xf32> to vector<8x8xf32>
    %94 = vector.extract_strided_slice %91 {offsets = [0, 0], sizes = [8, 8], strides = [1, 1]} : vector<8x32xf32> to vector<8x8xf32>
    %cst_42 = arith.constant dense<0.000000e+00> : vector<8x8xf32>
    %95 = tpu.matmul %92, %93, %cst_42 {dimension_numbers = #tpu.dot_dimension_numbers<[1], [1], [0], [0], [0, 0, 1, 0], [], []>} : vector<8x8xf32>, vector<8x8xf32>, vector<8x8xf32> -> vector<8x8xf32>
    %cst_43 = arith.constant 0.353553385 : f32
    %96 = vector.broadcast %cst_43 : f32 to vector<8x8xf32>
    %97 = arith.mulf %95, %96 : vector<8x8xf32>
    %cst_44 = arith.constant dense<0xFF800000> : vector<8xf32>
    %98 = vector.multi_reduction <maximumf>, %97, %cst_44 [1] : vector<8x8xf32> to vector<8xf32>
    %99 = vector.shape_cast %98 : vector<8xf32> to vector<8x1xf32>
    %100 = vector.broadcast %99 : vector<8x1xf32> to vector<8x8xf32>
    %101 = arith.subf %97, %100 : vector<8x8xf32>
    %102 = math.exp %101 : vector<8x8xf32>
    %cst_45 = arith.constant dense<0.000000e+00> : vector<8xf32>
    %103 = vector.multi_reduction <add>, %102, %cst_45 [1] : vector<8x8xf32> to vector<8xf32>
    %104 = vector.shape_cast %103 : vector<8xf32> to vector<8x1xf32>
    %105 = tpu.reciprocal %104 {approx = true} : vector<8x1xf32> -> vector<8x1xf32>
    %106 = vector.broadcast %105 : vector<8x1xf32> to vector<8x8xf32>
    %107 = arith.mulf %102, %106 : vector<8x8xf32>
    %c0_46 = arith.constant 0 : index
    %c0_47 = arith.constant 0 : index
    %c0_48 = arith.constant 0 : index
    %c0_49 = arith.constant 0 : index
    %108 = vector.load %arg24[%c0_46, %c0_47, %c0_48, %c0_49] : memref<1x4x8x8xf32, #tpu.memory_space<vmem>>, vector<1x1x8x8xf32>
    %109 = vector.shape_cast %108 : vector<1x1x8x8xf32> to vector<8x8xf32>
    %110 = vector.shape_cast %107 : vector<8x8xf32> to vector<1x1x8x8xf32>
    tpu.vector_store %arg24[%c0_46, %c0_47, %c0_48, %c0_49], %110 {strides = array<i32>} : memref<1x4x8x8xf32, #tpu.memory_space<vmem>>, vector<1x1x8x8xf32>,
    %cst_50 = arith.constant dense<0.000000e+00> : vector<8x8xf32>
    %111 = tpu.matmul %107, %94, %cst_50 {dimension_numbers = #tpu.dot_dimension_numbers<[1], [0], [0], [1], [0, 0, 1, 1], [], []>} : vector<8x8xf32>, vector<8x8xf32>, vector<8x8xf32> -> vector<8x8xf32>
    %c0_51 = arith.constant 0 : index
    %c0_52 = arith.constant 0 : index
    %112 = vector.load %arg25[%c0_51, %c0_52] : memref<8x32xf32, #tpu.memory_space<vmem>>, vector<8x8xf32>
    tpu.vector_store %arg25[%c0_51, %c0_52], %111 {strides = array<i32>} : memref<8x32xf32, #tpu.memory_space<vmem>>, vector<8x8xf32>,
    %113 = vector.extract_strided_slice %77 {offsets = [0, 8], sizes = [8, 8], strides = [1, 1]} : vector<8x32xf32> to vector<8x8xf32>
    %114 = vector.extract_strided_slice %84 {offsets = [0, 8], sizes = [8, 8], strides = [1, 1]} : vector<8x32xf32> to vector<8x8xf32>
    %115 = vector.extract_strided_slice %91 {offsets = [0, 8], sizes = [8, 8], strides = [1, 1]} : vector<8x32xf32> to vector<8x8xf32>
    %cst_53 = arith.constant dense<0.000000e+00> : vector<8x8xf32>
    %116 = tpu.matmul %113, %114, %cst_53 {dimension_numbers = #tpu.dot_dimension_numbers<[1], [1], [0], [0], [0, 0, 1, 0], [], []>} : vector<8x8xf32>, vector<8x8xf32>, vector<8x8xf32> -> vector<8x8xf32>
    %cst_54 = arith.constant 0.353553385 : f32
    %117 = vector.broadcast %cst_54 : f32 to vector<8x8xf32>
    %118 = arith.mulf %116, %117 : vector<8x8xf32>
    %cst_55 = arith.constant dense<0xFF800000> : vector<8xf32>
    %119 = vector.multi_reduction <maximumf>, %118, %cst_55 [1] : vector<8x8xf32> to vector<8xf32>
    %120 = vector.shape_cast %119 : vector<8xf32> to vector<8x1xf32>
    %121 = vector.broadcast %120 : vector<8x1xf32> to vector<8x8xf32>
    %122 = arith.subf %118, %121 : vector<8x8xf32>
    %123 = math.exp %122 : vector<8x8xf32>
    %cst_56 = arith.constant dense<0.000000e+00> : vector<8xf32>
    %124 = vector.multi_reduction <add>, %123, %cst_56 [1] : vector<8x8xf32> to vector<8xf32>
    %125 = vector.shape_cast %124 : vector<8xf32> to vector<8x1xf32>
    %126 = tpu.reciprocal %125 {approx = true} : vector<8x1xf32> -> vector<8x1xf32>
    %127 = vector.broadcast %126 : vector<8x1xf32> to vector<8x8xf32>
    %128 = arith.mulf %123, %127 : vector<8x8xf32>
    %c0_57 = arith.constant 0 : index
    %c1_58 = arith.constant 1 : index
    %c0_59 = arith.constant 0 : index
    %c0_60 = arith.constant 0 : index
    %129 = vector.load %arg24[%c0_57, %c1_58, %c0_59, %c0_60] : memref<1x4x8x8xf32, #tpu.memory_space<vmem>>, vector<1x1x8x8xf32>
    %130 = vector.shape_cast %129 : vector<1x1x8x8xf32> to vector<8x8xf32>
    %131 = vector.shape_cast %128 : vector<8x8xf32> to vector<1x1x8x8xf32>
    tpu.vector_store %arg24[%c0_57, %c1_58, %c0_59, %c0_60], %131 {strides = array<i32>} : memref<1x4x8x8xf32, #tpu.memory_space<vmem>>, vector<1x1x8x8xf32>,
    %cst_61 = arith.constant dense<0.000000e+00> : vector<8x8xf32>
    %132 = tpu.matmul %128, %115, %cst_61 {dimension_numbers = #tpu.dot_dimension_numbers<[1], [0], [0], [1], [0, 0, 1, 1], [], []>} : vector<8x8xf32>, vector<8x8xf32>, vector<8x8xf32> -> vector<8x8xf32>
    %c0_62 = arith.constant 0 : index
    %c8 = arith.constant 8 : index
    %133 = vector.load %arg25[%c0_62, %c8] : memref<8x32xf32, #tpu.memory_space<vmem>>, vector<8x8xf32>
    tpu.vector_store %arg25[%c0_62, %c8], %132 {strides = array<i32>} : memref<8x32xf32, #tpu.memory_space<vmem>>, vector<8x8xf32>,
    %134 = vector.extract_strided_slice %77 {offsets = [0, 16], sizes = [8, 8], strides = [1, 1]} : vector<8x32xf32> to vector<8x8xf32>
    %135 = vector.extract_strided_slice %84 {offsets = [0, 16], sizes = [8, 8], strides = [1, 1]} : vector<8x32xf32> to vector<8x8xf32>
    %136 = vector.extract_strided_slice %91 {offsets = [0, 16], sizes = [8, 8], strides = [1, 1]} : vector<8x32xf32> to vector<8x8xf32>
    %cst_63 = arith.constant dense<0.000000e+00> : vector<8x8xf32>
    %137 = tpu.matmul %134, %135, %cst_63 {dimension_numbers = #tpu.dot_dimension_numbers<[1], [1], [0], [0], [0, 0, 1, 0], [], []>} : vector<8x8xf32>, vector<8x8xf32>, vector<8x8xf32> -> vector<8x8xf32>
    %cst_64 = arith.constant 0.353553385 : f32
    %138 = vector.broadcast %cst_64 : f32 to vector<8x8xf32>
    %139 = arith.mulf %137, %138 : vector<8x8xf32>
    %cst_65 = arith.constant dense<0xFF800000> : vector<8xf32>
    %140 = vector.multi_reduction <maximumf>, %139, %cst_65 [1] : vector<8x8xf32> to vector<8xf32>
    %141 = vector.shape_cast %140 : vector<8xf32> to vector<8x1xf32>
    %142 = vector.broadcast %141 : vector<8x1xf32> to vector<8x8xf32>
    %143 = arith.subf %139, %142 : vector<8x8xf32>
    %144 = math.exp %143 : vector<8x8xf32>
    %cst_66 = arith.constant dense<0.000000e+00> : vector<8xf32>
    %145 = vector.multi_reduction <add>, %144, %cst_66 [1] : vector<8x8xf32> to vector<8xf32>
    %146 = vector.shape_cast %145 : vector<8xf32> to vector<8x1xf32>
    %147 = tpu.reciprocal %146 {approx = true} : vector<8x1xf32> -> vector<8x1xf32>
    %148 = vector.broadcast %147 : vector<8x1xf32> to vector<8x8xf32>
    %149 = arith.mulf %144, %148 : vector<8x8xf32>
    %c0_67 = arith.constant 0 : index
    %c2_68 = arith.constant 2 : index
    %c0_69 = arith.constant 0 : index
    %c0_70 = arith.constant 0 : index
    %150 = vector.load %arg24[%c0_67, %c2_68, %c0_69, %c0_70] : memref<1x4x8x8xf32, #tpu.memory_space<vmem>>, vector<1x1x8x8xf32>
    %151 = vector.shape_cast %150 : vector<1x1x8x8xf32> to vector<8x8xf32>
    %152 = vector.shape_cast %149 : vector<8x8xf32> to vector<1x1x8x8xf32>
    tpu.vector_store %arg24[%c0_67, %c2_68, %c0_69, %c0_70], %152 {strides = array<i32>} : memref<1x4x8x8xf32, #tpu.memory_space<vmem>>, vector<1x1x8x8xf32>,
    %cst_71 = arith.constant dense<0.000000e+00> : vector<8x8xf32>
    %153 = tpu.matmul %149, %136, %cst_71 {dimension_numbers = #tpu.dot_dimension_numbers<[1], [0], [0], [1], [0, 0, 1, 1], [], []>} : vector<8x8xf32>, vector<8x8xf32>, vector<8x8xf32> -> vector<8x8xf32>
    %c0_72 = arith.constant 0 : index
    %c16 = arith.constant 16 : index
    %154 = vector.load %arg25[%c0_72, %c16] : memref<8x32xf32, #tpu.memory_space<vmem>>, vector<8x8xf32>
    tpu.vector_store %arg25[%c0_72, %c16], %153 {strides = array<i32>} : memref<8x32xf32, #tpu.memory_space<vmem>>, vector<8x8xf32>,
    %155 = vector.extract_strided_slice %77 {offsets = [0, 24], sizes = [8, 8], strides = [1, 1]} : vector<8x32xf32> to vector<8x8xf32>
    %156 = vector.extract_strided_slice %84 {offsets = [0, 24], sizes = [8, 8], strides = [1, 1]} : vector<8x32xf32> to vector<8x8xf32>
    %157 = vector.extract_strided_slice %91 {offsets = [0, 24], sizes = [8, 8], strides = [1, 1]} : vector<8x32xf32> to vector<8x8xf32>
    %cst_73 = arith.constant dense<0.000000e+00> : vector<8x8xf32>
    %158 = tpu.matmul %155, %156, %cst_73 {dimension_numbers = #tpu.dot_dimension_numbers<[1], [1], [0], [0], [0, 0, 1, 0], [], []>} : vector<8x8xf32>, vector<8x8xf32>, vector<8x8xf32> -> vector<8x8xf32>
    %cst_74 = arith.constant 0.353553385 : f32
    %159 = vector.broadcast %cst_74 : f32 to vector<8x8xf32>
    %160 = arith.mulf %158, %159 : vector<8x8xf32>
    %cst_75 = arith.constant dense<0xFF800000> : vector<8xf32>
    %161 = vector.multi_reduction <maximumf>, %160, %cst_75 [1] : vector<8x8xf32> to vector<8xf32>
    %162 = vector.shape_cast %161 : vector<8xf32> to vector<8x1xf32>
    %163 = vector.broadcast %162 : vector<8x1xf32> to vector<8x8xf32>
    %164 = arith.subf %160, %163 : vector<8x8xf32>
    %165 = math.exp %164 : vector<8x8xf32>
    %cst_76 = arith.constant dense<0.000000e+00> : vector<8xf32>
    %166 = vector.multi_reduction <add>, %165, %cst_76 [1] : vector<8x8xf32> to vector<8xf32>
    %167 = vector.shape_cast %166 : vector<8xf32> to vector<8x1xf32>
    %168 = tpu.reciprocal %167 {approx = true} : vector<8x1xf32> -> vector<8x1xf32>
    %169 = vector.broadcast %168 : vector<8x1xf32> to vector<8x8xf32>
    %170 = arith.mulf %165, %169 : vector<8x8xf32>
    %c0_77 = arith.constant 0 : index
    %c3 = arith.constant 3 : index
    %c0_78 = arith.constant 0 : index
    %c0_79 = arith.constant 0 : index
    %171 = vector.load %arg24[%c0_77, %c3, %c0_78, %c0_79] : memref<1x4x8x8xf32, #tpu.memory_space<vmem>>, vector<1x1x8x8xf32>
    %172 = vector.shape_cast %171 : vector<1x1x8x8xf32> to vector<8x8xf32>
    %173 = vector.shape_cast %170 : vector<8x8xf32> to vector<1x1x8x8xf32>
    tpu.vector_store %arg24[%c0_77, %c3, %c0_78, %c0_79], %173 {strides = array<i32>} : memref<1x4x8x8xf32, #tpu.memory_space<vmem>>, vector<1x1x8x8xf32>,
    %cst_80 = arith.constant dense<0.000000e+00> : vector<8x8xf32>
    %174 = tpu.matmul %170, %157, %cst_80 {dimension_numbers = #tpu.dot_dimension_numbers<[1], [0], [0], [1], [0, 0, 1, 1], [], []>} : vector<8x8xf32>, vector<8x8xf32>, vector<8x8xf32> -> vector<8x8xf32>
    %c0_81 = arith.constant 0 : index
    %c24 = arith.constant 24 : index
    %175 = vector.load %arg25[%c0_81, %c24] : memref<8x32xf32, #tpu.memory_space<vmem>>, vector<8x8xf32>
    tpu.vector_store %arg25[%c0_81, %c24], %174 {strides = array<i32>} : memref<8x32xf32, #tpu.memory_space<vmem>>, vector<8x8xf32>,
    %c0_82 = arith.constant 0 : index
    %c0_83 = arith.constant 0 : index
    %176 = vector.load %arg25[%c0_82, %c0_83] : memref<8x32xf32, #tpu.memory_space<vmem>>, vector<8x32xf32>
    %c0_84 = arith.constant 0 : index
    %c0_85 = arith.constant 0 : index
    %177 = vector.load %arg15[%c0_84, %c0_85] : memref<32x32xf32, #tpu.memory_space<vmem>>, vector<32x32xf32>
    %cst_86 = arith.constant dense<0.000000e+00> : vector<8x32xf32>
    %178 = tpu.matmul %176, %177, %cst_86 {dimension_numbers = #tpu.dot_dimension_numbers<[1], [0], [0], [1], [0, 0, 1, 1], [], []>} : vector<8x32xf32>, vector<32x32xf32>, vector<8x32xf32> -> vector<8x32xf32>
    %c0_87 = arith.constant 0 : index
    %c0_88 = arith.constant 0 : index
    %179 = vector.load %arg16[%c0_87, %c0_88] : memref<1x32xf32, #tpu.memory_space<vmem>>, vector<1x32xf32>
    %180 = vector.broadcast %179 : vector<1x32xf32> to vector<8x32xf32>
    %181 = arith.addf %178, %180 : vector<8x32xf32>
    %c0_89 = arith.constant 0 : index
    %c0_90 = arith.constant 0 : index
    %c0_91 = arith.constant 0 : index
    %182 = vector.load %arg4[%c0_89, %c0_90, %c0_91] : memref<1x8x32xf32, #tpu.memory_space<vmem>>, vector<1x8x32xf32>
    %183 = vector.shape_cast %182 : vector<1x8x32xf32> to vector<8x32xf32>
    %184 = arith.addf %181, %183 : vector<8x32xf32>
    %c0_92 = arith.constant 0 : index
    %c0_93 = arith.constant 0 : index
    %185 = vector.load %arg17[%c0_92, %c0_93] : memref<1x32xf32, #tpu.memory_space<vmem>>, vector<1x32xf32>
    %c0_94 = arith.constant 0 : index
    %c0_95 = arith.constant 0 : index
    %186 = vector.load %arg18[%c0_94, %c0_95] : memref<1x32xf32, #tpu.memory_space<vmem>>, vector<1x32xf32>
    %cst_96 = arith.constant dense<0.000000e+00> : vector<8xf32>
    %187 = vector.multi_reduction <add>, %184, %cst_96 [1] : vector<8x32xf32> to vector<8xf32>
    %188 = vector.shape_cast %187 : vector<8xf32> to vector<8x1xf32>
    %cst_97 = arith.constant 3.200000e+01 : f32
    %189 = vector.broadcast %cst_97 : f32 to vector<8x1xf32>
    %190 = arith.divf %188, %189 : vector<8x1xf32>
    %191 = vector.broadcast %190 : vector<8x1xf32> to vector<8x32xf32>
    %192 = arith.subf %184, %191 : vector<8x32xf32>
    %193 = arith.mulf %192, %192 : vector<8x32xf32>
    %cst_98 = arith.constant dense<0.000000e+00> : vector<8xf32>
    %194 = vector.multi_reduction <add>, %193, %cst_98 [1] : vector<8x32xf32> to vector<8xf32>
    %195 = vector.shape_cast %194 : vector<8xf32> to vector<8x1xf32>
    %cst_99 = arith.constant 3.200000e+01 : f32
    %196 = vector.broadcast %cst_99 : f32 to vector<8x1xf32>
    %197 = arith.divf %195, %196 : vector<8x1xf32>
    %cst_100 = arith.constant 9.99999997E-7 : f32
    %198 = vector.broadcast %cst_100 : f32 to vector<8x1xf32>
    %199 = arith.addf %197, %198 : vector<8x1xf32>
    %200 = math.rsqrt %199 : vector<8x1xf32>
    %201 = vector.broadcast %200 : vector<8x1xf32> to vector<8x32xf32>
    %202 = arith.mulf %192, %201 : vector<8x32xf32>
    %203 = vector.broadcast %185 : vector<1x32xf32> to vector<8x32xf32>
    %204 = arith.mulf %202, %203 : vector<8x32xf32>
    %205 = vector.broadcast %186 : vector<1x32xf32> to vector<8x32xf32>
    %206 = arith.addf %204, %205 : vector<8x32xf32>
    %c0_101 = arith.constant 0 : index
    %c0_102 = arith.constant 0 : index
    %207 = vector.load %arg19[%c0_101, %c0_102] : memref<32x64xf32, #tpu.memory_space<vmem>>, vector<32x64xf32>
    %cst_103 = arith.constant dense<0.000000e+00> : vector<8x64xf32>
    %208 = tpu.matmul %206, %207, %cst_103 {dimension_numbers = #tpu.dot_dimension_numbers<[1], [0], [0], [1], [0, 0, 1, 1], [], []>} : vector<8x32xf32>, vector<32x64xf32>, vector<8x64xf32> -> vector<8x64xf32>
    %c0_104 = arith.constant 0 : index
    %c0_105 = arith.constant 0 : index
    %209 = vector.load %arg20[%c0_104, %c0_105] : memref<1x64xf32, #tpu.memory_space<vmem>>, vector<1x64xf32>
    %210 = vector.broadcast %209 : vector<1x64xf32> to vector<8x64xf32>
    %211 = arith.addf %208, %210 : vector<8x64xf32>
    %cst_106 = arith.constant 0.000000e+00 : f32
    %212 = vector.broadcast %cst_106 : f32 to vector<8x64xf32>
    %213 = arith.maximumf %211, %212 : vector<8x64xf32>
    %c0_107 = arith.constant 0 : index
    %c0_108 = arith.constant 0 : index
    %214 = vector.load %arg21[%c0_107, %c0_108] : memref<64x32xf32, #tpu.memory_space<vmem>>, vector<64x32xf32>
    %cst_109 = arith.constant dense<0.000000e+00> : vector<8x32xf32>
    %215 = tpu.matmul %213, %214, %cst_109 {dimension_numbers = #tpu.dot_dimension_numbers<[1], [0], [0], [1], [0, 0, 1, 1], [], []>} : vector<8x64xf32>, vector<64x32xf32>, vector<8x32xf32> -> vector<8x32xf32>
    %c0_110 = arith.constant 0 : index
    %c0_111 = arith.constant 0 : index
    %216 = vector.load %arg22[%c0_110, %c0_111] : memref<1x32xf32, #tpu.memory_space<vmem>>, vector<1x32xf32>
    %217 = vector.broadcast %216 : vector<1x32xf32> to vector<8x32xf32>
    %218 = arith.addf %215, %217 : vector<8x32xf32>
    %219 = arith.addf %218, %184 : vector<8x32xf32>
    %c0_112 = arith.constant 0 : index
    %c0_113 = arith.constant 0 : index
    %c0_114 = arith.constant 0 : index
    %220 = vector.load %arg23[%c0_112, %c0_113, %c0_114] : memref<1x8x32xf32, #tpu.memory_space<vmem>>, vector<1x8x32xf32>
    %221 = vector.shape_cast %220 : vector<1x8x32xf32> to vector<8x32xf32>
    %222 = vector.shape_cast %219 : vector<8x32xf32> to vector<1x8x32xf32>
    tpu.vector_store %arg23[%c0_112, %c0_113, %c0_114], %222 {strides = array<i32>} : memref<1x8x32xf32, #tpu.memory_space<vmem>>, vector<1x8x32xf32>,
    return
  }
  func.func @transform_0(%arg0: i32, %arg1: i32) -> i32 {
    %c0_i32 = arith.constant 0 : i32
    %c0_i32_0 = arith.constant 0 : i32
    return %c0_i32 : i32
  }
  func.func @transform_1(%arg0: i32, %arg1: i32) -> (i32, i32, i32) {
    %c0_i32 = arith.constant 0 : i32
    %c0_i32_0 = arith.constant 0 : i32
    %c0_i32_1 = arith.constant 0 : i32
    return %arg0, %c0_i32, %c0_i32_0 : i32, i32, i32
  }
  func.func @transform_2(%arg0: i32, %arg1: i32) -> (i32, i32, i32) {
    %c0_i32 = arith.constant 0 : i32
    %c0_i32_0 = arith.constant 0 : i32
    return %arg0, %arg1, %c0_i32 : i32, i32, i32
  }
  func.func @transform_3(%arg0: i32, %arg1: i32) -> (i32, i32, i32) {
    %c0_i32 = arith.constant 0 : i32
    %c0_i32_0 = arith.constant 0 : i32
    %c0_i32_1 = arith.constant 0 : i32
    return %arg0, %c0_i32, %c0_i32_0 : i32, i32, i32
  }
  func.func @transform_4(%arg0: i32, %arg1: i32) -> (i32, i32, i32) {
    %c0_i32 = arith.constant 0 : i32
    %c0_i32_0 = arith.constant 0 : i32
    return %arg0, %arg1, %c0_i32 : i32, i32, i32
  }
  func.func @transform_5(%arg0: i32, %arg1: i32) -> (i32, i32) {
    %c0_i32 = arith.constant 0 : i32
    %c0_i32_0 = arith.constant 0 : i32
    %c0_i32_1 = arith.constant 0 : i32
    return %c0_i32, %c0_i32_0 : i32, i32
  }
  func.func @transform_6(%arg0: i32, %arg1: i32) -> (i32, i32) {
    %c0_i32 = arith.constant 0 : i32
    %c0_i32_0 = arith.constant 0 : i32
    %c0_i32_1 = arith.constant 0 : i32
    return %c0_i32, %c0_i32_0 : i32, i32
  }
  func.func @transform_7(%arg0: i32, %arg1: i32) -> (i32, i32) {
    %c0_i32 = arith.constant 0 : i32
    %c0_i32_0 = arith.constant 0 : i32
    %c0_i32_1 = arith.constant 0 : i32
    return %c0_i32, %c0_i32_0 : i32, i32
  }
  func.func @transform_8(%arg0: i32, %arg1: i32) -> (i32, i32) {
    %c0_i32 = arith.constant 0 : i32
    %c0_i32_0 = arith.constant 0 : i32
    %c0_i32_1 = arith.constant 0 : i32
    return %c0_i32, %c0_i32_0 : i32, i32
  }
  func.func @transform_9(%arg0: i32, %arg1: i32) -> (i32, i32) {
    %c0_i32 = arith.constant 0 : i32
    %c0_i32_0 = arith.constant 0 : i32
    %c0_i32_1 = arith.constant 0 : i32
    return %c0_i32, %c0_i32_0 : i32, i32
  }
  func.func @transform_10(%arg0: i32, %arg1: i32) -> (i32, i32) {
    %c0_i32 = arith.constant 0 : i32
    %c0_i32_0 = arith.constant 0 : i32
    %c0_i32_1 = arith.constant 0 : i32
    return %c0_i32, %c0_i32_0 : i32, i32
  }
  func.func @transform_11(%arg0: i32, %arg1: i32) -> (i32, i32) {
    %c0_i32 = arith.constant 0 : i32
    %c0_i32_0 = arith.constant 0 : i32
    %c0_i32_1 = arith.constant 0 : i32
    return %c0_i32, %c0_i32_0 : i32, i32
  }
  func.func @transform_12(%arg0: i32, %arg1: i32) -> (i32, i32) {
    %c0_i32 = arith.constant 0 : i32
    %c0_i32_0 = arith.constant 0 : i32
    %c0_i32_1 = arith.constant 0 : i32
    return %c0_i32, %c0_i32_0 : i32, i32
  }
  func.func @transform_13(%arg0: i32, %arg1: i32) -> (i32, i32) {
    %c0_i32 = arith.constant 0 : i32
    %c0_i32_0 = arith.constant 0 : i32
    %c0_i32_1 = arith.constant 0 : i32
    return %c0_i32, %c0_i32_0 : i32, i32
  }
  func.func @transform_14(%arg0: i32, %arg1: i32) -> (i32, i32) {
    %c0_i32 = arith.constant 0 : i32
    %c0_i32_0 = arith.constant 0 : i32
    %c0_i32_1 = arith.constant 0 : i32
    return %c0_i32, %c0_i32_0 : i32, i32
  }
  func.func @transform_15(%arg0: i32, %arg1: i32) -> (i32, i32) {
    %c0_i32 = arith.constant 0 : i32
    %c0_i32_0 = arith.constant 0 : i32
    %c0_i32_1 = arith.constant 0 : i32
    return %c0_i32, %c0_i32_0 : i32, i32
  }
  func.func @transform_16(%arg0: i32, %arg1: i32) -> (i32, i32) {
    %c0_i32 = arith.constant 0 : i32
    %c0_i32_0 = arith.constant 0 : i32
    %c0_i32_1 = arith.constant 0 : i32
    return %c0_i32, %c0_i32_0 : i32, i32
  }
  func.func @transform_17(%arg0: i32, %arg1: i32) -> (i32, i32) {
    %c0_i32 = arith.constant 0 : i32
    %c0_i32_0 = arith.constant 0 : i32
    %c0_i32_1 = arith.constant 0 : i32
    return %c0_i32, %c0_i32_0 : i32, i32
  }
  func.func @transform_18(%arg0: i32, %arg1: i32) -> (i32, i32) {
    %c0_i32 = arith.constant 0 : i32
    %c0_i32_0 = arith.constant 0 : i32
    %c0_i32_1 = arith.constant 0 : i32
    return %c0_i32, %c0_i32_0 : i32, i32
  }
  func.func @transform_19(%arg0: i32, %arg1: i32) -> (i32, i32) {
    %c0_i32 = arith.constant 0 : i32
    %c0_i32_0 = arith.constant 0 : i32
    %c0_i32_1 = arith.constant 0 : i32
    return %c0_i32, %c0_i32_0 : i32, i32
  }
  func.func @transform_20(%arg0: i32, %arg1: i32) -> (i32, i32) {
    %c0_i32 = arith.constant 0 : i32
    %c0_i32_0 = arith.constant 0 : i32
    %c0_i32_1 = arith.constant 0 : i32
    return %c0_i32, %c0_i32_0 : i32, i32
  }
  func.func @transform_21(%arg0: i32, %arg1: i32) -> (i32, i32, i32) {
    %c0_i32 = arith.constant 0 : i32
    %c0_i32_0 = arith.constant 0 : i32
    return %arg0, %arg1, %c0_i32 : i32, i32, i32
  }
  func.func @transform_22(%arg0: i32, %arg1: i32) -> (i32, i32, i32, i32) {
    %c0_i32 = arith.constant 0 : i32
    %c0_i32_0 = arith.constant 0 : i32
    %c0_i32_1 = arith.constant 0 : i32
    return %arg0, %c0_i32, %arg1, %c0_i32_0 : i32, i32, i32, i32
  }
}

module attributes {stable_mosaic.version = 11 : i64} {
  func.func @kernel(%arg0: i32, %arg1: i32, %arg2: memref<3xf32, #tpu.memory_space<smem>>, %arg3: memref<1x8x32xf32, #tpu.memory_space<vmem>>, %arg4: memref<1x8x32xf32, #tpu.memory_space<vmem>>, %arg5: memref<1x8x32xf32, #tpu.memory_space<vmem>>, %arg6: memref<1x8x32xf32, #tpu.memory_space<vmem>>, %arg7: memref<1x32xf32, #tpu.memory_space<vmem>>, %arg8: memref<1x32xf32, #tpu.memory_space<vmem>>, %arg9: memref<32x32xf32, #tpu.memory_space<vmem>>, %arg10: memref<1x32xf32, #tpu.memory_space<vmem>>, %arg11: memref<32x32xf32, #tpu.memory_space<vmem>>, %arg12: memref<1x32xf32, #tpu.memory_space<vmem>>, %arg13: memref<32x32xf32, #tpu.memory_space<vmem>>, %arg14: memref<1x32xf32, #tpu.memory_space<vmem>>, %arg15: memref<32x32xf32, #tpu.memory_space<vmem>>, %arg16: memref<1x32xf32, #tpu.memory_space<vmem>>, %arg17: memref<1x32xf32, #tpu.memory_space<vmem>>, %arg18: memref<1x32xf32, #tpu.memory_space<vmem>>, %arg19: memref<32x64xf32, #tpu.memory_space<vmem>>, %arg20: memref<1x64xf32, #tpu.memory_space<vmem>>, %arg21: memref<64x32xf32, #tpu.memory_space<vmem>>, %arg22: memref<1x32xf32, #tpu.memory_space<vmem>>, %arg23: memref<1x8x32xf32, #tpu.memory_space<vmem>>, %arg24: memref<1x4x8x8xf32, #tpu.memory_space<vmem>>, %arg25: memref<8x32xf32, #tpu.memory_space<vmem>>) attributes {dimension_semantics = [#tpu.dimension_semantics<parallel>, #tpu.dimension_semantics<parallel>], iteration_bounds = array<i64: 2, 1>, scalar_prefetch = 0 : i64, scratch_operands = 1 : i64, tpu.core_type = #tpu.core_type<tc>, window_params = [{transform_indices = @transform_0, window_bounds = array<i64: 3>}, {transform_indices = @transform_1, window_bounds = array<i64: 1, 8, 32>}, {transform_indices = @transform_2, window_bounds = array<i64: 1, 8, 32>}, {transform_indices = @transform_3, window_bounds = array<i64: 1, 8, 32>}, {transform_indices = @transform_4, window_bounds = array<i64: 1, 8, 32>}, {pipeline_mode = #tpu.pipeline_mode<synchronous>, transform_indices = @transform_5, window_bounds = array<i64: 1, 32>}, {pipeline_mode = #tpu.pipeline_mode<synchronous>, transform_indices = @transform_6, window_bounds = array<i64: 1, 32>}, {pipeline_mode = #tpu.pipeline_mode<synchronous>, transform_indices = @transform_7, window_bounds = array<i64: 32, 32>}, {pipeline_mode = #tpu.pipeline_mode<synchronous>, transform_indices = @transform_8, window_bounds = array<i64: 1, 32>}, {pipeline_mode = #tpu.pipeline_mode<synchronous>, transform_indices = @transform_9, window_bounds = array<i64: 32, 32>}, {pipeline_mode = #tpu.pipeline_mode<synchronous>, transform_indices = @transform_10, window_bounds = array<i64: 1, 32>}, {pipeline_mode = #tpu.pipeline_mode<synchronous>, transform_indices = @transform_11, window_bounds = array<i64: 32, 32>}, {pipeline_mode = #tpu.pipeline_mode<synchronous>, transform_indices = @transform_12, window_bounds = array<i64: 1, 32>}, {pipeline_mode = #tpu.pipeline_mode<synchronous>, transform_indices = @transform_13, window_bounds = array<i64: 32, 32>}, {pipeline_mode = #tpu.pipeline_mode<synchronous>, transform_indices = @transform_14, window_bounds = array<i64: 1, 32>}, {pipeline_mode = #tpu.pipeline_mode<synchronous>, transform_indices = @transform_15, window_bounds = array<i64: 1, 32>}, {pipeline_mode = #tpu.pipeline_mode<synchronous>, transform_indices = @transform_16, window_bounds = array<i64: 1, 32>}, {pipeline_mode = #tpu.pipeline_mode<synchronous>, transform_indices = @transform_17, window_bounds = array<i64: 32, 64>}, {pipeline_mode = #tpu.pipeline_mode<synchronous>, transform_indices = @transform_18, window_bounds = array<i64: 1, 64>}, {pipeline_mode = #tpu.pipeline_mode<synchronous>, transform_indices = @transform_19, window_bounds = array<i64: 64, 32>}, {pipeline_mode = #tpu.pipeline_mode<synchronous>, transform_indices = @transform_20, window_bounds = array<i64: 1, 32>}, {transform_indices = @transform_21, window_bounds = array<i64: 1, 8, 32>}, {transform_indices = @transform_22, window_bounds = array<i64: 1, 4, 8, 8>}]} {
    %c0 = arith.constant 0 : index
    %c0_0 = arith.constant 0 : index
    %0 = vector.load %arg7[%c0, %c0_0] : memref<1x32xf32, #tpu.memory_space<vmem>>, vector<1x32xf32>
    %c0_1 = arith.constant 0 : index
    %c0_2 = arith.constant 0 : index
    %1 = vector.load %arg8[%c0_1, %c0_2] : memref<1x32xf32, #tpu.memory_space<vmem>>, vector<1x32xf32>
    %c0_3 = arith.constant 0 : index
    %c0_4 = arith.constant 0 : index
    %c0_5 = arith.constant 0 : index
    %2 = vector.load %arg3[%c0_3, %c0_4, %c0_5] : memref<1x8x32xf32, #tpu.memory_space<vmem>>, vector<1x8x32xf32>
    %3 = vector.shape_cast %2 : vector<1x8x32xf32> to vector<8x32xf32>
    %cst = arith.constant dense<0.000000e+00> : vector<8xf32>
    %4 = vector.multi_reduction <add>, %3, %cst [1] : vector<8x32xf32> to vector<8xf32>
    %5 = vector.shape_cast %4 : vector<8xf32> to vector<8x1xf32>
    %cst_6 = arith.constant 3.200000e+01 : f32
    %6 = vector.broadcast %cst_6 : f32 to vector<8x1xf32>
    %7 = arith.divf %5, %6 : vector<8x1xf32>
    %8 = vector.broadcast %7 : vector<8x1xf32> to vector<8x32xf32>
    %9 = arith.subf %3, %8 : vector<8x32xf32>
    %10 = arith.mulf %9, %9 : vector<8x32xf32>
    %cst_7 = arith.constant dense<0.000000e+00> : vector<8xf32>
    %11 = vector.multi_reduction <add>, %10, %cst_7 [1] : vector<8x32xf32> to vector<8xf32>
    %12 = vector.shape_cast %11 : vector<8xf32> to vector<8x1xf32>
    %cst_8 = arith.constant 3.200000e+01 : f32
    %13 = vector.broadcast %cst_8 : f32 to vector<8x1xf32>
    %14 = arith.divf %12, %13 : vector<8x1xf32>
    %cst_9 = arith.constant 9.99999997E-7 : f32
    %15 = vector.broadcast %cst_9 : f32 to vector<8x1xf32>
    %16 = arith.addf %14, %15 : vector<8x1xf32>
    %17 = math.rsqrt %16 : vector<8x1xf32>
    %18 = vector.broadcast %17 : vector<8x1xf32> to vector<8x32xf32>
    %19 = arith.mulf %9, %18 : vector<8x32xf32>
    %20 = vector.broadcast %0 : vector<1x32xf32> to vector<8x32xf32>
    %21 = arith.mulf %19, %20 : vector<8x32xf32>
    %22 = vector.broadcast %1 : vector<1x32xf32> to vector<8x32xf32>
    %23 = arith.addf %21, %22 : vector<8x32xf32>
    %c0_10 = arith.constant 0 : index
    %c0_11 = arith.constant 0 : index
    %c0_12 = arith.constant 0 : index
    %24 = vector.load %arg5[%c0_10, %c0_11, %c0_12] : memref<1x8x32xf32, #tpu.memory_space<vmem>>, vector<1x8x32xf32>
    %25 = vector.shape_cast %24 : vector<1x8x32xf32> to vector<8x32xf32>
    %cst_13 = arith.constant dense<0.000000e+00> : vector<8xf32>
    %26 = vector.multi_reduction <add>, %25, %cst_13 [1] : vector<8x32xf32> to vector<8xf32>
    %27 = vector.shape_cast %26 : vector<8xf32> to vector<8x1xf32>
    %cst_14 = arith.constant 3.200000e+01 : f32
    %28 = vector.broadcast %cst_14 : f32 to vector<8x1xf32>
    %29 = arith.divf %27, %28 : vector<8x1xf32>
    %30 = vector.broadcast %29 : vector<8x1xf32> to vector<8x32xf32>
    %31 = arith.subf %25, %30 : vector<8x32xf32>
    %32 = arith.mulf %31, %31 : vector<8x32xf32>
    %cst_15 = arith.constant dense<0.000000e+00> : vector<8xf32>
    %33 = vector.multi_reduction <add>, %32, %cst_15 [1] : vector<8x32xf32> to vector<8xf32>
    %34 = vector.shape_cast %33 : vector<8xf32> to vector<8x1xf32>
    %cst_16 = arith.constant 3.200000e+01 : f32
    %35 = vector.broadcast %cst_16 : f32 to vector<8x1xf32>
    %36 = arith.divf %34, %35 : vector<8x1xf32>
    %cst_17 = arith.constant 9.99999997E-7 : f32
    %37 = vector.broadcast %cst_17 : f32 to vector<8x1xf32>
    %38 = arith.addf %36, %37 : vector<8x1xf32>
    %39 = math.rsqrt %38 : vector<8x1xf32>
    %40 = vector.broadcast %39 : vector<8x1xf32> to vector<8x32xf32>
    %41 = arith.mulf %31, %40 : vector<8x32xf32>
    %42 = vector.broadcast %0 : vector<1x32xf32> to vector<8x32xf32>
    %43 = arith.mulf %41, %42 : vector<8x32xf32>
    %44 = vector.broadcast %1 : vector<1x32xf32> to vector<8x32xf32>
    %45 = arith.addf %43, %44 : vector<8x32xf32>
    %c0_18 = arith.constant 0 : index
    %c0_19 = arith.constant 0 : index
    %c0_20 = arith.constant 0 : index
    %46 = vector.load %arg6[%c0_18, %c0_19, %c0_20] : memref<1x8x32xf32, #tpu.memory_space<vmem>>, vector<1x8x32xf32>
    %47 = vector.shape_cast %46 : vector<1x8x32xf32> to vector<8x32xf32>
    %cst_21 = arith.constant dense<0.000000e+00> : vector<8xf32>
    %48 = vector.multi_reduction <add>, %47, %cst_21 [1] : vector<8x32xf32> to vector<8xf32>
    %49 = vector.shape_cast %48 : vector<8xf32> to vector<8x1xf32>
    %cst_22 = arith.constant 3.200000e+01 : f32
    %50 = vector.broadcast %cst_22 : f32 to vector<8x1xf32>
    %51 = arith.divf %49, %50 : vector<8x1xf32>
    %52 = vector.broadcast %51 : vector<8x1xf32> to vector<8x32xf32>
    %53 = arith.subf %47, %52 : vector<8x32xf32>
    %54 = arith.mulf %53, %53 : vector<8x32xf32>
    %cst_23 = arith.constant dense<0.000000e+00> : vector<8xf32>
    %55 = vector.multi_reduction <add>, %54, %cst_23 [1] : vector<8x32xf32> to vector<8xf32>
    %56 = vector.shape_cast %55 : vector<8xf32> to vector<8x1xf32>
    %cst_24 = arith.constant 3.200000e+01 : f32
    %57 = vector.broadcast %cst_24 : f32 to vector<8x1xf32>
    %58 = arith.divf %56, %57 : vector<8x1xf32>
    %cst_25 = arith.constant 9.99999997E-7 : f32
    %59 = vector.broadcast %cst_25 : f32 to vector<8x1xf32>
    %60 = arith.addf %58, %59 : vector<8x1xf32>
    %61 = math.rsqrt %60 : vector<8x1xf32>
    %62 = vector.broadcast %61 : vector<8x1xf32> to vector<8x32xf32>
    %63 = arith.mulf %53, %62 : vector<8x32xf32>
    %64 = vector.broadcast %0 : vector<1x32xf32> to vector<8x32xf32>
    %65 = arith.mulf %63, %64 : vector<8x32xf32>
    %66 = vector.broadcast %1 : vector<1x32xf32> to vector<8x32xf32>
    %67 = arith.addf %65, %66 : vector<8x32xf32>
    %c0_26 = arith.constant 0 : index
    %68 = memref.load %arg2[%c0_26] : memref<3xf32, #tpu.memory_space<smem>>
    %c1 = arith.constant 1 : index
    %69 = memref.load %arg2[%c1] : memref<3xf32, #tpu.memory_space<smem>>
    %c2 = arith.constant 2 : index
    %70 = memref.load %arg2[%c2] : memref<3xf32, #tpu.memory_space<smem>>
    %c0_27 = arith.constant 0 : index
    %c0_28 = arith.constant 0 : index
    %71 = vector.load %arg9[%c0_27, %c0_28] : memref<32x32xf32, #tpu.memory_space<vmem>>, vector<32x32xf32>
    %cst_29 = arith.constant dense<0.000000e+00> : vector<8x32xf32>
    %72 = tpu.matmul %67, %71, %cst_29 {dimension_numbers = #tpu.dot_dimension_numbers<[1], [0], [0], [1], [0, 0, 1, 1], [], []>} : vector<8x32xf32>, vector<32x32xf32>, vector<8x32xf32> -> vector<8x32xf32>
    %c0_30 = arith.constant 0 : index
    %c0_31 = arith.constant 0 : index
    %73 = vector.load %arg10[%c0_30, %c0_31] : memref<1x32xf32, #tpu.memory_space<vmem>>, vector<1x32xf32>
    %74 = vector.broadcast %73 : vector<1x32xf32> to vector<8x32xf32>
    %75 = arith.addf %72, %74 : vector<8x32xf32>
    %76 = vector.broadcast %68 : f32 to vector<8x32xf32>
    %77 = arith.mulf %75, %76 : vector<8x32xf32>
    %c0_32 = arith.constant 0 : index
    %c0_33 = arith.constant 0 : index
    %78 = vector.load %arg11[%c0_32, %c0_33] : memref<32x32xf32, #tpu.memory_space<vmem>>, vector<32x32xf32>
    %cst_34 = arith.constant dense<0.000000e+00> : vector<8x32xf32>
    %79 = tpu.matmul %45, %78, %cst_34 {dimension_numbers = #tpu.dot_dimension_numbers<[1], [0], [0], [1], [0, 0, 1, 1], [], []>} : vector<8x32xf32>, vector<32x32xf32>, vector<8x32xf32> -> vector<8x32xf32>
    %c0_35 = arith.constant 0 : index
    %c0_36 = arith.constant 0 : index
    %80 = vector.load %arg12[%c0_35, %c0_36] : memref<1x32xf32, #tpu.memory_space<vmem>>, vector<1x32xf32>
    %81 = vector.broadcast %80 : vector<1x32xf32> to vector<8x32xf32>
    %82 = arith.addf %79, %81 : vector<8x32xf32>
    %83 = vector.broadcast %69 : f32 to vector<8x32xf32>
    %84 = arith.mulf %82, %83 : vector<8x32xf32>
    %c0_37 = arith.constant 0 : index
    %c0_38 = arith.constant 0 : index
    %85 = vector.load %arg13[%c0_37, %c0_38] : memref<32x32xf32, #tpu.memory_space<vmem>>, vector<32x32xf32>
    %cst_39 = arith.constant dense<0.000000e+00> : vector<8x32xf32>
    %86 = tpu.matmul %23, %85, %cst_39 {dimension_numbers = #tpu.dot_dimension_numbers<[1], [0], [0], [1], [0, 0, 1, 1], [], []>} : vector<8x32xf32>, vector<32x32xf32>, vector<8x32xf32> -> vector<8x32xf32>
    %c0_40 = arith.constant 0 : index
    %c0_41 = arith.constant 0 : index
    %87 = vector.load %arg14[%c0_40, %c0_41] : memref<1x32xf32, #tpu.memory_space<vmem>>, vector<1x32xf32>
    %88 = vector.broadcast %87 : vector<1x32xf32> to vector<8x32xf32>
    %89 = arith.addf %86, %88 : vector<8x32xf32>
    %90 = vector.broadcast %70 : f32 to vector<8x32xf32>
    %91 = arith.mulf %89, %90 : vector<8x32xf32>
    %92 = vector.extract_strided_slice %77 {offsets = [0, 0], sizes = [8, 8], strides = [1, 1]} : vector<8x32xf32> to vector<8x8xf32>
    %93 = vector.extract_strided_slice %84 {offsets = [0, 0], sizes = [8, 8], strides = [1, 1]} : vector<8x32xf32> to vector<8x8xf32>
    %94 = vector.extract_strided_slice %91 {offsets = [0, 0], sizes = [8, 8], strides = [1, 1]} : vector<8x32xf32> to vector<8x8xf32>
    %cst_42 = arith.constant dense<0.000000e+00> : vector<8x8xf32>
    %95 = tpu.matmul %92, %93, %cst_42 {dimension_numbers = #tpu.dot_dimension_numbers<[1], [1], [0], [0], [0, 0, 1, 0], [], []>} : vector<8x8xf32>, vector<8x8xf32>, vector<8x8xf32> -> vector<8x8xf32>
    %cst_43 = arith.constant 0.353553385 : f32
    %96 = vector.broadcast %cst_43 : f32 to vector<8x8xf32>
    %97 = arith.mulf %95, %96 : vector<8x8xf32>
    %cst_44 = arith.constant dense<0xFF800000> : vector<8xf32>
    %98 = vector.multi_reduction <maximumf>, %97, %cst_44 [1] : vector<8x8xf32> to vector<8xf32>
    %99 = vector.shape_cast %98 : vector<8xf32> to vector<8x1xf32>
    %100 = vector.broadcast %99 : vector<8x1xf32> to vector<8x8xf32>
    %101 = arith.subf %97, %100 : vector<8x8xf32>
    %102 = math.exp %101 : vector<8x8xf32>
    %cst_45 = arith.constant dense<0.000000e+00> : vector<8xf32>
    %103 = vector.multi_reduction <add>, %102, %cst_45 [1] : vector<8x8xf32> to vector<8xf32>
    %104 = vector.shape_cast %103 : vector<8xf32> to vector<8x1xf32>
    %105 = tpu.reciprocal %104 {approx = true} : vector<8x1xf32> -> vector<8x1xf32>
    %106 = vector.broadcast %105 : vector<8x1xf32> to vector<8x8xf32>
    %107 = arith.mulf %102, %106 : vector<8x8xf32>
    %c0_46 = arith.constant 0 : index
    %c0_47 = arith.constant 0 : index
    %c0_48 = arith.constant 0 : index
    %c0_49 = arith.constant 0 : index
    %108 = vector.load %arg24[%c0_46, %c0_47, %c0_48, %c0_49] : memref<1x4x8x8xf32, #tpu.memory_space<vmem>>, vector<1x1x8x8xf32>
    %109 = vector.shape_cast %108 : vector<1x1x8x8xf32> to vector<8x8xf32>
    %110 = vector.shape_cast %107 : vector<8x8xf32> to vector<1x1x8x8xf32>
    tpu.vector_store %arg24[%c0_46, %c0_47, %c0_48, %c0_49], %110 {strides = array<i32>} : memref<1x4x8x8xf32, #tpu.memory_space<vmem>>, vector<1x1x8x8xf32>,
    %cst_50 = arith.constant dense<0.000000e+00> : vector<8x8xf32>
    %111 = tpu.matmul %107, %94, %cst_50 {dimension_numbers = #tpu.dot_dimension_numbers<[1], [0], [0], [1], [0, 0, 1, 1], [], []>} : vector<8x8xf32>, vector<8x8xf32>, vector<8x8xf32> -> vector<8x8xf32>
    %c0_51 = arith.constant 0 : index
    %c0_52 = arith.constant 0 : index
    %112 = vector.load %arg25[%c0_51, %c0_52] : memref<8x32xf32, #tpu.memory_space<vmem>>, vector<8x8xf32>
    tpu.vector_store %arg25[%c0_51, %c0_52], %111 {strides = array<i32>} : memref<8x32xf32, #tpu.memory_space<vmem>>, vector<8x8xf32>,
    %113 = vector.extract_strided_slice %77 {offsets = [0, 8], sizes = [8, 8], strides = [1, 1]} : vector<8x32xf32> to vector<8x8xf32>
    %114 = vector.extract_strided_slice %84 {offsets = [0, 8], sizes = [8, 8], strides = [1, 1]} : vector<8x32xf32> to vector<8x8xf32>
    %115 = vector.extract_strided_slice %91 {offsets = [0, 8], sizes = [8, 8], strides = [1, 1]} : vector<8x32xf32> to vector<8x8xf32>
    %cst_53 = arith.constant dense<0.000000e+00> : vector<8x8xf32>
    %116 = tpu.matmul %113, %114, %cst_53 {dimension_numbers = #tpu.dot_dimension_numbers<[1], [1], [0], [0], [0, 0, 1, 0], [], []>} : vector<8x8xf32>, vector<8x8xf32>, vector<8x8xf32> -> vector<8x8xf32>
    %cst_54 = arith.constant 0.353553385 : f32
    %117 = vector.broadcast %cst_54 : f32 to vector<8x8xf32>
    %118 = arith.mulf %116, %117 : vector<8x8xf32>
    %cst_55 = arith.constant dense<0xFF800000> : vector<8xf32>
    %119 = vector.multi_reduction <maximumf>, %118, %cst_55 [1] : vector<8x8xf32> to vector<8xf32>
    %120 = vector.shape_cast %119 : vector<8xf32> to vector<8x1xf32>
    %121 = vector.broadcast %120 : vector<8x1xf32> to vector<8x8xf32>
    %122 = arith.subf %118, %121 : vector<8x8xf32>
    %123 = math.exp %122 : vector<8x8xf32>
    %cst_56 = arith.constant dense<0.000000e+00> : vector<8xf32>
    %124 = vector.multi_reduction <add>, %123, %cst_56 [1] : vector<8x8xf32> to vector<8xf32>
    %125 = vector.shape_cast %124 : vector<8xf32> to vector<8x1xf32>
    %126 = tpu.reciprocal %125 {approx = true} : vector<8x1xf32> -> vector<8x1xf32>
    %127 = vector.broadcast %126 : vector<8x1xf32> to vector<8x8xf32>
    %128 = arith.mulf %123, %127 : vector<8x8xf32>
    %c0_57 = arith.constant 0 : index
    %c1_58 = arith.constant 1 : index
    %c0_59 = arith.constant 0 : index
    %c0_60 = arith.constant 0 : index
    %129 = vector.load %arg24[%c0_57, %c1_58, %c0_59, %c0_60] : memref<1x4x8x8xf32, #tpu.memory_space<vmem>>, vector<1x1x8x8xf32>
    %130 = vector.shape_cast %129 : vector<1x1x8x8xf32> to vector<8x8xf32>
    %131 = vector.shape_cast %128 : vector<8x8xf32> to vector<1x1x8x8xf32>
    tpu.vector_store %arg24[%c0_57, %c1_58, %c0_59, %c0_60], %131 {strides = array<i32>} : memref<1x4x8x8xf32, #tpu.memory_space<vmem>>, vector<1x1x8x8xf32>,
    %cst_61 = arith.constant dense<0.000000e+00> : vector<8x8xf32>
    %132 = tpu.matmul %128, %115, %cst_61 {dimension_numbers = #tpu.dot_dimension_numbers<[1], [0], [0], [1], [0, 0, 1, 1], [], []>} : vector<8x8xf32>, vector<8x8xf32>, vector<8x8xf32> -> vector<8x8xf32>
    %c0_62 = arith.constant 0 : index
    %c8 = arith.constant 8 : index
    %133 = vector.load %arg25[%c0_62, %c8] : memref<8x32xf32, #tpu.memory_space<vmem>>, vector<8x8xf32>
    tpu.vector_store %arg25[%c0_62, %c8], %132 {strides = array<i32>} : memref<8x32xf32, #tpu.memory_space<vmem>>, vector<8x8xf32>,
    %134 = vector.extract_strided_slice %77 {offsets = [0, 16], sizes = [8, 8], strides = [1, 1]} : vector<8x32xf32> to vector<8x8xf32>
    %135 = vector.extract_strided_slice %84 {offsets = [0, 16], sizes = [8, 8], strides = [1, 1]} : vector<8x32xf32> to vector<8x8xf32>
    %136 = vector.extract_strided_slice %91 {offsets = [0, 16], sizes = [8, 8], strides = [1, 1]} : vector<8x32xf32> to vector<8x8xf32>
    %cst_63 = arith.constant dense<0.000000e+00> : vector<8x8xf32>
    %137 = tpu.matmul %134, %135, %cst_63 {dimension_numbers = #tpu.dot_dimension_numbers<[1], [1], [0], [0], [0, 0, 1, 0], [], []>} : vector<8x8xf32>, vector<8x8xf32>, vector<8x8xf32> -> vector<8x8xf32>
    %cst_64 = arith.constant 0.353553385 : f32
    %138 = vector.broadcast %cst_64 : f32 to vector<8x8xf32>
    %139 = arith.mulf %137, %138 : vector<8x8xf32>
    %cst_65 = arith.constant dense<0xFF800000> : vector<8xf32>
    %140 = vector.multi_reduction <maximumf>, %139, %cst_65 [1] : vector<8x8xf32> to vector<8xf32>
    %141 = vector.shape_cast %140 : vector<8xf32> to vector<8x1xf32>
    %142 = vector.broadcast %141 : vector<8x1xf32> to vector<8x8xf32>
    %143 = arith.subf %139, %142 : vector<8x8xf32>
    %144 = math.exp %143 : vector<8x8xf32>
    %cst_66 = arith.constant dense<0.000000e+00> : vector<8xf32>
    %145 = vector.multi_reduction <add>, %144, %cst_66 [1] : vector<8x8xf32> to vector<8xf32>
    %146 = vector.shape_cast %145 : vector<8xf32> to vector<8x1xf32>
    %147 = tpu.reciprocal %146 {approx = true} : vector<8x1xf32> -> vector<8x1xf32>
    %148 = vector.broadcast %147 : vector<8x1xf32> to vector<8x8xf32>
    %149 = arith.mulf %144, %148 : vector<8x8xf32>
    %c0_67 = arith.constant 0 : index
    %c2_68 = arith.constant 2 : index
    %c0_69 = arith.constant 0 : index
    %c0_70 = arith.constant 0 : index
    %150 = vector.load %arg24[%c0_67, %c2_68, %c0_69, %c0_70] : memref<1x4x8x8xf32, #tpu.memory_space<vmem>>, vector<1x1x8x8xf32>
    %151 = vector.shape_cast %150 : vector<1x1x8x8xf32> to vector<8x8xf32>
    %152 = vector.shape_cast %149 : vector<8x8xf32> to vector<1x1x8x8xf32>
    tpu.vector_store %arg24[%c0_67, %c2_68, %c0_69, %c0_70], %152 {strides = array<i32>} : memref<1x4x8x8xf32, #tpu.memory_space<vmem>>, vector<1x1x8x8xf32>,
    %cst_71 = arith.constant dense<0.000000e+00> : vector<8x8xf32>
    %153 = tpu.matmul %149, %136, %cst_71 {dimension_numbers = #tpu.dot_dimension_numbers<[1], [0], [0], [1], [0, 0, 1, 1], [], []>} : vector<8x8xf32>, vector<8x8xf32>, vector<8x8xf32> -> vector<8x8xf32>
    %c0_72 = arith.constant 0 : index
    %c16 = arith.constant 16 : index
    %154 = vector.load %arg25[%c0_72, %c16] : memref<8x32xf32, #tpu.memory_space<vmem>>, vector<8x8xf32>
    tpu.vector_store %arg25[%c0_72, %c16], %153 {strides = array<i32>} : memref<8x32xf32, #tpu.memory_space<vmem>>, vector<8x8xf32>,
    %155 = vector.extract_strided_slice %77 {offsets = [0, 24], sizes = [8, 8], strides = [1, 1]} : vector<8x32xf32> to vector<8x8xf32>
    %156 = vector.extract_strided_slice %84 {offsets = [0, 24], sizes = [8, 8], strides = [1, 1]} : vector<8x32xf32> to vector<8x8xf32>
    %157 = vector.extract_strided_slice %91 {offsets = [0, 24], sizes = [8, 8], strides = [1, 1]} : vector<8x32xf32> to vector<8x8xf32>
    %cst_73 = arith.constant dense<0.000000e+00> : vector<8x8xf32>
    %158 = tpu.matmul %155, %156, %cst_73 {dimension_numbers = #tpu.dot_dimension_numbers<[1], [1], [0], [0], [0, 0, 1, 0], [], []>} : vector<8x8xf32>, vector<8x8xf32>, vector<8x8xf32> -> vector<8x8xf32>
    %cst_74 = arith.constant 0.353553385 : f32
    %159 = vector.broadcast %cst_74 : f32 to vector<8x8xf32>
    %160 = arith.mulf %158, %159 : vector<8x8xf32>
    %cst_75 = arith.constant dense<0xFF800000> : vector<8xf32>
    %161 = vector.multi_reduction <maximumf>, %160, %cst_75 [1] : vector<8x8xf32> to vector<8xf32>
    %162 = vector.shape_cast %161 : vector<8xf32> to vector<8x1xf32>
    %163 = vector.broadcast %162 : vector<8x1xf32> to vector<8x8xf32>
    %164 = arith.subf %160, %163 : vector<8x8xf32>
    %165 = math.exp %164 : vector<8x8xf32>
    %cst_76 = arith.constant dense<0.000000e+00> : vector<8xf32>
    %166 = vector.multi_reduction <add>, %165, %cst_76 [1] : vector<8x8xf32> to vector<8xf32>
    %167 = vector.shape_cast %166 : vector<8xf32> to vector<8x1xf32>
    %168 = tpu.reciprocal %167 {approx = true} : vector<8x1xf32> -> vector<8x1xf32>
    %169 = vector.broadcast %168 : vector<8x1xf32> to vector<8x8xf32>
    %170 = arith.mulf %165, %169 : vector<8x8xf32>
    %c0_77 = arith.constant 0 : index
    %c3 = arith.constant 3 : index
    %c0_78 = arith.constant 0 : index
    %c0_79 = arith.constant 0 : index
    %171 = vector.load %arg24[%c0_77, %c3, %c0_78, %c0_79] : memref<1x4x8x8xf32, #tpu.memory_space<vmem>>, vector<1x1x8x8xf32>
    %172 = vector.shape_cast %171 : vector<1x1x8x8xf32> to vector<8x8xf32>
    %173 = vector.shape_cast %170 : vector<8x8xf32> to vector<1x1x8x8xf32>
    tpu.vector_store %arg24[%c0_77, %c3, %c0_78, %c0_79], %173 {strides = array<i32>} : memref<1x4x8x8xf32, #tpu.memory_space<vmem>>, vector<1x1x8x8xf32>,
    %cst_80 = arith.constant dense<0.000000e+00> : vector<8x8xf32>
    %174 = tpu.matmul %170, %157, %cst_80 {dimension_numbers = #tpu.dot_dimension_numbers<[1], [0], [0], [1], [0, 0, 1, 1], [], []>} : vector<8x8xf32>, vector<8x8xf32>, vector<8x8xf32> -> vector<8x8xf32>
    %c0_81 = arith.constant 0 : index
    %c24 = arith.constant 24 : index
    %175 = vector.load %arg25[%c0_81, %c24] : memref<8x32xf32, #tpu.memory_space<vmem>>, vector<8x8xf32>
    tpu.vector_store %arg25[%c0_81, %c24], %174 {strides = array<i32>} : memref<8x32xf32, #tpu.memory_space<vmem>>, vector<8x8xf32>,
    %c0_82 = arith.constant 0 : index
    %c0_83 = arith.constant 0 : index
    %176 = vector.load %arg25[%c0_82, %c0_83] : memref<8x32xf32, #tpu.memory_space<vmem>>, vector<8x32xf32>
    %c0_84 = arith.constant 0 : index
    %c0_85 = arith.constant 0 : index
    %177 = vector.load %arg15[%c0_84, %c0_85] : memref<32x32xf32, #tpu.memory_space<vmem>>, vector<32x32xf32>
    %cst_86 = arith.constant dense<0.000000e+00> : vector<8x32xf32>
    %178 = tpu.matmul %176, %177, %cst_86 {dimension_numbers = #tpu.dot_dimension_numbers<[1], [0], [0], [1], [0, 0, 1, 1], [], []>} : vector<8x32xf32>, vector<32x32xf32>, vector<8x32xf32> -> vector<8x32xf32>
    %c0_87 = arith.constant 0 : index
    %c0_88 = arith.constant 0 : index
    %179 = vector.load %arg16[%c0_87, %c0_88] : memref<1x32xf32, #tpu.memory_space<vmem>>, vector<1x32xf32>
    %180 = vector.broadcast %179 : vector<1x32xf32> to vector<8x32xf32>
    %181 = arith.addf %178, %180 : vector<8x32xf32>
    %c0_89 = arith.constant 0 : index
    %c0_90 = arith.constant 0 : index
    %c0_91 = arith.constant 0 : index
    %182 = vector.load %arg4[%c0_89, %c0_90, %c0_91] : memref<1x8x32xf32, #tpu.memory_space<vmem>>, vector<1x8x32xf32>
    %183 = vector.shape_cast %182 : vector<1x8x32xf32> to vector<8x32xf32>
    %184 = arith.addf %181, %183 : vector<8x32xf32>
    %c0_92 = arith.constant 0 : index
    %c0_93 = arith.constant 0 : index
    %185 = vector.load %arg17[%c0_92, %c0_93] : memref<1x32xf32, #tpu.memory_space<vmem>>, vector<1x32xf32>
    %c0_94 = arith.constant 0 : index
    %c0_95 = arith.constant 0 : index
    %186 = vector.load %arg18[%c0_94, %c0_95] : memref<1x32xf32, #tpu.memory_space<vmem>>, vector<1x32xf32>
    %cst_96 = arith.constant dense<0.000000e+00> : vector<8xf32>
    %187 = vector.multi_reduction <add>, %184, %cst_96 [1] : vector<8x32xf32> to vector<8xf32>
    %188 = vector.shape_cast %187 : vector<8xf32> to vector<8x1xf32>
    %cst_97 = arith.constant 3.200000e+01 : f32
    %189 = vector.broadcast %cst_97 : f32 to vector<8x1xf32>
    %190 = arith.divf %188, %189 : vector<8x1xf32>
    %191 = vector.broadcast %190 : vector<8x1xf32> to vector<8x32xf32>
    %192 = arith.subf %184, %191 : vector<8x32xf32>
    %193 = arith.mulf %192, %192 : vector<8x32xf32>
    %cst_98 = arith.constant dense<0.000000e+00> : vector<8xf32>
    %194 = vector.multi_reduction <add>, %193, %cst_98 [1] : vector<8x32xf32> to vector<8xf32>
    %195 = vector.shape_cast %194 : vector<8xf32> to vector<8x1xf32>
    %cst_99 = arith.constant 3.200000e+01 : f32
    %196 = vector.broadcast %cst_99 : f32 to vector<8x1xf32>
    %197 = arith.divf %195, %196 : vector<8x1xf32>
    %cst_100 = arith.constant 9.99999997E-7 : f32
    %198 = vector.broadcast %cst_100 : f32 to vector<8x1xf32>
    %199 = arith.addf %197, %198 : vector<8x1xf32>
    %200 = math.rsqrt %199 : vector<8x1xf32>
    %201 = vector.broadcast %200 : vector<8x1xf32> to vector<8x32xf32>
    %202 = arith.mulf %192, %201 : vector<8x32xf32>
    %203 = vector.broadcast %185 : vector<1x32xf32> to vector<8x32xf32>
    %204 = arith.mulf %202, %203 : vector<8x32xf32>
    %205 = vector.broadcast %186 : vector<1x32xf32> to vector<8x32xf32>
    %206 = arith.addf %204, %205 : vector<8x32xf32>
    %c0_101 = arith.constant 0 : index
    %c0_102 = arith.constant 0 : index
    %207 = vector.load %arg19[%c0_101, %c0_102] : memref<32x64xf32, #tpu.memory_space<vmem>>, vector<32x64xf32>
    %cst_103 = arith.constant dense<0.000000e+00> : vector<8x64xf32>
    %208 = tpu.matmul %206, %207, %cst_103 {dimension_numbers = #tpu.dot_dimension_numbers<[1], [0], [0], [1], [0, 0, 1, 1], [], []>} : vector<8x32xf32>, vector<32x64xf32>, vector<8x64xf32> -> vector<8x64xf32>
    %c0_104 = arith.constant 0 : index
    %c0_105 = arith.constant 0 : index
    %209 = vector.load %arg20[%c0_104, %c0_105] : memref<1x64xf32, #tpu.memory_space<vmem>>, vector<1x64xf32>
    %210 = vector.broadcast %209 : vector<1x64xf32> to vector<8x64xf32>
    %211 = arith.addf %208, %210 : vector<8x64xf32>
    %cst_106 = arith.constant 0.000000e+00 : f32
    %212 = vector.broadcast %cst_106 : f32 to vector<8x64xf32>
    %213 = arith.maximumf %211, %212 : vector<8x64xf32>
    %c0_107 = arith.constant 0 : index
    %c0_108 = arith.constant 0 : index
    %214 = vector.load %arg21[%c0_107, %c0_108] : memref<64x32xf32, #tpu.memory_space<vmem>>, vector<64x32xf32>
    %cst_109 = arith.constant dense<0.000000e+00> : vector<8x32xf32>
    %215 = tpu.matmul %213, %214, %cst_109 {dimension_numbers = #tpu.dot_dimension_numbers<[1], [0], [0], [1], [0, 0, 1, 1], [], []>} : vector<8x64xf32>, vector<64x32xf32>, vector<8x32xf32> -> vector<8x32xf32>
    %c0_110 = arith.constant 0 : index
    %c0_111 = arith.constant 0 : index
    %216 = vector.load %arg22[%c0_110, %c0_111] : memref<1x32xf32, #tpu.memory_space<vmem>>, vector<1x32xf32>
    %217 = vector.broadcast %216 : vector<1x32xf32> to vector<8x32xf32>
    %218 = arith.addf %215, %217 : vector<8x32xf32>
    %219 = arith.addf %218, %184 : vector<8x32xf32>
    %c0_112 = arith.constant 0 : index
    %c0_113 = arith.constant 0 : index
    %c0_114 = arith.constant 0 : index
    %220 = vector.load %arg23[%c0_112, %c0_113, %c0_114] : memref<1x8x32xf32, #tpu.memory_space<vmem>>, vector<1x8x32xf32>
    %221 = vector.shape_cast %220 : vector<1x8x32xf32> to vector<8x32xf32>
    %222 = vector.shape_cast %219 : vector<8x32xf32> to vector<1x8x32xf32>
    tpu.vector_store %arg23[%c0_112, %c0_113, %c0_114], %222 {strides = array<i32>} : memref<1x8x32xf32, #tpu.memory_space<vmem>>, vector<1x8x32xf32>,
    return
  }
  func.func @transform_0(%arg0: i32, %arg1: i32) -> i32 {
    %c0_i32 = arith.constant 0 : i32
    %c0_i32_0 = arith.constant 0 : i32
    return %c0_i32 : i32
  }
  func.func @transform_1(%arg0: i32, %arg1: i32) -> (i32, i32, i32) {
    %c0_i32 = arith.constant 0 : i32
    %c0_i32_0 = arith.constant 0 : i32
    %c0_i32_1 = arith.constant 0 : i32
    return %arg0, %c0_i32, %c0_i32_0 : i32, i32, i32
  }
  func.func @transform_2(%arg0: i32, %arg1: i32) -> (i32, i32, i32) {
    %c0_i32 = arith.constant 0 : i32
    %c0_i32_0 = arith.constant 0 : i32
    return %arg0, %arg1, %c0_i32 : i32, i32, i32
  }
  func.func @transform_3(%arg0: i32, %arg1: i32) -> (i32, i32, i32) {
    %c0_i32 = arith.constant 0 : i32
    %c0_i32_0 = arith.constant 0 : i32
    %c0_i32_1 = arith.constant 0 : i32
    return %arg0, %c0_i32, %c0_i32_0 : i32, i32, i32
  }
  func.func @transform_4(%arg0: i32, %arg1: i32) -> (i32, i32, i32) {
    %c0_i32 = arith.constant 0 : i32
    %c0_i32_0 = arith.constant 0 : i32
    return %arg0, %arg1, %c0_i32 : i32, i32, i32
  }
  func.func @transform_5(%arg0: i32, %arg1: i32) -> (i32, i32) {
    %c0_i32 = arith.constant 0 : i32
    %c0_i32_0 = arith.constant 0 : i32
    %c0_i32_1 = arith.constant 0 : i32
    return %c0_i32, %c0_i32_0 : i32, i32
  }
  func.func @transform_6(%arg0: i32, %arg1: i32) -> (i32, i32) {
    %c0_i32 = arith.constant 0 : i32
    %c0_i32_0 = arith.constant 0 : i32
    %c0_i32_1 = arith.constant 0 : i32
    return %c0_i32, %c0_i32_0 : i32, i32
  }
  func.func @transform_7(%arg0: i32, %arg1: i32) -> (i32, i32) {
    %c0_i32 = arith.constant 0 : i32
    %c0_i32_0 = arith.constant 0 : i32
    %c0_i32_1 = arith.constant 0 : i32
    return %c0_i32, %c0_i32_0 : i32, i32
  }
  func.func @transform_8(%arg0: i32, %arg1: i32) -> (i32, i32) {
    %c0_i32 = arith.constant 0 : i32
    %c0_i32_0 = arith.constant 0 : i32
    %c0_i32_1 = arith.constant 0 : i32
    return %c0_i32, %c0_i32_0 : i32, i32
  }
  func.func @transform_9(%arg0: i32, %arg1: i32) -> (i32, i32) {
    %c0_i32 = arith.constant 0 : i32
    %c0_i32_0 = arith.constant 0 : i32
    %c0_i32_1 = arith.constant 0 : i32
    return %c0_i32, %c0_i32_0 : i32, i32
  }
  func.func @transform_10(%arg0: i32, %arg1: i32) -> (i32, i32) {
    %c0_i32 = arith.constant 0 : i32
    %c0_i32_0 = arith.constant 0 : i32
    %c0_i32_1 = arith.constant 0 : i32
    return %c0_i32, %c0_i32_0 : i32, i32
  }
  func.func @transform_11(%arg0: i32, %arg1: i32) -> (i32, i32) {
    %c0_i32 = arith.constant 0 : i32
    %c0_i32_0 = arith.constant 0 : i32
    %c0_i32_1 = arith.constant 0 : i32
    return %c0_i32, %c0_i32_0 : i32, i32
  }
  func.func @transform_12(%arg0: i32, %arg1: i32) -> (i32, i32) {
    %c0_i32 = arith.constant 0 : i32
    %c0_i32_0 = arith.constant 0 : i32
    %c0_i32_1 = arith.constant 0 : i32
    return %c0_i32, %c0_i32_0 : i32, i32
  }
  func.func @transform_13(%arg0: i32, %arg1: i32) -> (i32, i32) {
    %c0_i32 = arith.constant 0 : i32
    %c0_i32_0 = arith.constant 0 : i32
    %c0_i32_1 = arith.constant 0 : i32
    return %c0_i32, %c0_i32_0 : i32, i32
  }
  func.func @transform_14(%arg0: i32, %arg1: i32) -> (i32, i32) {
    %c0_i32 = arith.constant 0 : i32
    %c0_i32_0 = arith.constant 0 : i32
    %c0_i32_1 = arith.constant 0 : i32
    return %c0_i32, %c0_i32_0 : i32, i32
  }
  func.func @transform_15(%arg0: i32, %arg1: i32) -> (i32, i32) {
    %c0_i32 = arith.constant 0 : i32
    %c0_i32_0 = arith.constant 0 : i32
    %c0_i32_1 = arith.constant 0 : i32
    return %c0_i32, %c0_i32_0 : i32, i32
  }
  func.func @transform_16(%arg0: i32, %arg1: i32) -> (i32, i32) {
    %c0_i32 = arith.constant 0 : i32
    %c0_i32_0 = arith.constant 0 : i32
    %c0_i32_1 = arith.constant 0 : i32
    return %c0_i32, %c0_i32_0 : i32, i32
  }
  func.func @transform_17(%arg0: i32, %arg1: i32) -> (i32, i32) {
    %c0_i32 = arith.constant 0 : i32
    %c0_i32_0 = arith.constant 0 : i32
    %c0_i32_1 = arith.constant 0 : i32
    return %c0_i32, %c0_i32_0 : i32, i32
  }
  func.func @transform_18(%arg0: i32, %arg1: i32) -> (i32, i32) {
    %c0_i32 = arith.constant 0 : i32
    %c0_i32_0 = arith.constant 0 : i32
    %c0_i32_1 = arith.constant 0 : i32
    return %c0_i32, %c0_i32_0 : i32, i32
  }
  func.func @transform_19(%arg0: i32, %arg1: i32) -> (i32, i32) {
    %c0_i32 = arith.constant 0 : i32
    %c0_i32_0 = arith.constant 0 : i32
    %c0_i32_1 = arith.constant 0 : i32
    return %c0_i32, %c0_i32_0 : i32, i32
  }
  func.func @transform_20(%arg0: i32, %arg1: i32) -> (i32, i32) {
    %c0_i32 = arith.constant 0 : i32
    %c0_i32_0 = arith.constant 0 : i32
    %c0_i32_1 = arith.constant 0 : i32
    return %c0_i32, %c0_i32_0 : i32, i32
  }
  func.func @transform_21(%arg0: i32, %arg1: i32) -> (i32, i32, i32) {
    %c0_i32 = arith.constant 0 : i32
    %c0_i32_0 = arith.constant 0 : i32
    return %arg0, %arg1, %c0_i32 : i32, i32, i32
  }
  func.func @transform_22(%arg0: i32, %arg1: i32) -> (i32, i32, i32, i32) {
    %c0_i32 = arith.constant 0 : i32
    %c0_i32_0 = arith.constant 0 : i32
    %c0_i32_1 = arith.constant 0 : i32
    return %arg0, %c0_i32, %arg1, %c0_i32_0 : i32, i32, i32, i32
  }
}

</mosaic_0001>

<bundles_post_ra>
// kernel: tpu_custom_call.1
= control target key start
LH: loop header
LB: loop body
LE: loop exit
PB: predicated region body
PF: predicated region fallthrough
CT: control target
= control target key end

     0   :  { %s4546_s0 = inlined_call_operand.hbm [shape: f32[3], index: 0, kind: input, shape index: {}]   ;;  %s4547_s1 = inlined_call_operand.hbm [shape: f32[2,8,32], index: 1, kind: input, shape index: {}]   ;;  %s4548_s2 = inlined_call_operand.hbm [shape: f32[2,8,32], index: 2, kind: input, shape index: {}]   ;;  %s4549_s3 = inlined_call_operand.hbm [shape: f32[2,8,32], index: 3, kind: input, shape index: {}]   ;;  %s4550_s4 = inlined_call_operand.hbm [shape: f32[2,8,32], index: 4, kind: input, shape index: {}]   ;;  %s4551_s5 = inlined_call_operand.hbm [shape: f32[1,32], index: 5, kind: input, shape index: {}]   ;;  %s4552_s6 = inlined_call_operand.hbm [shape: f32[1,32], index: 6, kind: input, shape index: {}]   ;;  %s4553_s7 = inlined_call_operand.vmem [shape: f32[32,32], index: 7, kind: input, shape index: {}]   ;;  %s4554_s8 = inlined_call_operand.hbm [shape: f32[1,32], index: 8, kind: input, shape index: {}]   ;;  %s4555_s9 = inlined_call_operand.vmem [shape: f32[32,32], index: 9, kind: input, shape index: {}]   ;;  %s4556_s10 = inlined_call_operand.hbm [shape: f32[1,32], index: 10, kind: input, shape index: {}]   ;;  %s4557_s11 = inlined_call_operand.vmem [shape: f32[32,32], index: 11, kind: input, shape index: {}]   ;;  %s4558_s12 = inlined_call_operand.hbm [shape: f32[1,32], index: 12, kind: input, shape index: {}]   ;;  %s4559_s13 = inlined_call_operand.vmem [shape: f32[32,32], index: 13, kind: input, shape index: {}]   ;;  %s4560_s14 = inlined_call_operand.hbm [shape: f32[1,32], index: 14, kind: input, shape index: {}]   ;;  %s4561_s15 = inlined_call_operand.hbm [shape: f32[1,32], index: 15, kind: input, shape index: {}]   ;;  %s4562_s16 = inlined_call_operand.hbm [shape: f32[1,32], index: 16, kind: input, shape index: {}]   ;;  %s4563_s17 = inlined_call_operand.hbm [shape: f32[32,64], index: 17, kind: input, shape index: {}]   ;;  %s4564_s18 = inlined_call_operand.vmem [shape: f32[1,64], index: 18, kind: input, shape index: {}]   ;;  %s4565_s19 = inlined_call_operand.vmem [shape: f32[64,32], index: 19, kind: input, shape index: {}]   ;;  %s4566_s20 = inlined_call_operand.vmem [shape: f32[1,32], index: 20, kind: input, shape index: {}]   ;;  %s4567_s21 = inlined_call_operand.hbm [shape: f32[2,8,32], index: 21, kind: output, shape index: {0}]   ;;  %s4568_s22 = inlined_call_operand.hbm [shape: f32[2,4,8,8], index: 22, kind: output, shape index: {1}]  }
   0x1   :  { %4609 = sst [smem:[#allocation46_spill]] %s4546_s0 }
   0x2   :  { %4610 = sst [smem:[#allocation47_spill]] %s4547_s1 }
   0x3   :  { %4611 = sst [smem:[#allocation48_spill]] %s4548_s2 }
   0x4   :  { %4612 = sst [smem:[#allocation49_spill]] %s4549_s3 }
   0x5   :  { %4613 = sst [smem:[#allocation50_spill]] %s4550_s4 }
   0x6   :  { %4614 = sst [smem:[#allocation51_spill]] %s4551_s5 }
   0x7   :  { %4615 = sst [smem:[#allocation52_spill]] %s4552_s6 }
   0x8   :  { %4616 = sst [smem:[#allocation53_spill]] %s4553_s7 }
   0x9   :  { %4617 = sst [smem:[#allocation54_spill]] %s4554_s8 }
   0xa   :  { %4618 = sst [smem:[#allocation55_spill]] %s4555_s9 }
   0xb   :  { %4619 = sst [smem:[#allocation56_spill]] %s4556_s10 }
   0xc   :  { %4620 = sst [smem:[#allocation57_spill]] %s4557_s11 }
   0xd   :  { %4621 = sst [smem:[#allocation58_spill]] %s4559_s13 }
   0xe   :  { %4622 = sst [smem:[#allocation59_spill]] %s4560_s14 }
   0xf   :  { %4623 = sst [smem:[#allocation60_spill]] %s4562_s16 }
  0x10   :  { %4624 = sst [smem:[#allocation61_spill]] %s4564_s18 }
  0x11   :  { %4625 = sst [smem:[#allocation62_spill]] %s4565_s19 }
  0x12   :  { %4626 = sst [smem:[#allocation63_spill]] %s4566_s20 }
  0x13   :  { %4627 = sst [smem:[#allocation64_spill]] %s4567_s21 }
  0x14   :  { %4628 = sst [smem:[#allocation65_spill]] %s4568_s22 }
  0x15   :  { %28 = vsyncpa [#allocation6], 0 }
  0x16   :  { %29 = vsyncpa [#allocation4], 0 }
  0x17   :  { %31 = vsyncpa [#allocation4 + $0x1], 0 }
  0x18   :  { %32 = vsyncpa [#allocation9], 0 }
  0x19   :  { %34 = vsyncpa [#allocation9 + $0x1], 0 }
  0x1a   :  { %35 = vsyncpa [#allocation12], 0 }
  0x1b   :  { %37 = vsyncpa [#allocation12 + $0x1], 0 }
  0x1c   :  { %38 = vsyncpa [#allocation15], 0 }
  0x1d   :  { %39 = vsyncpa [#allocation18], 0 }
  0x1e   :  { %40 = vsyncpa [#allocation21], 0 }
  0x1f   :  { %41 = vsyncpa [#allocation24], 0 }
  0x20   :  { %42 = vsyncpa [#allocation5], 0 }
  0x21   :  { %44 = vsyncpa [#allocation5 + $0x1], 0 }
  0x22   :  { %45 = vsyncpa [#allocation28], 0 }
  0x23   :  { %47 = vsyncpa [#allocation28 + $0x1], 0  ;;  %s3766_s3 = smov 0   ;;  %s3768_s28 = smov 0  }
  0x24   :  { %s3770_s29 = smov 0   ;;  %s3772_s30 = smov 0  }
  0x25   :  { %s3774_s4 = smov 0   ;;  %s3776_s0 = smov 0  }
  0x26 LB: > { %4629 = sst [smem:[#allocation40_spill]] %s3601_s3  ;;  %s3623_s23 = smov [#allocation13]   ;;  %s3621_s0 = sphi %s3776_s0, %s53_s0   ;;  %s3617_s4 = sphi %s3774_s4, %s4699_s4   ;;  %s3613_s30 = sphi %s3772_s30, %s4698_s30   ;;  %s3609_s29 = sphi %s3770_s29, %s4702_s29   ;;  %s3605_s28 = sphi %s3768_s28, %s4701_s28   ;;  %s3601_s3 = sphi %s3766_s3, %s4700_s3  }
  0x27   : > { %4630 = sst [smem:[#allocation41_spill]] %s3613_s30  ;;  %s613_s1 = sshll.u32 %s3623_s23, 4  ;;  %s3802_s1 = int_to_ptr.vmem [resolvable:$true] %s613_s1 }
  0x28   : > { %4631 = sst [smem:[#allocation42_spill]] %s3617_s4  ;;  %s3797_s5 = sadd.s32 4294967295, %s3621_s0  }
  0x29   : > { %p2587_p0 = scmp.ge.s32.totalorder %s3621_s0, 1  ;;  %p4584_p1 = scmp.eq.s32.totalorder %s3797_s5, 0 }
  0x2a   : > { %p591_p2 = scmp.lt.s32.totalorder %s3621_s0, 3  ;;  %s3624_s6 = smov [#allocation14]  }
  0x2b   : > { %s624_s25 = sshll.u32 %s3624_s6, 4  ;;  %s3625_s26 = smov [#allocation17]   ;;  %s3811_s25 = int_to_ptr.vmem [resolvable:$true] %s624_s25 }
  0x2c   : > { %p3804_p3 = pnand %p2587_p0, %p591_p2  ;;  %s652_s2 = sshll.u32 %s3625_s26, 4  ;;  %s3819_s2 = int_to_ptr.vmem [resolvable:$true] %s652_s2 }
  0x2d   : > { %s3626_s23 = smov [#allocation20]   ;;  %s4634_s18 = sld [smem:[#allocation51_spill]] }
  0x2e   : > { %s4632_s24 = scalar_select %p3804_p3, 1, 0 }
  0x2f   : > { %p2923_p5 = pneg %p3804_p3  ;;  %s3821_s21 = sshll.u32 %s3626_s23, 4  ;;  %s681_s21 = int_to_ptr.vmem [resolvable:$true] %s3821_s21 }
  0x31   : > { %p3815_p6 = pnand %p2923_p5, %p4584_p1 }
  0x33   : > { %s4633_s27 = scalar_select %p3815_p6, 1, 0 }
  0x34   : > { %s3090_s30 = scalar_lea.hbm %s4634_s18, 16  ;;  %p3831_p8 = pneg %p3815_p6 }
  0x35   : > { %p3091_p7 = scmp.ne.s32.totalorder %s4634_s18, %s3090_s30  ;;  %p3097_p11 = scmp.lt.u32.totalorder %s3090_s30, %s4634_s18 }
  0x36   : > { %s4635_s26 = scalar_select %p3831_p8, 1, 0 }
  0x37   : > { %p3093_p9 = pnand %p3831_p8, %p3091_p7 }
  0x39   : > { %p3094_p10 = pneg %p3093_p9 }
  0x3b   : > { %p3099_p12 = pnand %p3097_p11, %p3094_p10 }
  0x3d   : > { %3102 = shalt.err (!%p3099_p12)
}
  0x3e   : > { %s3103_s19 = scalar_lea.vmem %s3802_s1, 16  ;;  %s3110_s20 = scalar_lea.vmem %s3802_s1, 32 }
  0x3f   : > { %p3104_p13 = scmp.ne.s32.totalorder %s3802_s1, %s3103_s19  ;;  %p3111_p5 = scmp.lt.s32.totalorder %s3802_s1, %s3802_s1 }
  0x40   : > { %p3112_p7 = scmp.lt.s32.totalorder %s3110_s20, %s3103_s19 }
  0x41   : > { %p3106_p0 = pnand %p3104_p13, %p3831_p8 }
  0x42   : > { %p3113_p9 = por %p3112_p7, %p3111_p5 }
  0x43   : > { %p3107_p2 = pneg %p3106_p0 }
  0x45   : > { %p3114_p4 = pnand %p3113_p9, %p3107_p2 }
  0x47   : > { %3117 = shalt.err (!%p3114_p4)
}
  0x48   : > { %2929 = dma.hbm_to_vmem [thread:$0]  (!%p3815_p6), %s4634_s18, 16, %s3802_s1, [#allocation12]  }
  0x49   : > { %s4636_s23 = sld [smem:[#allocation52_spill]] }
  0x4f   : > { %s3118_s9 = scalar_lea.hbm %s4636_s23, 16 }
  0x50   : > { %p3119_p10 = scmp.ne.s32.totalorder %s4636_s23, %s3118_s9  ;;  %p3125_p4 = scmp.lt.u32.totalorder %s3118_s9, %s4636_s23 }
  0x52   : > { %p3121_p11 = pnand %p3119_p10, %p3831_p8 }
  0x54   : > { %p3122_p12 = pneg %p3121_p11 }
  0x56   : > { %p3127_p13 = pnand %p3125_p4, %p3122_p12 }
  0x58   : > { %3130 = shalt.err (!%p3127_p13)
}
  0x59   : > { %s3131_s1 = scalar_lea.vmem %s3811_s25, 16  ;;  %s3138_s7 = scalar_lea.vmem %s3811_s25, 32 }
  0x5a   : > { %p3132_p0 = scmp.ne.s32.totalorder %s3811_s25, %s3131_s1  ;;  %p3139_p7 = scmp.lt.s32.totalorder %s3811_s25, %s3811_s25 }
  0x5b   : > { %p3140_p9 = scmp.lt.s32.totalorder %s3138_s7, %s3131_s1 }
  0x5c   : > { %p3134_p2 = pnand %p3132_p0, %p3831_p8 }
  0x5d   : > { %p3141_p10 = por %p3140_p9, %p3139_p7 }
  0x5e   : > { %p3135_p5 = pneg %p3134_p2 }
  0x60   : > { %p3142_p11 = pnand %p3141_p10, %p3135_p5 }
  0x62   : > { %3145 = shalt.err (!%p3142_p11)
}
  0x63   : > { %2932 = dma.hbm_to_vmem [thread:$0]  (!%p3815_p6), %s4636_s23, 16, %s3811_s25, [#allocation15]  }
  0x64   : > { %s4637_s10 = sld [smem:[#allocation56_spill]] }
  0x6a   : > { %s3146_s30 = scalar_lea.hbm %s4637_s10, 16 }
  0x6b   : > { %p3147_p12 = scmp.ne.s32.totalorder %s4637_s10, %s3146_s30  ;;  %p3153_p0 = scmp.lt.u32.totalorder %s3146_s30, %s4637_s10 }
  0x6d   : > { %p3149_p4 = pnand %p3147_p12, %p3831_p8 }
  0x6f   : > { %p3150_p13 = pneg %p3149_p4 }
  0x71   : > { %p3155_p2 = pnand %p3153_p0, %p3150_p13 }
  0x73   : > { %3158 = shalt.err (!%p3155_p2)
}
  0x74   : > { %s3159_s25 = scalar_lea.vmem %s3819_s2, 16  ;;  %s3166_s7 = scalar_lea.vmem %s3819_s2, 32 }
  0x75   : > { %p3160_p5 = scmp.ne.s32.totalorder %s3819_s2, %s3159_s25  ;;  %p3167_p10 = scmp.lt.s32.totalorder %s3819_s2, %s3819_s2 }
  0x76   : > { %p3168_p11 = scmp.lt.s32.totalorder %s3166_s7, %s3159_s25 }
  0x77   : > { %p3162_p7 = pnand %p3160_p5, %p3831_p8 }
  0x78   : > { %p3169_p12 = por %p3168_p11, %p3167_p10 }
  0x79   : > { %p3163_p9 = pneg %p3162_p7 }
  0x7b   : > { %p3170_p4 = pnand %p3169_p12, %p3163_p9 }
  0x7d   : > { %3173 = shalt.err (!%p3170_p4)
}
  0x7e   : > { %2938 = dma.hbm_to_vmem [thread:$0]  (!%p3815_p6), %s4637_s10, 16, %s3819_s2, [#allocation18]  }
  0x7f   : > { %s3627_s13 = smov [#allocation23]   ;;  %s4638_s14 = sld [smem:[#allocation59_spill]] }
  0x80   : > { %s702_s22 = sshll.u32 %s3627_s13, 4  ;;  %s703_s22 = int_to_ptr.vmem [resolvable:$true] %s702_s22 }
  0x85   : > { %s3174_s19 = scalar_lea.hbm %s4638_s14, 16 }
  0x86   : > { %p3175_p13 = scmp.ne.s32.totalorder %s4638_s14, %s3174_s19  ;;  %p3181_p5 = scmp.lt.u32.totalorder %s3174_s19, %s4638_s14 }
  0x88   : > { %p3177_p0 = pnand %p3175_p13, %p3831_p8 }
  0x8a   : > { %p3178_p2 = pneg %p3177_p0 }
  0x8c   : > { %p3183_p7 = pnand %p3181_p5, %p3178_p2 }
  0x8e   : > { %3186 = shalt.err (!%p3183_p7)
}
  0x8f   : > { %s3187_s2 = scalar_lea.vmem %s681_s21, 16  ;;  %s3194_s9 = scalar_lea.vmem %s681_s21, 32 }
  0x90   : > { %p3188_p9 = scmp.ne.s32.totalorder %s681_s21, %s3187_s2  ;;  %p3195_p12 = scmp.lt.s32.totalorder %s681_s21, %s681_s21 }
  0x91   : > { %p3196_p4 = scmp.lt.s32.totalorder %s3194_s9, %s3187_s2 }
  0x92   : > { %p3190_p10 = pnand %p3188_p9, %p3831_p8 }
  0x93   : > { %p3197_p1 = por %p3196_p4, %p3195_p12 }
  0x94   : > { %p3191_p11 = pneg %p3190_p10 }
  0x96   : > { %p3198_p3 = pnand %p3197_p1, %p3191_p11 }
  0x98   : > { %3201 = shalt.err (!%p3198_p3)
}
  0x99   : > { %2944 = dma.hbm_to_vmem [thread:$0]  (!%p3815_p6), %s4638_s14, 16, %s681_s21, [#allocation21]  }
  0x9a   : > { %s4639_s16 = sld [smem:[#allocation60_spill]] }
  0xa0   : > { %s3202_s19 = scalar_lea.hbm %s4639_s16, 16 }
  0xa1   : > { %p3203_p13 = scmp.ne.s32.totalorder %s4639_s16, %s3202_s19  ;;  %p3209_p3 = scmp.lt.u32.totalorder %s3202_s19, %s4639_s16 }
  0xa3   : > { %p3205_p0 = pnand %p3203_p13, %p3831_p8 }
  0xa5   : > { %p3206_p1 = pneg %p3205_p0 }
  0xa7   : > { %p3211_p2 = pnand %p3209_p3, %p3206_p1 }
  0xa9   : > { %3214 = shalt.err (!%p3211_p2)
}
  0xaa   : > { %s3215_s2 = scalar_lea.vmem %s703_s22, 16  ;;  %s3222_s21 = scalar_lea.vmem %s703_s22, 32 }
  0xab   : > { %p3216_p5 = scmp.ne.s32.totalorder %s703_s22, %s3215_s2  ;;  %p3223_p10 = scmp.lt.s32.totalorder %s703_s22, %s703_s22 }
  0xac   : > { %p3224_p11 = scmp.lt.s32.totalorder %s3222_s21, %s3215_s2 }
  0xad   : > { %p3218_p7 = pnand %p3216_p5, %p3831_p8 }
  0xae   : > { %p3225_p12 = por %p3224_p11, %p3223_p10 }
  0xaf   : > { %p3219_p9 = pneg %p3218_p7 }
  0xb1   : > { %p3226_p4 = pnand %p3225_p12, %p3219_p9 }
  0xb3   : > { %3229 = shalt.err (!%p3226_p4)
}
  0xb4   : > { %2950 = dma.hbm_to_vmem [thread:$0]  (!%p3815_p6), %s4639_s16, 16, %s703_s22, [#allocation24]  }
  0xb5   : > { %s2586_s13 = sadd.s32 4294967294, %s3621_s0   ;;  %s65_s30 = sadd.s32 1, %s3617_s4 }
  0xb6   : > { %s93_s6 = sadd.s32 1, %s3609_s29  ;;  %p67_p13 = scmp.ge.s32.totalorder %s65_s30, 2 }
  0xb7   : > { %p100_p0 = scmp.ne.s32.totalorder %s3609_s29, %s3605_s28  ;;  %p101_p1 = scmp.eq.s32.totalorder %s3621_s0, 0 }
  0xb8   : > { %p106_p3 = scmp.ne.s32.totalorder %s3605_s28, %s3601_s3  ;;  %s4704_s30 = smov (%p67_p13, %s65_s30), 0 }
  0xb9   : > { %4640 = sst [smem:[#allocation43_spill]] %s4704_s30  ;;  %p3948_p2 = por %p101_p1, %p100_p0 }
  0xba   : > { %p4642_p5 = scmp.eq.s32.totalorder %s3797_s5, 0  ;;  %s90_s20 = ssub.s32 %s3617_s4, %s4704_s30 }
  0xbb   : > { %p550_p9 = scmp.eq.s32.totalorder %s3797_s5, 1  ;;  %p91_p10 = scmp.eq.s32.totalorder %s90_s20, 0 }
  0xbc   : > { %p3954_p7 = por %p4642_p5, %p106_p3  ;;  %p556_p11 = scmp.eq.s32.totalorder %s2586_s13, 1 }
  0xbd   : > { %p3961_p12 = por %p550_p9, %p100_p0  ;;  %p2984_p4 = scmp.lt.s32.totalorder %s3621_s0, 2 }
  0xbe   : > { %s4643_s22 = scalar_select %p3954_p7, 1, 0 }
  0xbf   : > { %s4644_s1 = scalar_select %p3961_p12, 1, 0 }
  0xc0   : > { %s3967_s25 = scalar_select %p91_p10, %s3609_s29, %s93_s6  }
  0xc1   : > { %p3969_p13 = por %p556_p11, %p106_p3  ;;  %s4586_s2 = sand.u32 1, %s3609_s29  }
  0xc2   : > { %4645 = sst [smem:[#allocation44_spill]] %s3967_s25  ;;  %s3976_s21 = sshll.u32 %s4586_s2, 3 }
  0xc3   : > { %s4646_s7 = scalar_select %p3969_p13, 1, 0 }
  0xc4   : > { %s3979_s9 = sshll.u32 %s3617_s4, 7  ;;  %p3983_p0 = pnand %p2984_p4, %p3948_p2 }
  0xc5   : > { %4647 = sst [smem:[#allocation45_spill]] %s4646_s7  ;;  %s4592_s13 = sand.u32 1, %s3621_s0  }
  0xc6   : > { %s4648_s11 = scalar_select %p3983_p0, 1, 0 }
  0xc7   : > { %s4649_s10 = sld [smem:[#allocation48_spill]]  ;;  %s757_s2 = scalar_lea.vmem [#allocation8], %s3976_s21 }
  0xc8   : > { %s765_s16 = sshll.u32 %s757_s2, 4  ;;  %s3999_s19 = scalar_lea.sflag [#allocation9], %s4592_s13  ;;  %s3995_s16 = int_to_ptr.vmem [resolvable:$true] %s765_s16 }
  0xc9   : > { %p4005_p3 = pneg %p3983_p0 }
  0xcb   : > { %s4650_s23 = scalar_select %p4005_p3, 1, 0 }
  0xcd   : > { %s3992_s14 = scalar_lea.hbm %s4649_s10, %s3979_s9  ;;  %s3235_s2 = scalar_lea.hbm %s4649_s10, 256 }
  0xce   : > { %s3230_s18 = scalar_lea.hbm %s3992_s14, 128  ;;  %p3236_p9 = scmp.lt.u32.totalorder %s3992_s14, %s4649_s10 }
  0xcf   : > { %p3231_p1 = scmp.ne.s32.totalorder %s3992_s14, %s3230_s18  ;;  %p3237_p10 = scmp.lt.u32.totalorder %s3235_s2, %s3230_s18 }
  0xd0   : > { %p3239_p4 = scmp.lt.u32.totalorder %s3230_s18, %s3992_s14 }
  0xd1   : > { %p3233_p2 = pnand %p4005_p3, %p3231_p1  ;;  %p3238_p11 = por %p3237_p10, %p3236_p9 }
  0xd3   : > { %p3234_p5 = pneg %p3233_p2  ;;  %p3240_p13 = por %p3239_p4, %p3238_p11 }
  0xd5   : > { %p3241_p12 = pnand %p3240_p13, %p3234_p5 }
  0xd7   : > { %3244 = shalt.err (!%p3241_p12)
}
  0xd8   : > { %s3245_s13 = scalar_lea.vmem %s3995_s16, 128  ;;  %s3628_s6 = smov [#allocation8]  }
  0xd9   : > { %p3246_p1 = scmp.ne.s32.totalorder %s3995_s16, %s3245_s13  ;;  %s3250_s20 = sshll.u32 %s3628_s6, 4  ;;  %s3251_s20 = int_to_ptr.vmem [resolvable:$false] %s3250_s20 }
  0xda   : > { %s3252_s4 = scalar_lea.vmem %s3251_s20, 256  ;;  %p3253_p6 = scmp.lt.s32.totalorder %s3995_s16, %s3251_s20 }
  0xdb   : > { %p3248_p2 = pnand %p3246_p1, %p4005_p3  ;;  %p3254_p8 = scmp.lt.s32.totalorder %s3252_s4, %s3245_s13 }
  0xdd   : > { %p3249_p7 = pneg %p3248_p2  ;;  %p3255_p9 = por %p3254_p8, %p3253_p6 }
  0xdf   : > { %p3256_p10 = pnand %p3255_p9, %p3249_p7 }
  0xe1   : > { %3259 = shalt.err (!%p3256_p10)
}
  0xe2   : > { %2960 = dma.hbm_to_vmem [thread:$0]  (!%p3983_p0), %s3992_s14, 128, %s3995_s16, %s3999_s19  }
  0xe3   : > { %s4651_s2 = sld [smem:[#allocation46_spill]]  ;;  %p4652_p13 = scmp.ne.s32.totalorder %s4635_s26, 0 }
  0xe9   : > { %s3260_s10 = scalar_lea.hbm %s4651_s2, 16 }
  0xea   : > { %p3261_p12 = scmp.ne.s32.totalorder %s4651_s2, %s3260_s10  ;;  %p3267_p8 = scmp.lt.u32.totalorder %s3260_s10, %s4651_s2 }
  0xec   : > { %p3263_p5 = pnand %p3261_p12, %p4652_p13 }
  0xee   : > { %p3264_p6 = pneg %p3263_p5 }
  0xf0   : > { %p3269_p7 = pnand %p3267_p8, %p3264_p6 }
  0xf2   : > { %3272 = shalt.err (!%p3269_p7)
}
  0xf3   : > { %s3629_s4 = smov [#allocation3]   ;;  %p4653_p11 = scmp.ne.s32.totalorder %s4633_s27, 0 }
  0xf4   : > { %s3630_s18 = smov [#allocation16]   ;;  %s3631_s30 = smov [#allocation19]  }
  0xf5   : > { %2926 = dma.hbm_to_smem (!%p4653_p11), %s4651_s2, 16, %s3629_s4, [#allocation6]  }
  0xf6   : > { %s638_s25 = sshll.u32 %s3630_s18, 4  ;;  %s666_s6 = sshll.u32 %s3631_s30, 4  ;;  %s639_s25 = int_to_ptr.vmem [resolvable:$true] %s638_s25  ;;  %s4045_s6 = int_to_ptr.vmem [resolvable:$true] %s666_s6 }
  0xf7   : > { %s4654_s8 = sld [smem:[#allocation54_spill]] }
  0xfd   : > { %s3273_s10 = scalar_lea.hbm %s4654_s8, 16 }
  0xfe   : > { %p3274_p4 = scmp.ne.s32.totalorder %s4654_s8, %s3273_s10  ;;  %p3280_p9 = scmp.lt.u32.totalorder %s3273_s10, %s4654_s8 }
 0x100   : > { %p3276_p1 = pnand %p3274_p4, %p4652_p13 }
 0x102   : > { %p3277_p2 = pneg %p3276_p1 }
 0x104   : > { %p3282_p10 = pnand %p3280_p9, %p3277_p2 }
 0x106   : > { %3285 = shalt.err (!%p3282_p10)
}
 0x107   : > { %s3286_s16 = scalar_lea.vmem %s639_s25, 16  ;;  %s3293_s7 = scalar_lea.vmem %s639_s25, 32 }
 0x108   : > { %p3287_p12 = scmp.ne.s32.totalorder %s639_s25, %s3286_s16  ;;  %p3294_p8 = scmp.lt.s32.totalorder %s639_s25, %s639_s25 }
 0x109   : > { %p3295_p7 = scmp.lt.s32.totalorder %s3293_s7, %s3286_s16 }
 0x10a   : > { %p3289_p5 = pnand %p3287_p12, %p4652_p13 }
 0x10b   : > { %p3296_p0 = por %p3295_p7, %p3294_p8 }
 0x10c   : > { %p3290_p6 = pneg %p3289_p5 }
 0x10e   : > { %p3297_p3 = pnand %p3296_p0, %p3290_p6 }
 0x110   : > { %3300 = shalt.err (!%p3297_p3)
}
 0x111   : > { %2935 = dma.hbm_to_vmem [thread:$0]  (!%p4653_p11), %s4654_s8, 16, %s639_s25, [#allocation15]  }
 0x112   : > { %s3301_s10 = scalar_lea.hbm %s4558_s12, 16 }
 0x113   : > { %p3302_p4 = scmp.ne.s32.totalorder %s4558_s12, %s3301_s10  ;;  %p3308_p0 = scmp.lt.u32.totalorder %s3301_s10, %s4558_s12 }
 0x115   : > { %p3304_p1 = pnand %p3302_p4, %p4652_p13 }
 0x117   : > { %p3305_p2 = pneg %p3304_p1 }
 0x119   : > { %p3310_p3 = pnand %p3308_p0, %p3305_p2 }
 0x11b   : > { %3313 = shalt.err (!%p3310_p3)
}
 0x11c   : > { %s3314_s25 = scalar_lea.vmem %s4045_s6, 16  ;;  %s3321_s7 = scalar_lea.vmem %s4045_s6, 32 }
 0x11d   : > { %p3315_p9 = scmp.ne.s32.totalorder %s4045_s6, %s3314_s25  ;;  %p3322_p5 = scmp.lt.s32.totalorder %s4045_s6, %s4045_s6 }
 0x11e   : > { %p3323_p6 = scmp.lt.s32.totalorder %s3321_s7, %s3314_s25 }
 0x11f   : > { %p3317_p10 = pnand %p3315_p9, %p4652_p13 }
 0x120   : > { %p3324_p8 = por %p3323_p6, %p3322_p5 }
 0x121   : > { %p3318_p12 = pneg %p3317_p10 }
 0x123   : > { %p3325_p7 = pnand %p3324_p8, %p3318_p12 }
 0x125   : > { %3328 = shalt.err (!%p3325_p7)
}
 0x126   : > { %2941 = dma.hbm_to_vmem [thread:$0]  (!%p4653_p11), %s4558_s12, 16, %s4045_s6, [#allocation18]  }
 0x127   : > { %s3632_s30 = smov [#allocation22]   ;;  %s3633_s10 = smov [#allocation25]  }
 0x128   : > { %s691_s13 = sshll.u32 %s3632_s30, 4  ;;  %s712_s20 = sshll.u32 %s3633_s10, 4  ;;  %s692_s13 = int_to_ptr.vmem [resolvable:$true] %s691_s13  ;;  %s4089_s20 = int_to_ptr.vmem [resolvable:$true] %s712_s20 }
 0x129   : > { %s3329_s16 = scalar_lea.hbm %s4561_s15, 16 }
 0x12a   : > { %p3330_p4 = scmp.ne.s32.totalorder %s4561_s15, %s3329_s16  ;;  %p3336_p0 = scmp.lt.u32.totalorder %s3329_s16, %s4561_s15 }
 0x12c   : > { %p3332_p1 = pnand %p3330_p4, %p4652_p13 }
 0x12e   : > { %p3333_p2 = pneg %p3332_p1 }
 0x130   : > { %p3338_p3 = pnand %p3336_p0, %p3333_p2 }
 0x132   : > { %3341 = shalt.err (!%p3338_p3)
}
 0x133   : > { %s3342_s18 = scalar_lea.vmem %s692_s13, 16  ;;  %s3349_s30 = scalar_lea.vmem %s692_s13, 32 }
 0x134   : > { %p3343_p9 = scmp.ne.s32.totalorder %s692_s13, %s3342_s18  ;;  %p3350_p5 = scmp.lt.s32.totalorder %s692_s13, %s692_s13 }
 0x135   : > { %p3351_p6 = scmp.lt.s32.totalorder %s3349_s30, %s3342_s18 }
 0x136   : > { %p3345_p10 = pnand %p3343_p9, %p4652_p13 }
 0x137   : > { %p3352_p8 = por %p3351_p6, %p3350_p5 }
 0x138   : > { %p3346_p12 = pneg %p3345_p10 }
 0x13a   : > { %p3353_p7 = pnand %p3352_p8, %p3346_p12 }
 0x13c   : > { %3356 = shalt.err (!%p3353_p7)
}
 0x13d   : > { %2947 = dma.hbm_to_vmem [thread:$0]  (!%p4653_p11), %s4561_s15, 16, %s692_s13, [#allocation21]  }
 0x13e   : > { %s3357_s25 = scalar_lea.hbm %s4563_s17, 512 }
 0x13f   : > { %p3358_p4 = scmp.ne.s32.totalorder %s4563_s17, %s3357_s25  ;;  %p3364_p0 = scmp.lt.u32.totalorder %s3357_s25, %s4563_s17 }
 0x141   : > { %p3360_p1 = pnand %p3358_p4, %p4652_p13 }
 0x143   : > { %p3361_p2 = pneg %p3360_p1 }
 0x145   : > { %p3366_p3 = pnand %p3364_p0, %p3361_p2 }
 0x147   : > { %3369 = shalt.err (!%p3366_p3)
}
 0x148   : > { %s3370_s13 = scalar_lea.vmem %s4089_s20, 512  ;;  %p3378_p5 = scmp.lt.s32.totalorder %s4089_s20, %s4089_s20 }
 0x149   : > { %p3371_p9 = scmp.ne.s32.totalorder %s4089_s20, %s3370_s13  ;;  %p3379_p6 = scmp.lt.s32.totalorder %s3370_s13, %s3370_s13 }
 0x14b   : > { %p3373_p10 = pnand %p3371_p9, %p4652_p13  ;;  %p3380_p8 = por %p3379_p6, %p3378_p5 }
 0x14d   : > { %p3374_p12 = pneg %p3373_p10 }
 0x14f   : > { %p3381_p7 = pnand %p3380_p8, %p3374_p12 }
 0x151   : > { %3384 = shalt.err (!%p3381_p7)
}
 0x152   : > { %s3634_s30 = smov 128   ;;  %s3635_s10 = smov 8  }
 0x153   : > { %2953 = dma.hbm_to_vmem [thread:$0]  (!%p4653_p11), %s4563_s17, 512, %s4089_s20, [#allocation24], %s3634_s30, %s3634_s30, %s3635_s10  }
 0x154   : > { %s4655_s25 = sld [smem:[#allocation47_spill]]  ;;  %s739_s3 = scalar_lea.vmem [#allocation7], %s3976_s21 }
 0x155   : > { %s746_s6 = sshll.u32 %s739_s3, 4  ;;  %s4656_s18 = sand.u32 1, %s3609_s29   ;;  %s747_s6 = int_to_ptr.vmem [resolvable:$true] %s746_s6 }
 0x156   : > { %s736_s13 = scalar_lea.sflag [#allocation4], %s4656_s18  ;;  %p4657_p4 = scmp.ne.s32.totalorder %s4650_s23, 0 }
 0x15a   : > { %s4136_s7 = scalar_lea.hbm %s4655_s25, %s3979_s9  ;;  %s3390_s30 = scalar_lea.hbm %s4655_s25, 256 }
 0x15b   : > { %s3385_s2 = scalar_lea.hbm %s4136_s7, 128  ;;  %p3391_p11 = scmp.lt.u32.totalorder %s4136_s7, %s4655_s25 }
 0x15c   : > { %p3386_p13 = scmp.ne.s32.totalorder %s4136_s7, %s3385_s2  ;;  %p3392_p0 = scmp.lt.u32.totalorder %s3390_s30, %s3385_s2 }
 0x15d   : > { %p3394_p9 = scmp.lt.u32.totalorder %s3385_s2, %s4136_s7 }
 0x15e   : > { %p3388_p1 = pnand %p3386_p13, %p4657_p4  ;;  %p3393_p3 = por %p3392_p0, %p3391_p11 }
 0x160   : > { %p3389_p2 = pneg %p3388_p1  ;;  %p3395_p10 = por %p3394_p9, %p3393_p3 }
 0x162   : > { %p3396_p12 = pnand %p3395_p10, %p3389_p2 }
 0x164   : > { %3399 = shalt.err (!%p3396_p12)
}
 0x165   : > { %s3400_s4 = scalar_lea.vmem %s747_s6, 128  ;;  %s3636_s26 = smov [#allocation7]  }
 0x166   : > { %p3401_p5 = scmp.ne.s32.totalorder %s747_s6, %s3400_s4  ;;  %s3405_s16 = sshll.u32 %s3636_s26, 4  ;;  %s3406_s16 = int_to_ptr.vmem [resolvable:$false] %s3405_s16 }
 0x167   : > { %s3407_s3 = scalar_lea.vmem %s3406_s16, 256  ;;  %p3408_p7 = scmp.lt.s32.totalorder %s747_s6, %s3406_s16 }
 0x168   : > { %p3403_p6 = pnand %p3401_p5, %p4657_p4  ;;  %p3409_p13 = scmp.lt.s32.totalorder %s3407_s3, %s3400_s4 }
 0x16a   : > { %p3404_p8 = pneg %p3403_p6  ;;  %p3410_p1 = por %p3409_p13, %p3408_p7 }
 0x16c   : > { %p3411_p0 = pnand %p3410_p1, %p3404_p8 }
 0x16e   : > { %3414 = shalt.err (!%p3411_p0)
}
 0x16f   : > { %p4658_p11 = scmp.ne.s32.totalorder %s4648_s11, 0  ;;  %s4659_s27 = sld [smem:[#allocation49_spill]] }
 0x170   : > { %s776_s30 = scalar_lea.vmem [#allocation10], %s3976_s21 }
 0x171   : > { %2957 = dma.hbm_to_vmem [thread:$0]  (!%p4658_p11), %s4136_s7, 128, %s747_s6, %s736_s13  }
 0x172   : > { %s783_s10 = sshll.u32 %s776_s30, 4  ;;  %s784_s10 = int_to_ptr.vmem [resolvable:$true] %s783_s10 }
 0x175   : > { %s4162_s20 = scalar_lea.hbm %s4659_s27, %s3979_s9  ;;  %s3420_s7 = scalar_lea.hbm %s4659_s27, 256 }
 0x176   : > { %s3415_s14 = scalar_lea.hbm %s4162_s20, 128  ;;  %p3421_p10 = scmp.lt.u32.totalorder %s4162_s20, %s4659_s27 }
 0x177   : > { %p3416_p2 = scmp.ne.s32.totalorder %s4162_s20, %s3415_s14  ;;  %p3422_p12 = scmp.lt.u32.totalorder %s3420_s7, %s3415_s14 }
 0x178   : > { %p3424_p6 = scmp.lt.u32.totalorder %s3415_s14, %s4162_s20 }
 0x179   : > { %p3418_p3 = pnand %p3416_p2, %p4657_p4  ;;  %p3423_p5 = por %p3422_p12, %p3421_p10 }
 0x17b   : > { %p3419_p9 = pneg %p3418_p3  ;;  %p3425_p8 = por %p3424_p6, %p3423_p5 }
 0x17d   : > { %p3426_p7 = pnand %p3425_p8, %p3419_p9 }
 0x17f   : > { %3429 = shalt.err (!%p3426_p7)
}
 0x180   : > { %s3430_s16 = scalar_lea.vmem %s784_s10, 128  ;;  %s3637_s3 = smov [#allocation10]  }
 0x181   : > { %p3431_p13 = scmp.ne.s32.totalorder %s784_s10, %s3430_s16  ;;  %s3435_s2 = sshll.u32 %s3637_s3, 4  ;;  %s3436_s2 = int_to_ptr.vmem [resolvable:$false] %s3435_s2 }
 0x182   : > { %s3437_s18 = scalar_lea.vmem %s3436_s2, 256  ;;  %p3438_p2 = scmp.lt.s32.totalorder %s784_s10, %s3436_s2 }
 0x183   : > { %p3433_p1 = pnand %p3431_p13, %p4657_p4  ;;  %p3439_p3 = scmp.lt.s32.totalorder %s3437_s18, %s3430_s16 }
 0x185   : > { %p3434_p0 = pneg %p3433_p1  ;;  %p3440_p11 = por %p3439_p3, %p3438_p2 }
 0x187   : > { %p3441_p10 = pnand %p3440_p11, %p3434_p0 }
 0x189   : > { %3444 = shalt.err (!%p3441_p10)
}
 0x18a   : > { %p4660_p12 = scmp.ne.s32.totalorder %s4648_s11, 0  ;;  %s4661_s4 = sld [smem:[#allocation50_spill]] }
 0x18b   : > { %s794_s6 = scalar_lea.vmem [#allocation11], %s3976_s21  ;;  %s4663_s16 = sand.u32 1, %s3621_s0  }
 0x18c   : > { %2963 = dma.hbm_to_vmem [thread:$0]  (!%p4660_p12), %s4162_s20, 128, %s784_s10, %s3999_s19  }
 0x18d   : > { %s802_s13 = sshll.u32 %s794_s6, 4  ;;  %s791_s3 = scalar_lea.sflag [#allocation12], %s4663_s16  ;;  %s803_s13 = int_to_ptr.vmem [resolvable:$true] %s802_s13 }
 0x190   : > { %s4662_s26 = smov %s4661_s4  ;;  %s4187_s7 = scalar_lea.hbm %s4661_s4, %s3979_s9 }
 0x191   : > { %s3445_s2 = scalar_lea.hbm %s4187_s7, 128  ;;  %s3450_s10 = scalar_lea.hbm %s4662_s26, 256 }
 0x192   : > { %p3446_p11 = scmp.ne.s32.totalorder %s4187_s7, %s3445_s2  ;;  %p3451_p6 = scmp.lt.u32.totalorder %s4187_s7, %s4662_s26 }
 0x193   : > { %p3452_p8 = scmp.lt.u32.totalorder %s3450_s10, %s3445_s2  ;;  %p3454_p13 = scmp.lt.u32.totalorder %s3445_s2, %s4187_s7 }
 0x194   : > { %p3448_p9 = pnand %p3446_p11, %p4657_p4 }
 0x195   : > { %p3453_p7 = por %p3452_p8, %p3451_p6 }
 0x196   : > { %p3449_p5 = pneg %p3448_p9 }
 0x197   : > { %p3455_p1 = por %p3454_p13, %p3453_p7 }
 0x199   : > { %p3456_p0 = pnand %p3455_p1, %p3449_p5 }
 0x19b   : > { %3459 = shalt.err (!%p3456_p0)
}
 0x19c   : > { %s3460_s21 = scalar_lea.vmem %s803_s13, 128  ;;  %s3638_s30 = smov [#allocation11]  }
 0x19d   : > { %p3461_p2 = scmp.ne.s32.totalorder %s803_s13, %s3460_s21  ;;  %s3465_s14 = sshll.u32 %s3638_s30, 4  ;;  %s3466_s14 = int_to_ptr.vmem [resolvable:$false] %s3465_s14 }
 0x19e   : > { %s3467_s4 = scalar_lea.vmem %s3466_s14, 256  ;;  %p3468_p11 = scmp.lt.s32.totalorder %s803_s13, %s3466_s14 }
 0x19f   : > { %p3463_p3 = pnand %p3461_p2, %p4657_p4  ;;  %p3469_p9 = scmp.lt.s32.totalorder %s3467_s4, %s3460_s21 }
 0x1a1   : > { %p3464_p10 = pneg %p3463_p3  ;;  %p3470_p12 = por %p3469_p9, %p3468_p11 }
 0x1a3   : > { %p3471_p6 = pnand %p3470_p12, %p3464_p10 }
 0x1a5   : > { %3474 = shalt.err (!%p3471_p6)
}
 0x1a6   : > { %p4664_p8 = scmp.ne.s32.totalorder %s4648_s11, 0  ;;  %p4665_p5 = scmp.ne.s32.totalorder %s4632_s24, 0 }
 0x1a7   : > { %p4666_p7 = scmp.eq.s32.totalorder (!%p4665_p5), %s3797_s5, 0 }
 0x1a8   : > { %2966 = dma.hbm_to_vmem [thread:$0]  (!%p4664_p8), %s4187_s7, 128, %s803_s13, %s791_s3  }
 0x1a9   : > { %811 = sbr.rel (%p4665_p5) target bundleno = 3008 (0xbc0), region = 104 }
 0x1b0   : > { %3556 = dma.done.wait (%p4666_p7), [#allocation6], 16   ;;  %p4667_p4 = pmov %p4666_p7 }
 0x1b1   : > { %s4216_s23 = sand.u32 1, %s3605_s28   ;;  %p4668_p12 = scmp.ne.s32.totalorder %s4643_s22, 0 }
 0x1b2   : > { %3558 = vsyncadd (%p4667_p4), [#allocation6], 4294967280  ;;  %s4219_s6 = sshll.u32 %s4216_s23, 3  ;;  %s818_s11 = scalar_lea.sflag [#allocation4], %s4216_s23 }
 0x1b3   : > { %s821_s7 = scalar_lea.vmem [#allocation7], %s4219_s6 }
 0x1b4   : > { %3560 = dma.done.wait (%p4668_p12), %s818_s11, 128  }
 0x1b5   : > { %3562 = vsyncadd (%p4668_p12), %s818_s11, 4294967168  ;;  %s826_s24 = sand.u32 1, %s3797_s5   ;;  %s830_s16 = scalar_lea.vmem [#allocation8], %s4219_s6 }
 0x1b6   : > { %s827_s13 = scalar_lea.sflag [#allocation9], %s826_s24 }
 0x1b7   : > { %3564 = dma.done.wait (%p4668_p12), %s827_s13, 256  }
 0x1b8   : > { %3566 = vsyncadd (%p4668_p12), %s827_s13, 4294967040  ;;  %s839_s3 = scalar_lea.vmem [#allocation10], %s4219_s6  ;;  %s845_s2 = scalar_lea.sflag [#allocation12], %s826_s24 }
 0x1b9   : > { %s848_s19 = scalar_lea.vmem [#allocation11], %s4219_s6 }
 0x1ba   : > { %3568 = dma.done.wait (%p4668_p12), %s845_s2, 128  }
 0x1bb   : > { %3570 = vsyncadd (%p4668_p12), %s845_s2, 4294967168  ;;  %p4669_p13 = pmov %p4667_p4 }
 0x1bc   : > { %p4670_p1 = pmov %p4667_p4 }
 0x1bd   : > { %3572 = dma.done.wait (%p4669_p13), [#allocation12], 16  }
 0x1be   : > { %3574 = vsyncadd (%p4670_p1), [#allocation12], 4294967280  ;;  %p4671_p0 = pmov %p4670_p1 }
 0x1c0   : > { %3576 = dma.done.wait (%p4671_p0), [#allocation15], 32   ;;  %p4672_p2 = pmov %p4671_p0 }
 0x1c1   : > { %p4673_p3 = pmov %p4671_p0 }
 0x1c2   : > { %3578 = vsyncadd (%p4672_p2), [#allocation15], 4294967264 }
 0x1c3   : > { %3580 = dma.done.wait (%p4673_p3), [#allocation18], 32   ;;  %p4674_p10 = pmov %p4671_p0 }
 0x1c4   : > { %p4675_p11 = pmov %p4671_p0 }
 0x1c5   : > { %3582 = vsyncadd (%p4674_p10), [#allocation18], 4294967264 }
 0x1c6   : > { %3584 = dma.done.wait (%p4675_p11), [#allocation21], 32   ;;  %p4676_p9 = pmov %p4671_p0 }
 0x1c7   : > { %p4677_p6 = pmov %p4671_p0 }
 0x1c8   : > { %3586 = vsyncadd (%p4676_p9), [#allocation21], 4294967264 }
 0x1c9   : > { %3588 = dma.done.wait (%p4677_p6), [#allocation24], 528   ;;  %p4678_p8 = pmov %p4671_p0 }
 0x1cb   : > { %3590 = vsyncadd (%p4678_p8), [#allocation24], 4294966768 }
 0x1cc   : > { %889 = sfence }
 0x1cd   : > { %vm969_vm0 = vcmask 261120   ;;  %v1014_v0 = vld [vmem:[%s848_s19] sm:$0xff]  ;;  %v998_v1 = vld [vmem:[%s839_s3] sm:$0xff]  ;;  %s4679_s20 = sld [smem:[#allocation53_spill]]  ;;  %v3639_v19 = vmov 0.0|0.0   ;;  %vm3640_vm1 = vmmov 0  }
 0x1ce   : > { %v1015_v2 = vsel %vm969_vm0, %v1014_v0, 0.0  ;;  %v999_v3 = vsel %vm969_vm0, %v998_v1, 0.0  ;;  %v968_v4 = vld [vmem:[%s821_s7] sm:$0xff]  ;;  %2829 = vmatprep.subr.bf16.mxu1 %v3639_v19  ;;  %2841 = vmatprep.subr.bf16.mxu0 %v3639_v19  ;;  %v3641_v23 = vmov 0.0   ;;  %s4680_s7 = sld [smem:[#allocation57_spill]]  ;;  %s4681_s9 = sld [smem:[#allocation55_spill]] }
 0x1cf   : > { %1016 = vadd.xlane.f32.xlu0 %v1015_v2  ;;  %v970_v5 = vsel %vm969_vm0, %v968_v4, 0.0  ;;  %2723 = vmatprep.mubr.msk.f32.mxu1 %vm3640_vm1, %v3641_v23  ;;  %v2624_v42 = vld [vmem:[#allocation13] ss:$0 sm:$0xff]  ;;  %v2625_v46 = vld [vmem:[#allocation14] ss:$0 sm:$0xff]  ;;  %s1030_s24 = sld [smem:[#allocation3]] }
 0x1d0   : > { %2745 = vmatprep.mubr.msk.f32.mxu0 %vm3640_vm1, %v3641_v23  ;;  %s2626_s13 = sld [smem:[#allocation3 + $0x1]]  ;;  %s3642_s3 = smov 120   ;;  %vm1291_vm2 = vcmask 64512   ;;  %vm1628_vm3 = vcmask 130112   ;;  %vm1802_vm4 = vcmask 195712   ;;  %vm1976_vm5 = vcmask 261312  }
 0x1d1   : > { %s3643_s2 = smov 112   ;;  %s3644_s19 = smov 104   ;;  %vm2194_vm6 = vcmask 523264  }
 0x1d2   : > { %s2627_s5 = sld [smem:[#allocation3 + $0x2]]  ;;  %s2623_s22 = sshll.u32 %s4216_s23, 5 }
 0x1d3   : > { %1000 = vadd.xlane.f32.xlu0 %v999_v3  ;;  %v1033_v16 = vld [vmem:[%s4679_s20] sm:$0xff]  ;;  %v1034_v17 = vld [vmem:[%s4679_s20 + $0x8] sm:$0xff]  ;;  %v1035_v20 = vld [vmem:[%s4679_s20 + $0x10] sm:$0xff]  ;;  %s4366_s10 = scalar_lea.vmem [#allocation27], %s2623_s22  ;;  %s3645_s18 = smov 8  }
 0x1d4   : > { %v2830_v18 = vpack.c.bf16 %v1034_v17, %v1033_v16  ;;  %v1036_v21 = vld [vmem:[%s4679_s20 + $0x18] sm:$0xff]  ;;  %v1205_v29 = vld [vmem:[%s4680_s7] sm:$0xff]  ;;  %v1206_v30 = vld [vmem:[%s4680_s7 + $0x8] sm:$0xff]  ;;  %s3646_s21 = smov 16   ;;  %s4682_s4 = sld [smem:[#allocation58_spill]] }
 0x1d5   : > { %v2833_v22 = vpack.c.bf16 %v1036_v21, %v1035_v20  ;;  %v1207_v31 = vld [vmem:[%s4680_s7 + $0x10] sm:$0xff]  ;;  %v2842_v32 = vpack.c.bf16 %v1206_v30, %v1205_v29  ;;  %v1208_v33 = vld [vmem:[%s4680_s7 + $0x18] sm:$0xff]  ;;  %v1119_v44 = vld [vmem:[%s4681_s9] sm:$0xff]  ;;  %v1117_v2 = vstv %s1030_s24  ;;  %s3647_s22 = smov 24   ;;  %s4684_s30 = sld [smem:[#allocation62_spill]] }
 0x1d6   : > { %2831 = vmatpush3.bf16.msra.mxu1 %v2830_v18  ;;  %v2845_v34 = vpack.c.bf16 %v1208_v33, %v1207_v31  ;;  %v1120_v45 = vld [vmem:[%s4681_s9 + $0x8] sm:$0xff]  ;;  %v1121_v52 = vld [vmem:[%s4681_s9 + $0x10] sm:$0xff]  ;;  %v1122_v53 = vld [vmem:[%s4681_s9 + $0x18] sm:$0xff]  ;;  %s4688_s24 = sld [smem:[#allocation65_spill]]  ;;  %p4689_p7 = scmp.ne.s32.totalorder %s4644_s1, 0 }
 0x1d7   : > { %971 = vadd.xlane.f32.xlu0 %v970_v5  ;;  %2832 = vmatprep.subr.bf16.mxu1 %v3639_v19  ;;  %v2836_v49 = vpack.c.bf16 %v1120_v45, %v1119_v44  ;;  %v2839_v54 = vpack.c.bf16 %v1122_v53, %v1121_v52 }
 0x1d8   : > { %2843 = vmatpush3.bf16.msra.mxu0 %v2842_v32 }
 0x1d9   : > { %2844 = vmatprep.subr.bf16.mxu0 %v3639_v19 }
 0x1da   : > { %2834 = vmatpush3.bf16.msra.mxu1 %v2833_v22  ;;  %s4683_s11 = smov %s4682_s4 }
 0x1db   : > { %2835 = vmatprep.subr.bf16.mxu1 %v3639_v19  ;;  %s4685_s14 = smov %s4684_s30 }
 0x1dc   : > { %2846 = vmatpush3.bf16.msra.mxu0 %v2845_v34 }
 0x1dd   : > { %2758 = vmatprep.subr.mxu0 %v3641_v23 }
 0x25c   : > { %v1017_v6 = vpop.xlane.xlu0 %1016 }
 0x25d   : > { %v1018_v7 = vmul.f32 0.03125, %v1017_v6  ;;  %v2630_v6 = vld [vmem:[#allocation17] ss:$0 sm:$0xff] }
 0x25f   : > { %v1019_v8 = vsub.f32 %v1014_v0, %v1018_v7  ;;  %v2628_v0 = vld [vmem:[#allocation16] ss:$0 sm:$0xff] }
 0x260   : > { %v1001_v9 = vpop.xlane.xlu0 %1000 }
 0x261   : > { %v1002_v10 = vmul.f32 0.03125, %v1001_v9  ;;  %v1020_v11 = vmul.f32 %v1019_v8, %v1019_v8 }
 0x263   : > { %v1003_v12 = vsub.f32 %v998_v1, %v1002_v10  ;;  %v1021_v13 = vsel %vm969_vm0, %v1020_v11, 0.0 }
 0x264   : > { %1022 = vadd.xlane.f32.xlu1 %v1021_v13  ;;  %v972_v24 = vpop.xlane.xlu0 %971 }
 0x265   : > { %v1004_v14 = vmul.f32 %v1003_v12, %v1003_v12  ;;  %v974_v25 = vmul.f32 0.03125, %v972_v24 }
 0x267   : > { %v1005_v15 = vsel %vm969_vm0, %v1004_v14, 0.0  ;;  %v975_v26 = vsub.f32 %v968_v4, %v974_v25  ;;  %v1289_v14 = vstv %s2627_s5  ;;  %s4687_s5 = sld [smem:[#allocation61_spill]] }
 0x268   : > { %1006 = vadd.xlane.f32.xlu1 %v1005_v15 }
 0x269   : > { %v976_v27 = vmul.f32 %v975_v26, %v975_v26 }
 0x26b   : > { %v977_v28 = vsel %vm969_vm0, %v976_v27, 0.0 }
 0x26c   : > { %978 = vadd.xlane.f32.xlu1 %v977_v28 }
 0x2f1   : > { %v1023_v35 = vpop.xlane.xlu1 %1022 }
 0x2f2   : > { %v1024_v36 = vmul.f32 0.03125, %v1023_v35 }
 0x2f4   : > { %v1025_v37 = vadd.f32 1e-06, %v1024_v36 }
 0x2f5   : > { %v1007_v38 = vpop.xlane.xlu1 %1006 }
 0x2f6   : > { %3066 = vrsqrt.f32 %v1025_v37  ;;  %v1008_v39 = vmul.f32 0.03125, %v1007_v38 }
 0x2f8   : > { %v1009_v40 = vadd.f32 1e-06, %v1008_v39 }
 0x2f9   : > { %v979_v57 = vpop.xlane.xlu1 %978 }
 0x2fa   : > { %3068 = vrsqrt.f32 %v1009_v40  ;;  %v980_v58 = vmul.f32 0.03125, %v979_v57 }
 0x2fc   : > { %v981_v59 = vadd.f32 1e-06, %v980_v58 }
 0x2fe   : > { %3070 = vrsqrt.f32 %v981_v59 }
 0x300   : > { %v3067_v41 = vpop.eup %3066 }
 0x301   : > { %v1027_v43 = vmul.f32 %v3067_v41, %v1019_v8  ;;  %v1203_v8 = vstv %s2626_s13 }
 0x303   : > { %v1028_v47 = vmul.f32 %v2624_v42, %v1027_v43 }
 0x304   : > { %v3069_v48 = vpop.eup %3068 }
 0x305   : > { %v1011_v50 = vmul.f32 %v3069_v48, %v1003_v12  ;;  %v1029_v51 = vadd.f32 %v2625_v46, %v1028_v47  ;;  %v2632_v12 = vld [vmem:[#allocation19] ss:$0 sm:$0xff] }
 0x307   : > { %2724 = vmatmul.mubr.msk.f32.vlgmr.msra.gmra.mrb[0].mxu1 %vm969_vm0, %v1029_v51  ;;  %v1012_v55 = vmul.f32 %v2624_v42, %v1011_v50 }
 0x308   : > { %2837 = vmatpush3.bf16.msra.mxu1 %v2836_v49  ;;  %2734 = vmatprep.mubr.msk.f32.mxu1 %vm3640_vm1, %v3641_v23  ;;  %v3071_v60 = vpop.eup %3070 }
 0x309   : > { %2838 = vmatprep.subr.bf16.mxu1 %v3639_v19  ;;  %v1013_v56 = vadd.f32 %v2625_v46, %v1012_v55  ;;  %v983_v61 = vmul.f32 %v3071_v60, %v975_v26 }
 0x30b   : > { %v990_v62 = vmul.f32 %v2624_v42, %v983_v61 }
 0x30c   : > { %2840 = vmatpush3.bf16.msra.mxu1 %v2839_v54 }
 0x30d   : > { %2748 = vmatprep.subr.mxu1 %v3641_v23  ;;  %v997_v63 = vadd.f32 %v2625_v46, %v990_v62 }
 0x30f   : > { %2735 = vmatmul.mubr.msk.f32.vlgmr.msra.gmra.mrb[2].mxu1 %vm969_vm0, %v1013_v56  ;;  %2746 = vmatmul.mubr.msk.f32.vlgmr.msra.gmra.mrb[0].mxu0 %vm969_vm0, %v997_v63 }
 0x310   : > { %2750 = vmatprep.mubr.msk.f32.mxu1 %vm3640_vm1, %v3641_v23  ;;  %2760 = vmatprep.mubr.msk.f32.mxu0 %vm3640_vm1, %v3641_v23 }
 0x3da   : > { %v1113_v1 = vpop.f32.mrb[0].mxu1 }
 0x3db   : > { %v1114_v3 = vadd.f32 %v2628_v0, %v1113_v1  ;;  %v2725_v4 = vpop.f32.mrb[1].mxu1 }
 0x3dd   : > { %v1118_v5 = vmul.f32 %v1117_v2, %v1114_v3 }
 0x3df   : > { %1455 = vrot.lane.b32.xlu1 %v1118_v5, %s3642_s3 }
 0x3e2   : > { %v1199_v7 = vpop.f32.mrb[2].mxu1  ;;  %v1285_v13 = vpop.f32.mrb[0].mxu0 }
 0x3e3   : > { %v1200_v9 = vadd.f32 %v2630_v6, %v1199_v7  ;;  %v2736_v10 = vpop.f32.mrb[3].mxu1  ;;  %v1286_v15 = vadd.f32 %v2632_v12, %v1285_v13  ;;  %v2747_v16 = vpop.f32.mrb[1].mxu0 }
 0x3e5   : > { %v1204_v11 = vmul.f32 %v1203_v8, %v1200_v9  ;;  %v4335_v17 = vmul.f32 %v1289_v14, %v1286_v15 }
 0x3e7   : > { %1632 = vrot.lane.b32.xlu1 %v1204_v11, %s3643_s2  ;;  %1457 = vrot.lane.b32.xlu0 %v1204_v11, %s3642_s3 }
 0x3e8   : > { %2749 = vmatpush3.xpose.msk.msra.mxu1 %vm1291_vm2, %v1204_v11 }
 0x3e9   : > { %2753 = vmatprep.subr.mxu1 %v3641_v23 }
 0x3eb   : > { %2751 = vmatmul.mubr.msk.f32.vlgmr.msra.gmra.mrb[4].mxu1 %vm1291_vm2, %v1118_v5  ;;  %1630 = vrot.lane.b32.xlu1 %v1118_v5, %s3643_s2 }
 0x3ec   : > { %1806 = vrot.lane.b32.xlu0 %v1204_v11, %s3644_s19  ;;  %2755 = vmatprep.mubr.msk.f32.mxu1 %vm3640_vm1, %v3641_v23 }
 0x3ed   : > { %2754 = vmatpush3.msra.mxu1 %v4335_v17 }
 0x3ee   : > { %2763 = vmatprep.subr.mxu1 %v3641_v23 }
 0x3ef   : > { %1804 = vrot.lane.b32.xlu1 %v1118_v5, %s3644_s19 }
 0x451   : > { %v1456_v18 = vpop.permute.xlu1 %1455 }
 0x459   : > { %v1633_v20 = vpop.permute.xlu1 %1632  ;;  %v1458_v21 = vpop.permute.xlu0 %1457 }
 0x45a   : > { %2759 = vmatpush3.xpose.msk.msra.mxu0 %vm1291_vm2, %v1458_v21  ;;  %v1980_v21 = vld [vmem:[%s4683_s11 + $0x8] sm:$0xff] }
 0x45b   : > { %2768 = vmatprep.subr.mxu0 %v3641_v23 }
 0x45d   : > { %2761 = vmatmul.mubr.msk.f32.vlgmr.msra.gmra.mrb[2].mxu0 %vm1291_vm2, %v1456_v18  ;;  %v1631_v22 = vpop.permute.xlu1 %1630 }
 0x45e   : > { %2769 = vmatpush3.xpose.msk.msra.mxu0 %vm1291_vm2, %v1633_v20  ;;  %2770 = vmatprep.mubr.msk.f32.mxu0 %vm3640_vm1, %v3641_v23  ;;  %v1807_v24 = vpop.permute.xlu0 %1806  ;;  %v1979_v20 = vld [vmem:[%s4682_s4] sm:$0xff] }
 0x45f   : > { %2778 = vmatprep.subr.mxu0 %v3641_v23 }
 0x461   : > { %2771 = vmatmul.mubr.msk.f32.vlgmr.msra.gmra.mrb[4].mxu0 %vm1291_vm2, %v1631_v22  ;;  %v1805_v25 = vpop.permute.xlu1 %1804  ;;  %v2848_v22 = vpack.c.bf16 %v1980_v21, %v1979_v20 }
 0x462   : > { %2779 = vmatpush3.xpose.msk.msra.mxu0 %vm1291_vm2, %v1807_v24  ;;  %2780 = vmatprep.mubr.msk.f32.mxu0 %vm3640_vm1, %v3641_v23  ;;  %v1981_v24 = vld [vmem:[%s4683_s11 + $0x10] sm:$0xff] }
 0x463   : > { %2847 = vmatprep.subr.bf16.mxu0 %v3639_v19 }
 0x465   : > { %2781 = vmatmul.mubr.msk.f32.vlgmr.msra.gmra.mrb[6].mxu0 %vm1291_vm2, %v1805_v25  ;;  %v1982_v25 = vld [vmem:[%s4683_s11 + $0x18] sm:$0xff] }
 0x466   : > { %2796 = vmatprep.mubr.msk.f32.mxu0 %vm3640_vm1, %v3641_v23  ;;  %2849 = vmatpush3.bf16.msra.mxu0 %v2848_v22 }
 0x467   : > { %2850 = vmatprep.subr.bf16.mxu0 %v3639_v19 }
 0x4be   : > { %v1364_v26 = vpop.f32.mrb[4].mxu1 }
 0x4bf   : > { %v1368_v27 = vmul.f32 0.35355338, %v1364_v26  ;;  %v2752_v28 = vpop.f32.mrb[5].mxu1  ;;  %v2851_v26 = vpack.c.bf16 %v1982_v25, %v1981_v24 }
 0x4c1   : > { %v1369_v29 = vsel %vm1291_vm2, %v1368_v27, -inf  ;;  %2852 = vmatpush3.bf16.msra.mxu0 %v2851_v26 }
 0x4c2   : > { %1370 = vmax.xlane.f32.xlu0 %v1369_v29  ;;  %2859 = vmatprep.subr.bf16.mxu0 %v3639_v19 }
 0x530   : > { %v1529_v30 = vpop.f32.mrb[2].mxu0 }
 0x531   : > { %v1533_v31 = vmul.f32 0.35355338, %v1529_v30  ;;  %v2762_v32 = vpop.f32.mrb[3].mxu0 }
 0x533   : > { %v1534_v33 = vsel %vm1291_vm2, %v1533_v31, -inf }
 0x534   : > { %1535 = vmax.xlane.f32.xlu1 %v1534_v33  ;;  %v1704_v34 = vpop.f32.mrb[4].mxu0  ;;  %v2649_v33 = vld [vmem:[#allocation20] ss:$0 sm:$0xff] }
 0x535   : > { %v1708_v35 = vmul.f32 0.35355338, %v1704_v34  ;;  %v2772_v36 = vpop.f32.mrb[5].mxu0 }
 0x537   : > { %v1709_v37 = vsel %vm1291_vm2, %v1708_v35, -inf }
 0x538   : > { %1710 = vmax.xlane.f32.xlu0 %v1709_v37  ;;  %v1878_v38 = vpop.f32.mrb[6].mxu0 }
 0x539   : > { %v1882_v39 = vmul.f32 0.35355338, %v1878_v38  ;;  %v2782_v40 = vpop.f32.mrb[7].mxu0 }
 0x53b   : > { %v1883_v41 = vsel %vm1291_vm2, %v1882_v39, -inf }
 0x53c   : > { %1884 = vmax.xlane.f32.xlu0 %v1883_v41 }
 0x54f   : > { %v1371_v42 = vpop.xlane.xlu0 %1370 }
 0x550   : > { %v1372_v43 = vsub.f32 %v1368_v27, %v1371_v42 }
 0x552   : > { %v1373_v44 = vmul.f32 1.442695, %v1372_v43 }
 0x554   : > { %3072 = vpow2.f32 %v1373_v44 }
 0x55e   : > { %v3073_v45 = vpop.eup %3072 }
 0x55f   : > { %v1375_v46 = vsel %vm1291_vm2, %v3073_v45, 0.0 }
 0x560   : > { %1376 = vadd.xlane.f32.xlu0 %v1375_v46 }
 0x5c1   : > { %v1536_v47 = vpop.xlane.xlu1 %1535 }
 0x5c2   : > { %v1537_v48 = vsub.f32 %v1533_v31, %v1536_v47  ;;  %v2096_v47 = vld [vmem:[#allocation25 + $0x10] sm:$0xff] }
 0x5c4   : > { %v1538_v49 = vmul.f32 1.442695, %v1537_v48  ;;  %v2097_v48 = vld [vmem:[#allocation25 + $0x18] sm:$0xff] }
 0x5c5   : > { %v1711_v50 = vpop.xlane.xlu0 %1710 }
 0x5c6   : > { %3074 = vpow2.f32 %v1538_v49  ;;  %v1712_v51 = vsub.f32 %v1708_v35, %v1711_v50  ;;  %v2063_v35 = vld [vmem:[%s830_s16] sm:$0xff]  ;;  %v2857_v49 = vpack.c.bf16 %v2097_v48, %v2096_v47  ;;  %s2304_s16 = sshll.u32 %s4366_s10, 4  ;;  %s4460_s16 = int_to_ptr.vmem [resolvable:$true] %s2304_s16 }
 0x5c7   : > { %v2179_v50 = vld [vmem:[%s4684_s30] sm:$0xff]  ;;  %s4686_s30 = sld [smem:[#allocation41_spill]] }
 0x5c8   : > { %v1713_v52 = vmul.f32 1.442695, %v1712_v51  ;;  %v2180_v51 = vld [vmem:[%s4685_s14 + $0x8] sm:$0xff] }
 0x5c9   : > { %v1885_v57 = vpop.xlane.xlu0 %1884 }
 0x5ca   : > { %3076 = vpow2.f32 %v1713_v52  ;;  %v1886_v59 = vsub.f32 %v1882_v39, %v1885_v57  ;;  %v2181_v52 = vld [vmem:[%s4685_s14 + $0x10] sm:$0xff]  ;;  %v2184_v57 = vld [vmem:[%s4685_s14 + $0x28] sm:$0xff] }
 0x5cc   : > { %v1887_v60 = vmul.f32 1.442695, %v1886_v59 }
 0x5d0   : > { %v3075_v53 = vpop.eup %3074 }
 0x5d1   : > { %v1540_v54 = vsel %vm1291_vm2, %v3075_v53, 0.0 }
 0x5d2   : > { %1541 = vadd.xlane.f32.xlu1 %v1540_v54  ;;  %v2182_v54 = vld [vmem:[%s4685_s14 + $0x18] sm:$0xff] }
 0x5d4   : > { %v3077_v55 = vpop.eup %3076 }
 0x5d5   : > { %v1715_v56 = vsel %vm1291_vm2, %v3077_v55, 0.0 }
 0x5d6   : > { %1716 = vadd.xlane.f32.xlu0 %v1715_v56  ;;  %v2183_v56 = vld [vmem:[%s4685_s14 + $0x20] sm:$0xff] }
 0x5e3   : > { %1722 = vrot.lane.b32.xlu1 %v4335_v17, %s3643_s2  ;;  %s3475_s2 = scalar_lea.vmem %s4460_s16, 512 }
 0x5e4   : > { %p3476_p5 = scmp.ne.s32.totalorder %s4460_s16, %s3475_s2 }
 0x5e6   : > { %p3477_p4 = pnand %p3476_p5, %p4689_p7 }
 0x5e8   : > { %p3478_p12 = pneg %p3477_p4 }
 0x5ec   : > { %1548 = vrot.lane.b32.xlu0 %v4335_v17, %s3642_s3 }
 0x5ed   : > { %v1377_v58 = vpop.xlane.xlu0 %1376 }
 0x5ee   : > { %3078 = vrcp.f32 %v1377_v58  ;;  %v2866_v58 = vpack.c.bf16 %v2184_v57, %v2183_v56 }
 0x5ef   : > { %3080 = vpow2.f32 %v1887_v60 }
 0x5f8   : > { %v3079_v61 = vpop.eup %3078 }
 0x5f9   : > { %v1379_v62 = vmul.f32 %v3079_v61, %v3073_v45  ;;  %v3081_v63 = vpop.eup %3080  ;;  %v2095_v45 = vld [vmem:[#allocation25 + $0x8] sm:$0xff] }
 0x5fa   : > { %v1889_v0 = vsel %vm1291_vm2, %v3081_v63, 0.0 }
 0x5fb   : > { %1380 = vst.msk [vmem:[%s4366_s10] sm:$0xff] %vm1291_vm2, %v1379_v62  ;;  %2756 = vmatmul.mubr.msk.f32.vlgmr.msra.gmra.mrb[6].mxu1 %vm1291_vm2, %v1379_v62 }
 0x5fc   : > { %2765 = vmatprep.mubr.msk.f32.mxu1 %vm3640_vm1, %v3641_v23 }
 0x607   : > { %1890 = vadd.xlane.f32.xlu1 %v1889_v0 }
 0x618   : > { %1896 = vrot.lane.b32.xlu1 %v4335_v17, %s3644_s19  ;;  %s3648_s19 = smov [#allocation27]  }
 0x65f   : > { %v1542_v1 = vpop.xlane.xlu1 %1541 }
 0x660   : > { %3082 = vrcp.f32 %v1542_v1  ;;  %v2652_v1 = vld [vmem:[#allocation23] ss:$0 sm:$0xff] }
 0x663   : > { %v1717_v2 = vpop.xlane.xlu0 %1716  ;;  %v1723_v6 = vpop.permute.xlu1 %1722 }
 0x664   : > { %3084 = vrcp.f32 %v1717_v2 }
 0x667   : > { %v1549_v3 = vpop.permute.xlu0 %1548 }
 0x668   : > { %2764 = vmatpush3.msra.mxu1 %v1549_v3 }
 0x669   : > { %2773 = vmatprep.subr.mxu1 %v3641_v23 }
 0x66a   : > { %v3083_v4 = vpop.eup %3082 }
 0x66b   : > { %v1544_v5 = vmul.f32 %v3083_v4, %v3075_v53  ;;  %v2860_v53 = vpack.c.bf16 %v2180_v51, %v2179_v50  ;;  %v2185_v4 = vld [vmem:[%s4685_s14 + $0x30] sm:$0xff] }
 0x66d   : > { %2639 = vst.msk [vmem:[%s4366_s10 + $0x8] sm:$0xff] %vm1291_vm2, %v1544_v5  ;;  %2766 = vmatmul.mubr.msk.f32.vlgmr.msra.gmra.mrb[8].mxu1 %vm1291_vm2, %v1544_v5 }
 0x66e   : > { %v3085_v7 = vpop.eup %3084  ;;  %2774 = vmatpush3.msra.mxu1 %v1723_v6  ;;  %2775 = vmatprep.mubr.msk.f32.mxu1 %vm3640_vm1, %v3641_v23  ;;  %v2653_v6 = vld [vmem:[%s4687_s5] ss:$0 sm:$0xff]  ;;  %s3479_s5 = sshll.u32 %s3648_s19, 4  ;;  %s3480_s5 = int_to_ptr.vmem [resolvable:$false] %s3479_s5 }
 0x66f   : > { %v1719_v8 = vmul.f32 %v3085_v7, %v3077_v55  ;;  %2783 = vmatprep.subr.mxu1 %v3641_v23  ;;  %v2863_v55 = vpack.c.bf16 %v2182_v54, %v2181_v52  ;;  %p3482_p13 = scmp.lt.s32.totalorder %s4460_s16, %s3480_s5 }
 0x671   : > { %2643 = vst.msk [vmem:[%s4366_s10 + $0x10] sm:$0xff] %vm1291_vm2, %v1719_v8  ;;  %2776 = vmatmul.mubr.msk.f32.vlgmr.msra.gmra.mrb[10].mxu1 %vm1291_vm2, %v1719_v8 }
 0x672   : > { %2785 = vmatprep.mubr.msk.f32.mxu1 %vm3640_vm1, %v3641_v23 }
 0x694   : > { %v1891_v9 = vpop.xlane.xlu1 %1890 }
 0x695   : > { %3086 = vrcp.f32 %v1891_v9 }
 0x698   : > { %v1897_v10 = vpop.permute.xlu1 %1896 }
 0x699   : > { %2784 = vmatpush3.msra.mxu1 %v1897_v10 }
 0x69a   : > { %2853 = vmatprep.subr.bf16.mxu1 %v3639_v19 }
 0x69f   : > { %v3087_v11 = vpop.eup %3086 }
 0x6a0   : > { %v1893_v12 = vmul.f32 %v3087_v11, %v3081_v63  ;;  %v2651_v63 = vld [vmem:[#allocation22] ss:$0 sm:$0xff] }
 0x6a2   : > { %2647 = vst.msk [vmem:[%s4366_s10 + $0x18] sm:$0xff] %vm1291_vm2, %v1893_v12  ;;  %2786 = vmatmul.mubr.msk.f32.vlgmr.msra.gmra.mrb[12].mxu1 %vm1291_vm2, %v1893_v12  ;;  %s3481_s10 = scalar_lea.vmem %s3480_s5, 1024 }
 0x6a3   : > { %2807 = vmatprep.mubr.msk.f32.mxu1 %vm3640_vm1, %v3641_v23  ;;  %p3483_p1 = scmp.lt.s32.totalorder %s3481_s10, %s3475_s2 }
 0x6a5   : > { %p3484_p0 = por %p3483_p1, %p3482_p13 }
 0x6a7   : > { %p3485_p2 = pnand %p3484_p0, %p3478_p12 }
 0x6ce   : > { %v1450_v13 = vpop.f32.mrb[6].mxu1 }
 0x6cf   : > { %1454 = vst.msk [vmem:[#allocation2] sm:$0xff] %vm1291_vm2, %v1450_v13  ;;  %v2757_v14 = vpop.f32.mrb[7].mxu1 }
 0x740   : > { %v1620_v15 = vpop.f32.mrb[8].mxu1 }
 0x741   : > { %1625 = vrot.lane.b32.xlu1 %v1620_v15, %s3645_s18  ;;  %v2767_v16 = vpop.f32.mrb[9].mxu1 }
 0x744   : > { %v1794_v17 = vpop.f32.mrb[10].mxu1 }
 0x745   : > { %1799 = vrot.lane.b32.xlu0 %v1794_v17, %s3646_s21  ;;  %v2777_v18 = vpop.f32.mrb[11].mxu1 }
 0x775   : > { %v1968_v27 = vpop.f32.mrb[12].mxu1 }
 0x776   : > { %1973 = vrot.lane.b32.xlu1 %v1968_v27, %s3647_s22  ;;  %v2787_v28 = vpop.f32.mrb[13].mxu1  ;;  %s2664_s22 = sshll.u32 %s4686_s30, 9 }
 0x777   : > { %s4458_s13 = scalar_lea.hbm %s4688_s24, %s2664_s22 }
 0x7b3   : > { %v1626_v29 = vpop.permute.xlu1 %1625 }
 0x7b4   : > { %1629 = vst.msk [vmem:[#allocation2] sm:$0xff] %vm1628_vm3, %v1626_v29 }
 0x7b7   : > { %v1800_v30 = vpop.permute.xlu0 %1799 }
 0x7b8   : > { %1803 = vst.msk [vmem:[#allocation2] sm:$0xff] %vm1802_vm4, %v1800_v30 }
 0x7e8   : > { %v1974_v31 = vpop.permute.xlu1 %1973 }
 0x7e9   : > { %1977 = vst.msk [vmem:[#allocation2] sm:$0xff] %vm1976_vm5, %v1974_v31 }
 0x7f0   : > { %v1978_v32 = vld [vmem:[#allocation2] sm:$0xff] }
 0x7f1   : > { %2797 = vmatmul.mubr.msk.f32.vlgmr.msra.gmra.mrb[8].mxu0 %vm969_vm0, %v1978_v32 }
 0x7f2   : > { %2826 = vmatprep.mubr.msk.f32.mxu0 %vm3640_vm1, %v3641_v23  ;;  %v2094_v23 = vld [vmem:[#allocation25] sm:$0xff]  ;;  %2861 = vmatpush3.bf16.msra.mxu0 %v2860_v53 }
 0x7f3   : > { %v2854_v46 = vpack.c.bf16 %v2095_v45, %v2094_v23  ;;  %2862 = vmatprep.subr.bf16.mxu0 %v3639_v19 }
 0x7f5   : > { %2855 = vmatpush3.bf16.msra.mxu1 %v2854_v46 }
 0x7f6   : > { %2856 = vmatprep.subr.bf16.mxu1 %v3639_v19  ;;  %2864 = vmatpush3.bf16.msra.mxu0 %v2863_v55 }
 0x7f7   : > { %2865 = vmatprep.subr.bf16.mxu0 %v3639_v19 }
 0x7f9   : > { %2858 = vmatpush3.bf16.msra.mxu1 %v2857_v49 }
 0x7fa   : > { %2867 = vmatpush3.bf16.msra.mxu0 %v2866_v58 }
 0x7fb   : > { %2868 = vmatprep.subr.bf16.mxu0 %v3639_v19  ;;  %v2186_v19 = vld [vmem:[%s4685_s14 + $0x38] sm:$0xff] }
 0x7fc   : > { %v2869_v5 = vpack.c.bf16 %v2186_v19, %v2185_v4 }
 0x7fe   : > { %2870 = vmatpush3.bf16.msra.mxu0 %v2869_v5 }
 0x8c4   : > { %v2059_v34 = vpop.f32.mrb[8].mxu0 }
 0x8c5   : > { %v2060_v36 = vadd.f32 %v2649_v33, %v2059_v34  ;;  %v2798_v37 = vpop.f32.mrb[9].mxu0 }
 0x8c7   : > { %v4415_v38 = vadd.f32 %v2063_v35, %v2060_v36 }
 0x8c9   : > { %v2067_v39 = vsel %vm969_vm0, %v4415_v38, 0.0 }
 0x8ca   : > { %2068 = vadd.xlane.f32.xlu0 %v2067_v39 }
 0x957   : > { %v2069_v40 = vpop.xlane.xlu0 %2068 }
 0x958   : > { %v2070_v41 = vmul.f32 0.03125, %v2069_v40 }
 0x95a   : > { %v2071_v42 = vsub.f32 %v4415_v38, %v2070_v41 }
 0x95c   : > { %v2072_v43 = vmul.f32 %v2071_v42, %v2071_v42 }
 0x95e   : > { %v2073_v44 = vsel %vm969_vm0, %v2072_v43, 0.0 }
 0x95f   : > { %2074 = vadd.xlane.f32.xlu1 %v2073_v44 }
 0x9ec   : > { %v2075_v59 = vpop.xlane.xlu1 %2074 }
 0x9ed   : > { %v2076_v60 = vmul.f32 0.03125, %v2075_v59 }
 0x9ef   : > { %v2077_v61 = vadd.f32 1e-06, %v2076_v60 }
 0x9f1   : > { %3088 = vrsqrt.f32 %v2077_v61 }
 0x9fb   : > { %v3089_v62 = vpop.eup %3088 }
 0x9fc   : > { %v2079_v0 = vmul.f32 %v3089_v62, %v2071_v42 }
 0x9fe   : > { %v2086_v2 = vmul.f32 %v2651_v63, %v2079_v0 }
 0xa00   : > { %v2093_v3 = vadd.f32 %v2652_v1, %v2086_v2 }
 0xa02   : > { %2808 = vmatmul.mubr.msk.f32.vlgmr.msra.gmra.mrb[14].mxu1 %vm969_vm0, %v2093_v3 }
 0xad5   : > { %v2174_v7 = vpop.f32.mrb[14].mxu1 }
 0xad6   : > { %v2175_v8 = vadd.f32 %v2653_v6, %v2174_v7  ;;  %v2809_v9 = vpop.f32.mrb[15].mxu1 }
 0xad8   : > { %v2178_v10 = vmax.f32 %v2175_v8, 0.0 }
 0xada   : > { %2827 = vmatmul.mubr.msk.f32.vlgmr.msra.gmra.mrb[10].mxu0 %vm2194_vm6, %v2178_v10 }
 0xadb   : > { %3488 = shalt.err (!%p3485_p2)
}
 0xadc   : > { %s3489_s22 = scalar_lea.hbm %s4458_s13, 512  ;;  %s3493_s19 = scalar_lea.hbm %s4688_s24, 1024 }
 0xadd   : > { %p3490_p3 = scmp.ne.s32.totalorder %s4458_s13, %s3489_s22  ;;  %p3494_p9 = scmp.lt.u32.totalorder %s4458_s13, %s4688_s24 }
 0xade   : > { %p3495_p6 = scmp.lt.u32.totalorder %s3493_s19, %s3489_s22  ;;  %p3497_p5 = scmp.lt.u32.totalorder %s3489_s22, %s4458_s13 }
 0xadf   : > { %p3491_p10 = pnand %p3490_p3, %p4689_p7 }
 0xae0   : > { %p3496_p8 = por %p3495_p6, %p3494_p9 }
 0xae1   : > { %p3492_p11 = pneg %p3491_p10 }
 0xae2   : > { %p3498_p4 = por %p3497_p5, %p3496_p8 }
 0xae4   : > { %p3499_p12 = pnand %p3498_p4, %p3492_p11 }
 0xae6   : > { %3502 = shalt.err (!%p3499_p12)
}
 0xae7   : > { %s3649_s2 = smov 128   ;;  %s4690_s10 = scalar_lea.sflag [#allocation28], %s4216_s23 }
 0xae8   : > { %2920 = dma.vmem_to_hbm [thread:$0]  (%p4689_p7), %s4460_s16, 512, %s4458_s13, %s4690_s10, %s3649_s2, %s3649_s2, %s3645_s18  }
 0xae9   : > { %s4691_s4 = sld [smem:[#allocation63_spill]]  ;;  %s2659_s22 = sshll.u32 %s4686_s30, 7 }
 0xaea   : > { %s958_s19 = scalar_lea.vmem [#allocation26], %s4219_s6  ;;  %s4692_s9 = sld [smem:[#allocation64_spill]] }
 0xaeb   : > { %s2290_s5 = sshll.u32 %s958_s19, 4  ;;  %s2271_s18 = scalar_lea.sflag [#allocation5], %s4216_s23  ;;  %s4498_s5 = int_to_ptr.vmem [resolvable:$true] %s2290_s5 }
 0xaec   : > { %s3503_s30 = scalar_lea.vmem %s4498_s5, 128  ;;  %s3650_s6 = smov [#allocation26]  }
 0xaed   : > { %p3504_p13 = scmp.ne.s32.totalorder %s4498_s5, %s3503_s30  ;;  %s3507_s16 = sshll.u32 %s3650_s6, 4  ;;  %s3508_s16 = int_to_ptr.vmem [resolvable:$false] %s3507_s16 }
 0xaee   : > { %s3509_s13 = scalar_lea.vmem %s3508_s16, 256  ;;  %p3510_p2 = scmp.lt.s32.totalorder %s4498_s5, %s3508_s16 }
 0xaef   : > { %v2655_v11 = vld [vmem:[%s4691_s4] ss:$0 sm:$0xff]  ;;  %p3505_p1 = pnand %p3504_p13, %p4689_p7  ;;  %p3511_p3 = scmp.lt.s32.totalorder %s3509_s13, %s3503_s30 }
 0xaf0   : > { %s4496_s11 = scalar_lea.hbm %s4692_s9, %s2659_s22 }
 0xaf1   : > { %p3506_p0 = pneg %p3505_p1  ;;  %p3512_p10 = por %p3511_p3, %p3510_p2 }
 0xaf3   : > { %p3513_p11 = pnand %p3512_p10, %p3506_p0 }
 0xbad   : > { %v2264_v12 = vpop.f32.mrb[10].mxu0 }
 0xbae   : > { %v2265_v13 = vadd.f32 %v2655_v11, %v2264_v12  ;;  %v2828_v14 = vpop.f32.mrb[11].mxu0 }
 0xbb0   : > { %v2268_v15 = vadd.f32 %v2265_v13, %v4415_v38 }
 0xbb2   : > { %2269 = vst.msk [vmem:[%s958_s19] sm:$0xff] %vm969_vm0, %v2268_v15 }
 0xbb3   : > { %3516 = shalt.err (!%p3513_p11)
}
 0xbb4   : > { %s3517_s8 = scalar_lea.hbm %s4496_s11, 128  ;;  %s3521_s2 = scalar_lea.hbm %s4692_s9, 256 }
 0xbb5   : > { %p3518_p9 = scmp.ne.s32.totalorder %s4496_s11, %s3517_s8  ;;  %p3522_p5 = scmp.lt.u32.totalorder %s4496_s11, %s4692_s9 }
 0xbb6   : > { %p3523_p4 = scmp.lt.u32.totalorder %s3521_s2, %s3517_s8  ;;  %p3525_p13 = scmp.lt.u32.totalorder %s3517_s8, %s4496_s11 }
 0xbb7   : > { %p3519_p6 = pnand %p3518_p9, %p4689_p7 }
 0xbb8   : > { %p3524_p12 = por %p3523_p4, %p3522_p5 }
 0xbb9   : > { %p3520_p8 = pneg %p3519_p6 }
 0xbba   : > { %p3526_p1 = por %p3525_p13, %p3524_p12 }
 0xbbc   : > { %p3527_p0 = pnand %p3526_p1, %p3520_p8 }
 0xbbe   : > { %3530 = shalt.err (!%p3527_p0)
}
 0xbbf   : > { %2919 = dma.vmem_to_hbm [thread:$0]  (%p4689_p7), %s4498_s5, 128, %s4496_s11, %s2271_s18  }
 0xbc0 PF: > { %s4693_s21 = sld [smem:[#allocation40_spill]]  ;;  %s4694_s4 = sld [smem:[#allocation45_spill]] }
 0xbc1   : > { %p4696_p3 = scmp.ge.s32.totalorder %s3621_s0, 2 }
 0xbc6   : > { %s2319_s22 = sand.u32 1, %s4693_s21   ;;  %p4695_p2 = scmp.ne.s32.totalorder %s4694_s4, 0 }
 0xbc7   : > { %s2320_s19 = scalar_lea.sflag [#allocation5], %s2319_s22 }
 0xbc8   : > { %p2968_p10 = pnand %p4696_p3, %p4695_p2 }
 0xbca   : > { %3592 = dma.done.wait (!%p2968_p10), %s2320_s19, 128  }
 0xbcb   : > { %3594 = vsyncadd (!%p2968_p10), %s2320_s19, 4294967168  ;;  %s2329_s30 = scalar_lea.sflag [#allocation28], %s2319_s22 }
 0xbcc   : > { %3596 = dma.done.wait (!%p2968_p10), %s2329_s30, 512  }
 0xbcd   : > { %3598 = vsyncadd (!%p2968_p10), %s2329_s30, 4294966784  ;;  %s53_s0 = sadd.s32 1, %s3621_s0   ;;  %s4697_s1 = sld [smem:[#allocation44_spill]] }
 0xbce   : > { %p50_p11 = scmp.ge.s32.totalorder %s53_s0, 4   ;;  %s4698_s30 = sld [smem:[#allocation42_spill]] }
 0xbcf   : > { %s4699_s4 = sld [smem:[#allocation43_spill]]  ;;  %s4700_s3 = smov %s3605_s28 }
 0xbd0   : > { %s4701_s28 = smov %s3609_s29  ;;  %52 = sbr.rel (!%p50_p11) target bundleno = 38 (0x26), region = 247 }
 0xbd3   : > { %s4702_s29 = smov %s4697_s1 }
 0xbd7   :  { %2334 = vsyncpa [#allocation4], 1 }
 0xbd8   :  { %2336 = vsyncpa [#allocation4 + $0x1], 1 }
 0xbd9   :  { %2337 = vsyncpa [#allocation9], 1 }
 0xbda   :  { %2339 = vsyncpa [#allocation9 + $0x1], 1 }
 0xbdb   :  { %2340 = vsyncpa [#allocation12], 1 }
 0xbdc   :  { %2342 = vsyncpa [#allocation12 + $0x1], 1 }
 0xbdd   :  { %2343 = vsyncpa [#allocation15], 1 }
 0xbde   :  { %2344 = vsyncpa [#allocation18], 1 }
 0xbdf   :  { %2345 = vsyncpa [#allocation21], 1 }
 0xbe0   :  { %2346 = vsyncpa [#allocation24], 1 }
 0xbe1   :  { %2347 = vsyncpa [#allocation5], 1 }
 0xbe2   :  { %2349 = vsyncpa [#allocation5 + $0x1], 1 }
 0xbe3   :  { %2350 = vsyncpa [#allocation28], 1 }
 0xbe4   :  { %2352 = vsyncpa [#allocation28 + $0x1], 1 }
 0xbe5   :  { %2353 = vsyncpa [#allocation6], 1 }
 0xbe6   :  { %2355 = vsyncpa [#allocation6 + $0x1], 1 }

// kernel: tpu_custom_call.1
= control target key start
LH: loop header
LB: loop body
LE: loop exit
PB: predicated region body
PF: predicated region fallthrough
CT: control target
= control target key end

     0   :  { %s4546_s0 = inlined_call_operand.hbm [shape: f32[3], index: 0, kind: input, shape index: {}]   ;;  %s4547_s1 = inlined_call_operand.hbm [shape: f32[2,8,32], index: 1, kind: input, shape index: {}]   ;;  %s4548_s2 = inlined_call_operand.hbm [shape: f32[2,8,32], index: 2, kind: input, shape index: {}]   ;;  %s4549_s3 = inlined_call_operand.hbm [shape: f32[2,8,32], index: 3, kind: input, shape index: {}]   ;;  %s4550_s4 = inlined_call_operand.hbm [shape: f32[2,8,32], index: 4, kind: input, shape index: {}]   ;;  %s4551_s5 = inlined_call_operand.hbm [shape: f32[1,32], index: 5, kind: input, shape index: {}]   ;;  %s4552_s6 = inlined_call_operand.hbm [shape: f32[1,32], index: 6, kind: input, shape index: {}]   ;;  %s4553_s7 = inlined_call_operand.vmem [shape: f32[32,32], index: 7, kind: input, shape index: {}]   ;;  %s4554_s8 = inlined_call_operand.hbm [shape: f32[1,32], index: 8, kind: input, shape index: {}]   ;;  %s4555_s9 = inlined_call_operand.vmem [shape: f32[32,32], index: 9, kind: input, shape index: {}]   ;;  %s4556_s10 = inlined_call_operand.hbm [shape: f32[1,32], index: 10, kind: input, shape index: {}]   ;;  %s4557_s11 = inlined_call_operand.vmem [shape: f32[32,32], index: 11, kind: input, shape index: {}]   ;;  %s4558_s12 = inlined_call_operand.hbm [shape: f32[1,32], index: 12, kind: input, shape index: {}]   ;;  %s4559_s13 = inlined_call_operand.vmem [shape: f32[32,32], index: 13, kind: input, shape index: {}]   ;;  %s4560_s14 = inlined_call_operand.hbm [shape: f32[1,32], index: 14, kind: input, shape index: {}]   ;;  %s4561_s15 = inlined_call_operand.hbm [shape: f32[1,32], index: 15, kind: input, shape index: {}]   ;;  %s4562_s16 = inlined_call_operand.hbm [shape: f32[1,32], index: 16, kind: input, shape index: {}]   ;;  %s4563_s17 = inlined_call_operand.hbm [shape: f32[32,64], index: 17, kind: input, shape index: {}]   ;;  %s4564_s18 = inlined_call_operand.vmem [shape: f32[1,64], index: 18, kind: input, shape index: {}]   ;;  %s4565_s19 = inlined_call_operand.vmem [shape: f32[64,32], index: 19, kind: input, shape index: {}]   ;;  %s4566_s20 = inlined_call_operand.vmem [shape: f32[1,32], index: 20, kind: input, shape index: {}]   ;;  %s4567_s21 = inlined_call_operand.hbm [shape: f32[2,8,32], index: 21, kind: output, shape index: {0}]   ;;  %s4568_s22 = inlined_call_operand.hbm [shape: f32[2,4,8,8], index: 22, kind: output, shape index: {1}]  }
   0x1   :  { %4609 = sst [smem:[#allocation46_spill]] %s4546_s0 }
   0x2   :  { %4610 = sst [smem:[#allocation47_spill]] %s4547_s1 }
   0x3   :  { %4611 = sst [smem:[#allocation48_spill]] %s4548_s2 }
   0x4   :  { %4612 = sst [smem:[#allocation49_spill]] %s4549_s3 }
   0x5   :  { %4613 = sst [smem:[#allocation50_spill]] %s4550_s4 }
   0x6   :  { %4614 = sst [smem:[#allocation51_spill]] %s4551_s5 }
   0x7   :  { %4615 = sst [smem:[#allocation52_spill]] %s4552_s6 }
   0x8   :  { %4616 = sst [smem:[#allocation53_spill]] %s4553_s7 }
   0x9   :  { %4617 = sst [smem:[#allocation54_spill]] %s4554_s8 }
   0xa   :  { %4618 = sst [smem:[#allocation55_spill]] %s4555_s9 }
   0xb   :  { %4619 = sst [smem:[#allocation56_spill]] %s4556_s10 }
   0xc   :  { %4620 = sst [smem:[#allocation57_spill]] %s4557_s11 }
   0xd   :  { %4621 = sst [smem:[#allocation58_spill]] %s4559_s13 }
   0xe   :  { %4622 = sst [smem:[#allocation59_spill]] %s4560_s14 }
   0xf   :  { %4623 = sst [smem:[#allocation60_spill]] %s4562_s16 }
  0x10   :  { %4624 = sst [smem:[#allocation61_spill]] %s4564_s18 }
  0x11   :  { %4625 = sst [smem:[#allocation62_spill]] %s4565_s19 }
  0x12   :  { %4626 = sst [smem:[#allocation63_spill]] %s4566_s20 }
  0x13   :  { %4627 = sst [smem:[#allocation64_spill]] %s4567_s21 }
  0x14   :  { %4628 = sst [smem:[#allocation65_spill]] %s4568_s22 }
  0x15   :  { %28 = vsyncpa [#allocation6], 0 }
  0x16   :  { %29 = vsyncpa [#allocation4], 0 }
  0x17   :  { %31 = vsyncpa [#allocation4 + $0x1], 0 }
  0x18   :  { %32 = vsyncpa [#allocation9], 0 }
  0x19   :  { %34 = vsyncpa [#allocation9 + $0x1], 0 }
  0x1a   :  { %35 = vsyncpa [#allocation12], 0 }
  0x1b   :  { %37 = vsyncpa [#allocation12 + $0x1], 0 }
  0x1c   :  { %38 = vsyncpa [#allocation15], 0 }
  0x1d   :  { %39 = vsyncpa [#allocation18], 0 }
  0x1e   :  { %40 = vsyncpa [#allocation21], 0 }
  0x1f   :  { %41 = vsyncpa [#allocation24], 0 }
  0x20   :  { %42 = vsyncpa [#allocation5], 0 }
  0x21   :  { %44 = vsyncpa [#allocation5 + $0x1], 0 }
  0x22   :  { %45 = vsyncpa [#allocation28], 0 }
  0x23   :  { %47 = vsyncpa [#allocation28 + $0x1], 0  ;;  %s3766_s3 = smov 0   ;;  %s3768_s28 = smov 0  }
  0x24   :  { %s3770_s29 = smov 0   ;;  %s3772_s30 = smov 0  }
  0x25   :  { %s3774_s4 = smov 0   ;;  %s3776_s0 = smov 0  }
  0x26 LB: > { %4629 = sst [smem:[#allocation40_spill]] %s3601_s3  ;;  %s3623_s23 = smov [#allocation13]   ;;  %s3621_s0 = sphi %s3776_s0, %s53_s0   ;;  %s3617_s4 = sphi %s3774_s4, %s4699_s4   ;;  %s3613_s30 = sphi %s3772_s30, %s4698_s30   ;;  %s3609_s29 = sphi %s3770_s29, %s4702_s29   ;;  %s3605_s28 = sphi %s3768_s28, %s4701_s28   ;;  %s3601_s3 = sphi %s3766_s3, %s4700_s3  }
  0x27   : > { %4630 = sst [smem:[#allocation41_spill]] %s3613_s30  ;;  %s613_s1 = sshll.u32 %s3623_s23, 4  ;;  %s3802_s1 = int_to_ptr.vmem [resolvable:$true] %s613_s1 }
  0x28   : > { %4631 = sst [smem:[#allocation42_spill]] %s3617_s4  ;;  %s3797_s5 = sadd.s32 4294967295, %s3621_s0  }
  0x29   : > { %p2587_p0 = scmp.ge.s32.totalorder %s3621_s0, 1  ;;  %p4584_p1 = scmp.eq.s32.totalorder %s3797_s5, 0 }
  0x2a   : > { %p591_p2 = scmp.lt.s32.totalorder %s3621_s0, 3  ;;  %s3624_s6 = smov [#allocation14]  }
  0x2b   : > { %s624_s25 = sshll.u32 %s3624_s6, 4  ;;  %s3625_s26 = smov [#allocation17]   ;;  %s3811_s25 = int_to_ptr.vmem [resolvable:$true] %s624_s25 }
  0x2c   : > { %p3804_p3 = pnand %p2587_p0, %p591_p2  ;;  %s652_s2 = sshll.u32 %s3625_s26, 4  ;;  %s3819_s2 = int_to_ptr.vmem [resolvable:$true] %s652_s2 }
  0x2d   : > { %s3626_s23 = smov [#allocation20]   ;;  %s4634_s18 = sld [smem:[#allocation51_spill]] }
  0x2e   : > { %s4632_s24 = scalar_select %p3804_p3, 1, 0 }
  0x2f   : > { %p2923_p5 = pneg %p3804_p3  ;;  %s3821_s21 = sshll.u32 %s3626_s23, 4  ;;  %s681_s21 = int_to_ptr.vmem [resolvable:$true] %s3821_s21 }
  0x31   : > { %p3815_p6 = pnand %p2923_p5, %p4584_p1 }
  0x33   : > { %s4633_s27 = scalar_select %p3815_p6, 1, 0 }
  0x34   : > { %s3090_s30 = scalar_lea.hbm %s4634_s18, 16  ;;  %p3831_p8 = pneg %p3815_p6 }
  0x35   : > { %p3091_p7 = scmp.ne.s32.totalorder %s4634_s18, %s3090_s30  ;;  %p3097_p11 = scmp.lt.u32.totalorder %s3090_s30, %s4634_s18 }
  0x36   : > { %s4635_s26 = scalar_select %p3831_p8, 1, 0 }
  0x37   : > { %p3093_p9 = pnand %p3831_p8, %p3091_p7 }
  0x39   : > { %p3094_p10 = pneg %p3093_p9 }
  0x3b   : > { %p3099_p12 = pnand %p3097_p11, %p3094_p10 }
  0x3d   : > { %3102 = shalt.err (!%p3099_p12)
}
  0x3e   : > { %s3103_s19 = scalar_lea.vmem %s3802_s1, 16  ;;  %s3110_s20 = scalar_lea.vmem %s3802_s1, 32 }
  0x3f   : > { %p3104_p13 = scmp.ne.s32.totalorder %s3802_s1, %s3103_s19  ;;  %p3111_p5 = scmp.lt.s32.totalorder %s3802_s1, %s3802_s1 }
  0x40   : > { %p3112_p7 = scmp.lt.s32.totalorder %s3110_s20, %s3103_s19 }
  0x41   : > { %p3106_p0 = pnand %p3104_p13, %p3831_p8 }
  0x42   : > { %p3113_p9 = por %p3112_p7, %p3111_p5 }
  0x43   : > { %p3107_p2 = pneg %p3106_p0 }
  0x45   : > { %p3114_p4 = pnand %p3113_p9, %p3107_p2 }
  0x47   : > { %3117 = shalt.err (!%p3114_p4)
}
  0x48   : > { %2929 = dma.hbm_to_vmem [thread:$0]  (!%p3815_p6), %s4634_s18, 16, %s3802_s1, [#allocation12]  }
  0x49   : > { %s4636_s23 = sld [smem:[#allocation52_spill]] }
  0x4f   : > { %s3118_s9 = scalar_lea.hbm %s4636_s23, 16 }
  0x50   : > { %p3119_p10 = scmp.ne.s32.totalorder %s4636_s23, %s3118_s9  ;;  %p3125_p4 = scmp.lt.u32.totalorder %s3118_s9, %s4636_s23 }
  0x52   : > { %p3121_p11 = pnand %p3119_p10, %p3831_p8 }
  0x54   : > { %p3122_p12 = pneg %p3121_p11 }
  0x56   : > { %p3127_p13 = pnand %p3125_p4, %p3122_p12 }
  0x58   : > { %3130 = shalt.err (!%p3127_p13)
}
  0x59   : > { %s3131_s1 = scalar_lea.vmem %s3811_s25, 16  ;;  %s3138_s7 = scalar_lea.vmem %s3811_s25, 32 }
  0x5a   : > { %p3132_p0 = scmp.ne.s32.totalorder %s3811_s25, %s3131_s1  ;;  %p3139_p7 = scmp.lt.s32.totalorder %s3811_s25, %s3811_s25 }
  0x5b   : > { %p3140_p9 = scmp.lt.s32.totalorder %s3138_s7, %s3131_s1 }
  0x5c   : > { %p3134_p2 = pnand %p3132_p0, %p3831_p8 }
  0x5d   : > { %p3141_p10 = por %p3140_p9, %p3139_p7 }
  0x5e   : > { %p3135_p5 = pneg %p3134_p2 }
  0x60   : > { %p3142_p11 = pnand %p3141_p10, %p3135_p5 }
  0x62   : > { %3145 = shalt.err (!%p3142_p11)
}
  0x63   : > { %2932 = dma.hbm_to_vmem [thread:$0]  (!%p3815_p6), %s4636_s23, 16, %s3811_s25, [#allocation15]  }
  0x64   : > { %s4637_s10 = sld [smem:[#allocation56_spill]] }
  0x6a   : > { %s3146_s30 = scalar_lea.hbm %s4637_s10, 16 }
  0x6b   : > { %p3147_p12 = scmp.ne.s32.totalorder %s4637_s10, %s3146_s30  ;;  %p3153_p0 = scmp.lt.u32.totalorder %s3146_s30, %s4637_s10 }
  0x6d   : > { %p3149_p4 = pnand %p3147_p12, %p3831_p8 }
  0x6f   : > { %p3150_p13 = pneg %p3149_p4 }
  0x71   : > { %p3155_p2 = pnand %p3153_p0, %p3150_p13 }
  0x73   : > { %3158 = shalt.err (!%p3155_p2)
}
  0x74   : > { %s3159_s25 = scalar_lea.vmem %s3819_s2, 16  ;;  %s3166_s7 = scalar_lea.vmem %s3819_s2, 32 }
  0x75   : > { %p3160_p5 = scmp.ne.s32.totalorder %s3819_s2, %s3159_s25  ;;  %p3167_p10 = scmp.lt.s32.totalorder %s3819_s2, %s3819_s2 }
  0x76   : > { %p3168_p11 = scmp.lt.s32.totalorder %s3166_s7, %s3159_s25 }
  0x77   : > { %p3162_p7 = pnand %p3160_p5, %p3831_p8 }
  0x78   : > { %p3169_p12 = por %p3168_p11, %p3167_p10 }
  0x79   : > { %p3163_p9 = pneg %p3162_p7 }
  0x7b   : > { %p3170_p4 = pnand %p3169_p12, %p3163_p9 }
  0x7d   : > { %3173 = shalt.err (!%p3170_p4)
}
  0x7e   : > { %2938 = dma.hbm_to_vmem [thread:$0]  (!%p3815_p6), %s4637_s10, 16, %s3819_s2, [#allocation18]  }
  0x7f   : > { %s3627_s13 = smov [#allocation23]   ;;  %s4638_s14 = sld [smem:[#allocation59_spill]] }
  0x80   : > { %s702_s22 = sshll.u32 %s3627_s13, 4  ;;  %s703_s22 = int_to_ptr.vmem [resolvable:$true] %s702_s22 }
  0x85   : > { %s3174_s19 = scalar_lea.hbm %s4638_s14, 16 }
  0x86   : > { %p3175_p13 = scmp.ne.s32.totalorder %s4638_s14, %s3174_s19  ;;  %p3181_p5 = scmp.lt.u32.totalorder %s3174_s19, %s4638_s14 }
  0x88   : > { %p3177_p0 = pnand %p3175_p13, %p3831_p8 }
  0x8a   : > { %p3178_p2 = pneg %p3177_p0 }
  0x8c   : > { %p3183_p7 = pnand %p3181_p5, %p3178_p2 }
  0x8e   : > { %3186 = shalt.err (!%p3183_p7)
}
  0x8f   : > { %s3187_s2 = scalar_lea.vmem %s681_s21, 16  ;;  %s3194_s9 = scalar_lea.vmem %s681_s21, 32 }
  0x90   : > { %p3188_p9 = scmp.ne.s32.totalorder %s681_s21, %s3187_s2  ;;  %p3195_p12 = scmp.lt.s32.totalorder %s681_s21, %s681_s21 }
  0x91   : > { %p3196_p4 = scmp.lt.s32.totalorder %s3194_s9, %s3187_s2 }
  0x92   : > { %p3190_p10 = pnand %p3188_p9, %p3831_p8 }
  0x93   : > { %p3197_p1 = por %p3196_p4, %p3195_p12 }
  0x94   : > { %p3191_p11 = pneg %p3190_p10 }
  0x96   : > { %p3198_p3 = pnand %p3197_p1, %p3191_p11 }
  0x98   : > { %3201 = shalt.err (!%p3198_p3)
}
  0x99   : > { %2944 = dma.hbm_to_vmem [thread:$0]  (!%p3815_p6), %s4638_s14, 16, %s681_s21, [#allocation21]  }
  0x9a   : > { %s4639_s16 = sld [smem:[#allocation60_spill]] }
  0xa0   : > { %s3202_s19 = scalar_lea.hbm %s4639_s16, 16 }
  0xa1   : > { %p3203_p13 = scmp.ne.s32.totalorder %s4639_s16, %s3202_s19  ;;  %p3209_p3 = scmp.lt.u32.totalorder %s3202_s19, %s4639_s16 }
  0xa3   : > { %p3205_p0 = pnand %p3203_p13, %p3831_p8 }
  0xa5   : > { %p3206_p1 = pneg %p3205_p0 }
  0xa7   : > { %p3211_p2 = pnand %p3209_p3, %p3206_p1 }
  0xa9   : > { %3214 = shalt.err (!%p3211_p2)
}
  0xaa   : > { %s3215_s2 = scalar_lea.vmem %s703_s22, 16  ;;  %s3222_s21 = scalar_lea.vmem %s703_s22, 32 }
  0xab   : > { %p3216_p5 = scmp.ne.s32.totalorder %s703_s22, %s3215_s2  ;;  %p3223_p10 = scmp.lt.s32.totalorder %s703_s22, %s703_s22 }
  0xac   : > { %p3224_p11 = scmp.lt.s32.totalorder %s3222_s21, %s3215_s2 }
  0xad   : > { %p3218_p7 = pnand %p3216_p5, %p3831_p8 }
  0xae   : > { %p3225_p12 = por %p3224_p11, %p3223_p10 }
  0xaf   : > { %p3219_p9 = pneg %p3218_p7 }
  0xb1   : > { %p3226_p4 = pnand %p3225_p12, %p3219_p9 }
  0xb3   : > { %3229 = shalt.err (!%p3226_p4)
}
  0xb4   : > { %2950 = dma.hbm_to_vmem [thread:$0]  (!%p3815_p6), %s4639_s16, 16, %s703_s22, [#allocation24]  }
  0xb5   : > { %s2586_s13 = sadd.s32 4294967294, %s3621_s0   ;;  %s65_s30 = sadd.s32 1, %s3617_s4 }
  0xb6   : > { %s93_s6 = sadd.s32 1, %s3609_s29  ;;  %p67_p13 = scmp.ge.s32.totalorder %s65_s30, 2 }
  0xb7   : > { %p100_p0 = scmp.ne.s32.totalorder %s3609_s29, %s3605_s28  ;;  %p101_p1 = scmp.eq.s32.totalorder %s3621_s0, 0 }
  0xb8   : > { %p106_p3 = scmp.ne.s32.totalorder %s3605_s28, %s3601_s3  ;;  %s4704_s30 = smov (%p67_p13, %s65_s30), 0 }
  0xb9   : > { %4640 = sst [smem:[#allocation43_spill]] %s4704_s30  ;;  %p3948_p2 = por %p101_p1, %p100_p0 }
  0xba   : > { %p4642_p5 = scmp.eq.s32.totalorder %s3797_s5, 0  ;;  %s90_s20 = ssub.s32 %s3617_s4, %s4704_s30 }
  0xbb   : > { %p550_p9 = scmp.eq.s32.totalorder %s3797_s5, 1  ;;  %p91_p10 = scmp.eq.s32.totalorder %s90_s20, 0 }
  0xbc   : > { %p3954_p7 = por %p4642_p5, %p106_p3  ;;  %p556_p11 = scmp.eq.s32.totalorder %s2586_s13, 1 }
  0xbd   : > { %p3961_p12 = por %p550_p9, %p100_p0  ;;  %p2984_p4 = scmp.lt.s32.totalorder %s3621_s0, 2 }
  0xbe   : > { %s4643_s22 = scalar_select %p3954_p7, 1, 0 }
  0xbf   : > { %s4644_s1 = scalar_select %p3961_p12, 1, 0 }
  0xc0   : > { %s3967_s25 = scalar_select %p91_p10, %s3609_s29, %s93_s6  }
  0xc1   : > { %p3969_p13 = por %p556_p11, %p106_p3  ;;  %s4586_s2 = sand.u32 1, %s3609_s29  }
  0xc2   : > { %4645 = sst [smem:[#allocation44_spill]] %s3967_s25  ;;  %s3976_s21 = sshll.u32 %s4586_s2, 3 }
  0xc3   : > { %s4646_s7 = scalar_select %p3969_p13, 1, 0 }
  0xc4   : > { %s3979_s9 = sshll.u32 %s3617_s4, 7  ;;  %p3983_p0 = pnand %p2984_p4, %p3948_p2 }
  0xc5   : > { %4647 = sst [smem:[#allocation45_spill]] %s4646_s7  ;;  %s4592_s13 = sand.u32 1, %s3621_s0  }
  0xc6   : > { %s4648_s11 = scalar_select %p3983_p0, 1, 0 }
  0xc7   : > { %s4649_s10 = sld [smem:[#allocation48_spill]]  ;;  %s757_s2 = scalar_lea.vmem [#allocation8], %s3976_s21 }
  0xc8   : > { %s765_s16 = sshll.u32 %s757_s2, 4  ;;  %s3999_s19 = scalar_lea.sflag [#allocation9], %s4592_s13  ;;  %s3995_s16 = int_to_ptr.vmem [resolvable:$true] %s765_s16 }
  0xc9   : > { %p4005_p3 = pneg %p3983_p0 }
  0xcb   : > { %s4650_s23 = scalar_select %p4005_p3, 1, 0 }
  0xcd   : > { %s3992_s14 = scalar_lea.hbm %s4649_s10, %s3979_s9  ;;  %s3235_s2 = scalar_lea.hbm %s4649_s10, 256 }
  0xce   : > { %s3230_s18 = scalar_lea.hbm %s3992_s14, 128  ;;  %p3236_p9 = scmp.lt.u32.totalorder %s3992_s14, %s4649_s10 }
  0xcf   : > { %p3231_p1 = scmp.ne.s32.totalorder %s3992_s14, %s3230_s18  ;;  %p3237_p10 = scmp.lt.u32.totalorder %s3235_s2, %s3230_s18 }
  0xd0   : > { %p3239_p4 = scmp.lt.u32.totalorder %s3230_s18, %s3992_s14 }
  0xd1   : > { %p3233_p2 = pnand %p4005_p3, %p3231_p1  ;;  %p3238_p11 = por %p3237_p10, %p3236_p9 }
  0xd3   : > { %p3234_p5 = pneg %p3233_p2  ;;  %p3240_p13 = por %p3239_p4, %p3238_p11 }
  0xd5   : > { %p3241_p12 = pnand %p3240_p13, %p3234_p5 }
  0xd7   : > { %3244 = shalt.err (!%p3241_p12)
}
  0xd8   : > { %s3245_s13 = scalar_lea.vmem %s3995_s16, 128  ;;  %s3628_s6 = smov [#allocation8]  }
  0xd9   : > { %p3246_p1 = scmp.ne.s32.totalorder %s3995_s16, %s3245_s13  ;;  %s3250_s20 = sshll.u32 %s3628_s6, 4  ;;  %s3251_s20 = int_to_ptr.vmem [resolvable:$false] %s3250_s20 }
  0xda   : > { %s3252_s4 = scalar_lea.vmem %s3251_s20, 256  ;;  %p3253_p6 = scmp.lt.s32.totalorder %s3995_s16, %s3251_s20 }
  0xdb   : > { %p3248_p2 = pnand %p3246_p1, %p4005_p3  ;;  %p3254_p8 = scmp.lt.s32.totalorder %s3252_s4, %s3245_s13 }
  0xdd   : > { %p3249_p7 = pneg %p3248_p2  ;;  %p3255_p9 = por %p3254_p8, %p3253_p6 }
  0xdf   : > { %p3256_p10 = pnand %p3255_p9, %p3249_p7 }
  0xe1   : > { %3259 = shalt.err (!%p3256_p10)
}
  0xe2   : > { %2960 = dma.hbm_to_vmem [thread:$0]  (!%p3983_p0), %s3992_s14, 128, %s3995_s16, %s3999_s19  }
  0xe3   : > { %s4651_s2 = sld [smem:[#allocation46_spill]]  ;;  %p4652_p13 = scmp.ne.s32.totalorder %s4635_s26, 0 }
  0xe9   : > { %s3260_s10 = scalar_lea.hbm %s4651_s2, 16 }
  0xea   : > { %p3261_p12 = scmp.ne.s32.totalorder %s4651_s2, %s3260_s10  ;;  %p3267_p8 = scmp.lt.u32.totalorder %s3260_s10, %s4651_s2 }
  0xec   : > { %p3263_p5 = pnand %p3261_p12, %p4652_p13 }
  0xee   : > { %p3264_p6 = pneg %p3263_p5 }
  0xf0   : > { %p3269_p7 = pnand %p3267_p8, %p3264_p6 }
  0xf2   : > { %3272 = shalt.err (!%p3269_p7)
}
  0xf3   : > { %s3629_s4 = smov [#allocation3]   ;;  %p4653_p11 = scmp.ne.s32.totalorder %s4633_s27, 0 }
  0xf4   : > { %s3630_s18 = smov [#allocation16]   ;;  %s3631_s30 = smov [#allocation19]  }
  0xf5   : > { %2926 = dma.hbm_to_smem (!%p4653_p11), %s4651_s2, 16, %s3629_s4, [#allocation6]  }
  0xf6   : > { %s638_s25 = sshll.u32 %s3630_s18, 4  ;;  %s666_s6 = sshll.u32 %s3631_s30, 4  ;;  %s639_s25 = int_to_ptr.vmem [resolvable:$true] %s638_s25  ;;  %s4045_s6 = int_to_ptr.vmem [resolvable:$true] %s666_s6 }
  0xf7   : > { %s4654_s8 = sld [smem:[#allocation54_spill]] }
  0xfd   : > { %s3273_s10 = scalar_lea.hbm %s4654_s8, 16 }
  0xfe   : > { %p3274_p4 = scmp.ne.s32.totalorder %s4654_s8, %s3273_s10  ;;  %p3280_p9 = scmp.lt.u32.totalorder %s3273_s10, %s4654_s8 }
 0x100   : > { %p3276_p1 = pnand %p3274_p4, %p4652_p13 }
 0x102   : > { %p3277_p2 = pneg %p3276_p1 }
 0x104   : > { %p3282_p10 = pnand %p3280_p9, %p3277_p2 }
 0x106   : > { %3285 = shalt.err (!%p3282_p10)
}
 0x107   : > { %s3286_s16 = scalar_lea.vmem %s639_s25, 16  ;;  %s3293_s7 = scalar_lea.vmem %s639_s25, 32 }
 0x108   : > { %p3287_p12 = scmp.ne.s32.totalorder %s639_s25, %s3286_s16  ;;  %p3294_p8 = scmp.lt.s32.totalorder %s639_s25, %s639_s25 }
 0x109   : > { %p3295_p7 = scmp.lt.s32.totalorder %s3293_s7, %s3286_s16 }
 0x10a   : > { %p3289_p5 = pnand %p3287_p12, %p4652_p13 }
 0x10b   : > { %p3296_p0 = por %p3295_p7, %p3294_p8 }
 0x10c   : > { %p3290_p6 = pneg %p3289_p5 }
 0x10e   : > { %p3297_p3 = pnand %p3296_p0, %p3290_p6 }
 0x110   : > { %3300 = shalt.err (!%p3297_p3)
}
 0x111   : > { %2935 = dma.hbm_to_vmem [thread:$0]  (!%p4653_p11), %s4654_s8, 16, %s639_s25, [#allocation15]  }
 0x112   : > { %s3301_s10 = scalar_lea.hbm %s4558_s12, 16 }
 0x113   : > { %p3302_p4 = scmp.ne.s32.totalorder %s4558_s12, %s3301_s10  ;;  %p3308_p0 = scmp.lt.u32.totalorder %s3301_s10, %s4558_s12 }
 0x115   : > { %p3304_p1 = pnand %p3302_p4, %p4652_p13 }
 0x117   : > { %p3305_p2 = pneg %p3304_p1 }
 0x119   : > { %p3310_p3 = pnand %p3308_p0, %p3305_p2 }
 0x11b   : > { %3313 = shalt.err (!%p3310_p3)
}
 0x11c   : > { %s3314_s25 = scalar_lea.vmem %s4045_s6, 16  ;;  %s3321_s7 = scalar_lea.vmem %s4045_s6, 32 }
 0x11d   : > { %p3315_p9 = scmp.ne.s32.totalorder %s4045_s6, %s3314_s25  ;;  %p3322_p5 = scmp.lt.s32.totalorder %s4045_s6, %s4045_s6 }
 0x11e   : > { %p3323_p6 = scmp.lt.s32.totalorder %s3321_s7, %s3314_s25 }
 0x11f   : > { %p3317_p10 = pnand %p3315_p9, %p4652_p13 }
 0x120   : > { %p3324_p8 = por %p3323_p6, %p3322_p5 }
 0x121   : > { %p3318_p12 = pneg %p3317_p10 }
 0x123   : > { %p3325_p7 = pnand %p3324_p8, %p3318_p12 }
 0x125   : > { %3328 = shalt.err (!%p3325_p7)
}
 0x126   : > { %2941 = dma.hbm_to_vmem [thread:$0]  (!%p4653_p11), %s4558_s12, 16, %s4045_s6, [#allocation18]  }
 0x127   : > { %s3632_s30 = smov [#allocation22]   ;;  %s3633_s10 = smov [#allocation25]  }
 0x128   : > { %s691_s13 = sshll.u32 %s3632_s30, 4  ;;  %s712_s20 = sshll.u32 %s3633_s10, 4  ;;  %s692_s13 = int_to_ptr.vmem [resolvable:$true] %s691_s13  ;;  %s4089_s20 = int_to_ptr.vmem [resolvable:$true] %s712_s20 }
 0x129   : > { %s3329_s16 = scalar_lea.hbm %s4561_s15, 16 }
 0x12a   : > { %p3330_p4 = scmp.ne.s32.totalorder %s4561_s15, %s3329_s16  ;;  %p3336_p0 = scmp.lt.u32.totalorder %s3329_s16, %s4561_s15 }
 0x12c   : > { %p3332_p1 = pnand %p3330_p4, %p4652_p13 }
 0x12e   : > { %p3333_p2 = pneg %p3332_p1 }
 0x130   : > { %p3338_p3 = pnand %p3336_p0, %p3333_p2 }
 0x132   : > { %3341 = shalt.err (!%p3338_p3)
}
 0x133   : > { %s3342_s18 = scalar_lea.vmem %s692_s13, 16  ;;  %s3349_s30 = scalar_lea.vmem %s692_s13, 32 }
 0x134   : > { %p3343_p9 = scmp.ne.s32.totalorder %s692_s13, %s3342_s18  ;;  %p3350_p5 = scmp.lt.s32.totalorder %s692_s13, %s692_s13 }
 0x135   : > { %p3351_p6 = scmp.lt.s32.totalorder %s3349_s30, %s3342_s18 }
 0x136   : > { %p3345_p10 = pnand %p3343_p9, %p4652_p13 }
 0x137   : > { %p3352_p8 = por %p3351_p6, %p3350_p5 }
 0x138   : > { %p3346_p12 = pneg %p3345_p10 }
 0x13a   : > { %p3353_p7 = pnand %p3352_p8, %p3346_p12 }
 0x13c   : > { %3356 = shalt.err (!%p3353_p7)
}
 0x13d   : > { %2947 = dma.hbm_to_vmem [thread:$0]  (!%p4653_p11), %s4561_s15, 16, %s692_s13, [#allocation21]  }
 0x13e   : > { %s3357_s25 = scalar_lea.hbm %s4563_s17, 512 }
 0x13f   : > { %p3358_p4 = scmp.ne.s32.totalorder %s4563_s17, %s3357_s25  ;;  %p3364_p0 = scmp.lt.u32.totalorder %s3357_s25, %s4563_s17 }
 0x141   : > { %p3360_p1 = pnand %p3358_p4, %p4652_p13 }
 0x143   : > { %p3361_p2 = pneg %p3360_p1 }
 0x145   : > { %p3366_p3 = pnand %p3364_p0, %p3361_p2 }
 0x147   : > { %3369 = shalt.err (!%p3366_p3)
}
 0x148   : > { %s3370_s13 = scalar_lea.vmem %s4089_s20, 512  ;;  %p3378_p5 = scmp.lt.s32.totalorder %s4089_s20, %s4089_s20 }
 0x149   : > { %p3371_p9 = scmp.ne.s32.totalorder %s4089_s20, %s3370_s13  ;;  %p3379_p6 = scmp.lt.s32.totalorder %s3370_s13, %s3370_s13 }
 0x14b   : > { %p3373_p10 = pnand %p3371_p9, %p4652_p13  ;;  %p3380_p8 = por %p3379_p6, %p3378_p5 }
 0x14d   : > { %p3374_p12 = pneg %p3373_p10 }
 0x14f   : > { %p3381_p7 = pnand %p3380_p8, %p3374_p12 }
 0x151   : > { %3384 = shalt.err (!%p3381_p7)
}
 0x152   : > { %s3634_s30 = smov 128   ;;  %s3635_s10 = smov 8  }
 0x153   : > { %2953 = dma.hbm_to_vmem [thread:$0]  (!%p4653_p11), %s4563_s17, 512, %s4089_s20, [#allocation24], %s3634_s30, %s3634_s30, %s3635_s10  }
 0x154   : > { %s4655_s25 = sld [smem:[#allocation47_spill]]  ;;  %s739_s3 = scalar_lea.vmem [#allocation7], %s3976_s21 }
 0x155   : > { %s746_s6 = sshll.u32 %s739_s3, 4  ;;  %s4656_s18 = sand.u32 1, %s3609_s29   ;;  %s747_s6 = int_to_ptr.vmem [resolvable:$true] %s746_s6 }
 0x156   : > { %s736_s13 = scalar_lea.sflag [#allocation4], %s4656_s18  ;;  %p4657_p4 = scmp.ne.s32.totalorder %s4650_s23, 0 }
 0x15a   : > { %s4136_s7 = scalar_lea.hbm %s4655_s25, %s3979_s9  ;;  %s3390_s30 = scalar_lea.hbm %s4655_s25, 256 }
 0x15b   : > { %s3385_s2 = scalar_lea.hbm %s4136_s7, 128  ;;  %p3391_p11 = scmp.lt.u32.totalorder %s4136_s7, %s4655_s25 }
 0x15c   : > { %p3386_p13 = scmp.ne.s32.totalorder %s4136_s7, %s3385_s2  ;;  %p3392_p0 = scmp.lt.u32.totalorder %s3390_s30, %s3385_s2 }
 0x15d   : > { %p3394_p9 = scmp.lt.u32.totalorder %s3385_s2, %s4136_s7 }
 0x15e   : > { %p3388_p1 = pnand %p3386_p13, %p4657_p4  ;;  %p3393_p3 = por %p3392_p0, %p3391_p11 }
 0x160   : > { %p3389_p2 = pneg %p3388_p1  ;;  %p3395_p10 = por %p3394_p9, %p3393_p3 }
 0x162   : > { %p3396_p12 = pnand %p3395_p10, %p3389_p2 }
 0x164   : > { %3399 = shalt.err (!%p3396_p12)
}
 0x165   : > { %s3400_s4 = scalar_lea.vmem %s747_s6, 128  ;;  %s3636_s26 = smov [#allocation7]  }
 0x166   : > { %p3401_p5 = scmp.ne.s32.totalorder %s747_s6, %s3400_s4  ;;  %s3405_s16 = sshll.u32 %s3636_s26, 4  ;;  %s3406_s16 = int_to_ptr.vmem [resolvable:$false] %s3405_s16 }
 0x167   : > { %s3407_s3 = scalar_lea.vmem %s3406_s16, 256  ;;  %p3408_p7 = scmp.lt.s32.totalorder %s747_s6, %s3406_s16 }
 0x168   : > { %p3403_p6 = pnand %p3401_p5, %p4657_p4  ;;  %p3409_p13 = scmp.lt.s32.totalorder %s3407_s3, %s3400_s4 }
 0x16a   : > { %p3404_p8 = pneg %p3403_p6  ;;  %p3410_p1 = por %p3409_p13, %p3408_p7 }
 0x16c   : > { %p3411_p0 = pnand %p3410_p1, %p3404_p8 }
 0x16e   : > { %3414 = shalt.err (!%p3411_p0)
}
 0x16f   : > { %p4658_p11 = scmp.ne.s32.totalorder %s4648_s11, 0  ;;  %s4659_s27 = sld [smem:[#allocation49_spill]] }
 0x170   : > { %s776_s30 = scalar_lea.vmem [#allocation10], %s3976_s21 }
 0x171   : > { %2957 = dma.hbm_to_vmem [thread:$0]  (!%p4658_p11), %s4136_s7, 128, %s747_s6, %s736_s13  }
 0x172   : > { %s783_s10 = sshll.u32 %s776_s30, 4  ;;  %s784_s10 = int_to_ptr.vmem [resolvable:$true] %s783_s10 }
 0x175   : > { %s4162_s20 = scalar_lea.hbm %s4659_s27, %s3979_s9  ;;  %s3420_s7 = scalar_lea.hbm %s4659_s27, 256 }
 0x176   : > { %s3415_s14 = scalar_lea.hbm %s4162_s20, 128  ;;  %p3421_p10 = scmp.lt.u32.totalorder %s4162_s20, %s4659_s27 }
 0x177   : > { %p3416_p2 = scmp.ne.s32.totalorder %s4162_s20, %s3415_s14  ;;  %p3422_p12 = scmp.lt.u32.totalorder %s3420_s7, %s3415_s14 }
 0x178   : > { %p3424_p6 = scmp.lt.u32.totalorder %s3415_s14, %s4162_s20 }
 0x179   : > { %p3418_p3 = pnand %p3416_p2, %p4657_p4  ;;  %p3423_p5 = por %p3422_p12, %p3421_p10 }
 0x17b   : > { %p3419_p9 = pneg %p3418_p3  ;;  %p3425_p8 = por %p3424_p6, %p3423_p5 }
 0x17d   : > { %p3426_p7 = pnand %p3425_p8, %p3419_p9 }
 0x17f   : > { %3429 = shalt.err (!%p3426_p7)
}
 0x180   : > { %s3430_s16 = scalar_lea.vmem %s784_s10, 128  ;;  %s3637_s3 = smov [#allocation10]  }
 0x181   : > { %p3431_p13 = scmp.ne.s32.totalorder %s784_s10, %s3430_s16  ;;  %s3435_s2 = sshll.u32 %s3637_s3, 4  ;;  %s3436_s2 = int_to_ptr.vmem [resolvable:$false] %s3435_s2 }
 0x182   : > { %s3437_s18 = scalar_lea.vmem %s3436_s2, 256  ;;  %p3438_p2 = scmp.lt.s32.totalorder %s784_s10, %s3436_s2 }
 0x183   : > { %p3433_p1 = pnand %p3431_p13, %p4657_p4  ;;  %p3439_p3 = scmp.lt.s32.totalorder %s3437_s18, %s3430_s16 }
 0x185   : > { %p3434_p0 = pneg %p3433_p1  ;;  %p3440_p11 = por %p3439_p3, %p3438_p2 }
 0x187   : > { %p3441_p10 = pnand %p3440_p11, %p3434_p0 }
 0x189   : > { %3444 = shalt.err (!%p3441_p10)
}
 0x18a   : > { %p4660_p12 = scmp.ne.s32.totalorder %s4648_s11, 0  ;;  %s4661_s4 = sld [smem:[#allocation50_spill]] }
 0x18b   : > { %s794_s6 = scalar_lea.vmem [#allocation11], %s3976_s21  ;;  %s4663_s16 = sand.u32 1, %s3621_s0  }
 0x18c   : > { %2963 = dma.hbm_to_vmem [thread:$0]  (!%p4660_p12), %s4162_s20, 128, %s784_s10, %s3999_s19  }
 0x18d   : > { %s802_s13 = sshll.u32 %s794_s6, 4  ;;  %s791_s3 = scalar_lea.sflag [#allocation12], %s4663_s16  ;;  %s803_s13 = int_to_ptr.vmem [resolvable:$true] %s802_s13 }
 0x190   : > { %s4662_s26 = smov %s4661_s4  ;;  %s4187_s7 = scalar_lea.hbm %s4661_s4, %s3979_s9 }
 0x191   : > { %s3445_s2 = scalar_lea.hbm %s4187_s7, 128  ;;  %s3450_s10 = scalar_lea.hbm %s4662_s26, 256 }
 0x192   : > { %p3446_p11 = scmp.ne.s32.totalorder %s4187_s7, %s3445_s2  ;;  %p3451_p6 = scmp.lt.u32.totalorder %s4187_s7, %s4662_s26 }
 0x193   : > { %p3452_p8 = scmp.lt.u32.totalorder %s3450_s10, %s3445_s2  ;;  %p3454_p13 = scmp.lt.u32.totalorder %s3445_s2, %s4187_s7 }
 0x194   : > { %p3448_p9 = pnand %p3446_p11, %p4657_p4 }
 0x195   : > { %p3453_p7 = por %p3452_p8, %p3451_p6 }
 0x196   : > { %p3449_p5 = pneg %p3448_p9 }
 0x197   : > { %p3455_p1 = por %p3454_p13, %p3453_p7 }
 0x199   : > { %p3456_p0 = pnand %p3455_p1, %p3449_p5 }
 0x19b   : > { %3459 = shalt.err (!%p3456_p0)
}
 0x19c   : > { %s3460_s21 = scalar_lea.vmem %s803_s13, 128  ;;  %s3638_s30 = smov [#allocation11]  }
 0x19d   : > { %p3461_p2 = scmp.ne.s32.totalorder %s803_s13, %s3460_s21  ;;  %s3465_s14 = sshll.u32 %s3638_s30, 4  ;;  %s3466_s14 = int_to_ptr.vmem [resolvable:$false] %s3465_s14 }
 0x19e   : > { %s3467_s4 = scalar_lea.vmem %s3466_s14, 256  ;;  %p3468_p11 = scmp.lt.s32.totalorder %s803_s13, %s3466_s14 }
 0x19f   : > { %p3463_p3 = pnand %p3461_p2, %p4657_p4  ;;  %p3469_p9 = scmp.lt.s32.totalorder %s3467_s4, %s3460_s21 }
 0x1a1   : > { %p3464_p10 = pneg %p3463_p3  ;;  %p3470_p12 = por %p3469_p9, %p3468_p11 }
 0x1a3   : > { %p3471_p6 = pnand %p3470_p12, %p3464_p10 }
 0x1a5   : > { %3474 = shalt.err (!%p3471_p6)
}
 0x1a6   : > { %p4664_p8 = scmp.ne.s32.totalorder %s4648_s11, 0  ;;  %p4665_p5 = scmp.ne.s32.totalorder %s4632_s24, 0 }
 0x1a7   : > { %p4666_p7 = scmp.eq.s32.totalorder (!%p4665_p5), %s3797_s5, 0 }
 0x1a8   : > { %2966 = dma.hbm_to_vmem [thread:$0]  (!%p4664_p8), %s4187_s7, 128, %s803_s13, %s791_s3  }
 0x1a9   : > { %811 = sbr.rel (%p4665_p5) target bundleno = 3008 (0xbc0), region = 104 }
 0x1b0   : > { %3556 = dma.done.wait (%p4666_p7), [#allocation6], 16   ;;  %p4667_p4 = pmov %p4666_p7 }
 0x1b1   : > { %s4216_s23 = sand.u32 1, %s3605_s28   ;;  %p4668_p12 = scmp.ne.s32.totalorder %s4643_s22, 0 }
 0x1b2   : > { %3558 = vsyncadd (%p4667_p4), [#allocation6], 4294967280  ;;  %s4219_s6 = sshll.u32 %s4216_s23, 3  ;;  %s818_s11 = scalar_lea.sflag [#allocation4], %s4216_s23 }
 0x1b3   : > { %s821_s7 = scalar_lea.vmem [#allocation7], %s4219_s6 }
 0x1b4   : > { %3560 = dma.done.wait (%p4668_p12), %s818_s11, 128  }
 0x1b5   : > { %3562 = vsyncadd (%p4668_p12), %s818_s11, 4294967168  ;;  %s826_s24 = sand.u32 1, %s3797_s5   ;;  %s830_s16 = scalar_lea.vmem [#allocation8], %s4219_s6 }
 0x1b6   : > { %s827_s13 = scalar_lea.sflag [#allocation9], %s826_s24 }
 0x1b7   : > { %3564 = dma.done.wait (%p4668_p12), %s827_s13, 256  }
 0x1b8   : > { %3566 = vsyncadd (%p4668_p12), %s827_s13, 4294967040  ;;  %s839_s3 = scalar_lea.vmem [#allocation10], %s4219_s6  ;;  %s845_s2 = scalar_lea.sflag [#allocation12], %s826_s24 }
 0x1b9   : > { %s848_s19 = scalar_lea.vmem [#allocation11], %s4219_s6 }
 0x1ba   : > { %3568 = dma.done.wait (%p4668_p12), %s845_s2, 128  }
 0x1bb   : > { %3570 = vsyncadd (%p4668_p12), %s845_s2, 4294967168  ;;  %p4669_p13 = pmov %p4667_p4 }
 0x1bc   : > { %p4670_p1 = pmov %p4667_p4 }
 0x1bd   : > { %3572 = dma.done.wait (%p4669_p13), [#allocation12], 16  }
 0x1be   : > { %3574 = vsyncadd (%p4670_p1), [#allocation12], 4294967280  ;;  %p4671_p0 = pmov %p4670_p1 }
 0x1c0   : > { %3576 = dma.done.wait (%p4671_p0), [#allocation15], 32   ;;  %p4672_p2 = pmov %p4671_p0 }
 0x1c1   : > { %p4673_p3 = pmov %p4671_p0 }
 0x1c2   : > { %3578 = vsyncadd (%p4672_p2), [#allocation15], 4294967264 }
 0x1c3   : > { %3580 = dma.done.wait (%p4673_p3), [#allocation18], 32   ;;  %p4674_p10 = pmov %p4671_p0 }
 0x1c4   : > { %p4675_p11 = pmov %p4671_p0 }
 0x1c5   : > { %3582 = vsyncadd (%p4674_p10), [#allocation18], 4294967264 }
 0x1c6   : > { %3584 = dma.done.wait (%p4675_p11), [#allocation21], 32   ;;  %p4676_p9 = pmov %p4671_p0 }
 0x1c7   : > { %p4677_p6 = pmov %p4671_p0 }
 0x1c8   : > { %3586 = vsyncadd (%p4676_p9), [#allocation21], 4294967264 }
 0x1c9   : > { %3588 = dma.done.wait (%p4677_p6), [#allocation24], 528   ;;  %p4678_p8 = pmov %p4671_p0 }
 0x1cb   : > { %3590 = vsyncadd (%p4678_p8), [#allocation24], 4294966768 }
 0x1cc   : > { %889 = sfence }
 0x1cd   : > { %vm969_vm0 = vcmask 261120   ;;  %v1014_v0 = vld [vmem:[%s848_s19] sm:$0xff]  ;;  %v998_v1 = vld [vmem:[%s839_s3] sm:$0xff]  ;;  %s4679_s20 = sld [smem:[#allocation53_spill]]  ;;  %v3639_v19 = vmov 0.0|0.0   ;;  %vm3640_vm1 = vmmov 0  }
 0x1ce   : > { %v1015_v2 = vsel %vm969_vm0, %v1014_v0, 0.0  ;;  %v999_v3 = vsel %vm969_vm0, %v998_v1, 0.0  ;;  %v968_v4 = vld [vmem:[%s821_s7] sm:$0xff]  ;;  %2829 = vmatprep.subr.bf16.mxu1 %v3639_v19  ;;  %2841 = vmatprep.subr.bf16.mxu0 %v3639_v19  ;;  %v3641_v23 = vmov 0.0   ;;  %s4680_s7 = sld [smem:[#allocation57_spill]]  ;;  %s4681_s9 = sld [smem:[#allocation55_spill]] }
 0x1cf   : > { %1016 = vadd.xlane.f32.xlu0 %v1015_v2  ;;  %v970_v5 = vsel %vm969_vm0, %v968_v4, 0.0  ;;  %2723 = vmatprep.mubr.msk.f32.mxu1 %vm3640_vm1, %v3641_v23  ;;  %v2624_v42 = vld [vmem:[#allocation13] ss:$0 sm:$0xff]  ;;  %v2625_v46 = vld [vmem:[#allocation14] ss:$0 sm:$0xff]  ;;  %s1030_s24 = sld [smem:[#allocation3]] }
 0x1d0   : > { %2745 = vmatprep.mubr.msk.f32.mxu0 %vm3640_vm1, %v3641_v23  ;;  %s2626_s13 = sld [smem:[#allocation3 + $0x1]]  ;;  %s3642_s3 = smov 120   ;;  %vm1291_vm2 = vcmask 64512   ;;  %vm1628_vm3 = vcmask 130112   ;;  %vm1802_vm4 = vcmask 195712   ;;  %vm1976_vm5 = vcmask 261312  }
 0x1d1   : > { %s3643_s2 = smov 112   ;;  %s3644_s19 = smov 104   ;;  %vm2194_vm6 = vcmask 523264  }
 0x1d2   : > { %s2627_s5 = sld [smem:[#allocation3 + $0x2]]  ;;  %s2623_s22 = sshll.u32 %s4216_s23, 5 }
 0x1d3   : > { %1000 = vadd.xlane.f32.xlu0 %v999_v3  ;;  %v1033_v16 = vld [vmem:[%s4679_s20] sm:$0xff]  ;;  %v1034_v17 = vld [vmem:[%s4679_s20 + $0x8] sm:$0xff]  ;;  %v1035_v20 = vld [vmem:[%s4679_s20 + $0x10] sm:$0xff]  ;;  %s4366_s10 = scalar_lea.vmem [#allocation27], %s2623_s22  ;;  %s3645_s18 = smov 8  }
 0x1d4   : > { %v2830_v18 = vpack.c.bf16 %v1034_v17, %v1033_v16  ;;  %v1036_v21 = vld [vmem:[%s4679_s20 + $0x18] sm:$0xff]  ;;  %v1205_v29 = vld [vmem:[%s4680_s7] sm:$0xff]  ;;  %v1206_v30 = vld [vmem:[%s4680_s7 + $0x8] sm:$0xff]  ;;  %s3646_s21 = smov 16   ;;  %s4682_s4 = sld [smem:[#allocation58_spill]] }
 0x1d5   : > { %v2833_v22 = vpack.c.bf16 %v1036_v21, %v1035_v20  ;;  %v1207_v31 = vld [vmem:[%s4680_s7 + $0x10] sm:$0xff]  ;;  %v2842_v32 = vpack.c.bf16 %v1206_v30, %v1205_v29  ;;  %v1208_v33 = vld [vmem:[%s4680_s7 + $0x18] sm:$0xff]  ;;  %v1119_v44 = vld [vmem:[%s4681_s9] sm:$0xff]  ;;  %v1117_v2 = vstv %s1030_s24  ;;  %s3647_s22 = smov 24   ;;  %s4684_s30 = sld [smem:[#allocation62_spill]] }
 0x1d6   : > { %2831 = vmatpush3.bf16.msra.mxu1 %v2830_v18  ;;  %v2845_v34 = vpack.c.bf16 %v1208_v33, %v1207_v31  ;;  %v1120_v45 = vld [vmem:[%s4681_s9 + $0x8] sm:$0xff]  ;;  %v1121_v52 = vld [vmem:[%s4681_s9 + $0x10] sm:$0xff]  ;;  %v1122_v53 = vld [vmem:[%s4681_s9 + $0x18] sm:$0xff]  ;;  %s4688_s24 = sld [smem:[#allocation65_spill]]  ;;  %p4689_p7 = scmp.ne.s32.totalorder %s4644_s1, 0 }
 0x1d7   : > { %971 = vadd.xlane.f32.xlu0 %v970_v5  ;;  %2832 = vmatprep.subr.bf16.mxu1 %v3639_v19  ;;  %v2836_v49 = vpack.c.bf16 %v1120_v45, %v1119_v44  ;;  %v2839_v54 = vpack.c.bf16 %v1122_v53, %v1121_v52 }
 0x1d8   : > { %2843 = vmatpush3.bf16.msra.mxu0 %v2842_v32 }
 0x1d9   : > { %2844 = vmatprep.subr.bf16.mxu0 %v3639_v19 }
 0x1da   : > { %2834 = vmatpush3.bf16.msra.mxu1 %v2833_v22  ;;  %s4683_s11 = smov %s4682_s4 }
 0x1db   : > { %2835 = vmatprep.subr.bf16.mxu1 %v3639_v19  ;;  %s4685_s14 = smov %s4684_s30 }
 0x1dc   : > { %2846 = vmatpush3.bf16.msra.mxu0 %v2845_v34 }
 0x1dd   : > { %2758 = vmatprep.subr.mxu0 %v3641_v23 }
 0x25c   : > { %v1017_v6 = vpop.xlane.xlu0 %1016 }
 0x25d   : > { %v1018_v7 = vmul.f32 0.03125, %v1017_v6  ;;  %v2630_v6 = vld [vmem:[#allocation17] ss:$0 sm:$0xff] }
 0x25f   : > { %v1019_v8 = vsub.f32 %v1014_v0, %v1018_v7  ;;  %v2628_v0 = vld [vmem:[#allocation16] ss:$0 sm:$0xff] }
 0x260   : > { %v1001_v9 = vpop.xlane.xlu0 %1000 }
 0x261   : > { %v1002_v10 = vmul.f32 0.03125, %v1001_v9  ;;  %v1020_v11 = vmul.f32 %v1019_v8, %v1019_v8 }
 0x263   : > { %v1003_v12 = vsub.f32 %v998_v1, %v1002_v10  ;;  %v1021_v13 = vsel %vm969_vm0, %v1020_v11, 0.0 }
 0x264   : > { %1022 = vadd.xlane.f32.xlu1 %v1021_v13  ;;  %v972_v24 = vpop.xlane.xlu0 %971 }
 0x265   : > { %v1004_v14 = vmul.f32 %v1003_v12, %v1003_v12  ;;  %v974_v25 = vmul.f32 0.03125, %v972_v24 }
 0x267   : > { %v1005_v15 = vsel %vm969_vm0, %v1004_v14, 0.0  ;;  %v975_v26 = vsub.f32 %v968_v4, %v974_v25  ;;  %v1289_v14 = vstv %s2627_s5  ;;  %s4687_s5 = sld [smem:[#allocation61_spill]] }
 0x268   : > { %1006 = vadd.xlane.f32.xlu1 %v1005_v15 }
 0x269   : > { %v976_v27 = vmul.f32 %v975_v26, %v975_v26 }
 0x26b   : > { %v977_v28 = vsel %vm969_vm0, %v976_v27, 0.0 }
 0x26c   : > { %978 = vadd.xlane.f32.xlu1 %v977_v28 }
 0x2f1   : > { %v1023_v35 = vpop.xlane.xlu1 %1022 }
 0x2f2   : > { %v1024_v36 = vmul.f32 0.03125, %v1023_v35 }
 0x2f4   : > { %v1025_v37 = vadd.f32 1e-06, %v1024_v36 }
 0x2f5   : > { %v1007_v38 = vpop.xlane.xlu1 %1006 }
 0x2f6   : > { %3066 = vrsqrt.f32 %v1025_v37  ;;  %v1008_v39 = vmul.f32 0.03125, %v1007_v38 }
 0x2f8   : > { %v1009_v40 = vadd.f32 1e-06, %v1008_v39 }
 0x2f9   : > { %v979_v57 = vpop.xlane.xlu1 %978 }
 0x2fa   : > { %3068 = vrsqrt.f32 %v1009_v40  ;;  %v980_v58 = vmul.f32 0.03125, %v979_v57 }
 0x2fc   : > { %v981_v59 = vadd.f32 1e-06, %v980_v58 }
 0x2fe   : > { %3070 = vrsqrt.f32 %v981_v59 }
 0x300   : > { %v3067_v41 = vpop.eup %3066 }
 0x301   : > { %v1027_v43 = vmul.f32 %v3067_v41, %v1019_v8  ;;  %v1203_v8 = vstv %s2626_s13 }
 0x303   : > { %v1028_v47 = vmul.f32 %v2624_v42, %v1027_v43 }
 0x304   : > { %v3069_v48 = vpop.eup %3068 }
 0x305   : > { %v1011_v50 = vmul.f32 %v3069_v48, %v1003_v12  ;;  %v1029_v51 = vadd.f32 %v2625_v46, %v1028_v47  ;;  %v2632_v12 = vld [vmem:[#allocation19] ss:$0 sm:$0xff] }
 0x307   : > { %2724 = vmatmul.mubr.msk.f32.vlgmr.msra.gmra.mrb[0].mxu1 %vm969_vm0, %v1029_v51  ;;  %v1012_v55 = vmul.f32 %v2624_v42, %v1011_v50 }
 0x308   : > { %2837 = vmatpush3.bf16.msra.mxu1 %v2836_v49  ;;  %2734 = vmatprep.mubr.msk.f32.mxu1 %vm3640_vm1, %v3641_v23  ;;  %v3071_v60 = vpop.eup %3070 }
 0x309   : > { %2838 = vmatprep.subr.bf16.mxu1 %v3639_v19  ;;  %v1013_v56 = vadd.f32 %v2625_v46, %v1012_v55  ;;  %v983_v61 = vmul.f32 %v3071_v60, %v975_v26 }
 0x30b   : > { %v990_v62 = vmul.f32 %v2624_v42, %v983_v61 }
 0x30c   : > { %2840 = vmatpush3.bf16.msra.mxu1 %v2839_v54 }
 0x30d   : > { %2748 = vmatprep.subr.mxu1 %v3641_v23  ;;  %v997_v63 = vadd.f32 %v2625_v46, %v990_v62 }
 0x30f   : > { %2735 = vmatmul.mubr.msk.f32.vlgmr.msra.gmra.mrb[2].mxu1 %vm969_vm0, %v1013_v56  ;;  %2746 = vmatmul.mubr.msk.f32.vlgmr.msra.gmra.mrb[0].mxu0 %vm969_vm0, %v997_v63 }
 0x310   : > { %2750 = vmatprep.mubr.msk.f32.mxu1 %vm3640_vm1, %v3641_v23  ;;  %2760 = vmatprep.mubr.msk.f32.mxu0 %vm3640_vm1, %v3641_v23 }
 0x3da   : > { %v1113_v1 = vpop.f32.mrb[0].mxu1 }
 0x3db   : > { %v1114_v3 = vadd.f32 %v2628_v0, %v1113_v1  ;;  %v2725_v4 = vpop.f32.mrb[1].mxu1 }
 0x3dd   : > { %v1118_v5 = vmul.f32 %v1117_v2, %v1114_v3 }
 0x3df   : > { %1455 = vrot.lane.b32.xlu1 %v1118_v5, %s3642_s3 }
 0x3e2   : > { %v1199_v7 = vpop.f32.mrb[2].mxu1  ;;  %v1285_v13 = vpop.f32.mrb[0].mxu0 }
 0x3e3   : > { %v1200_v9 = vadd.f32 %v2630_v6, %v1199_v7  ;;  %v2736_v10 = vpop.f32.mrb[3].mxu1  ;;  %v1286_v15 = vadd.f32 %v2632_v12, %v1285_v13  ;;  %v2747_v16 = vpop.f32.mrb[1].mxu0 }
 0x3e5   : > { %v1204_v11 = vmul.f32 %v1203_v8, %v1200_v9  ;;  %v4335_v17 = vmul.f32 %v1289_v14, %v1286_v15 }
 0x3e7   : > { %1632 = vrot.lane.b32.xlu1 %v1204_v11, %s3643_s2  ;;  %1457 = vrot.lane.b32.xlu0 %v1204_v11, %s3642_s3 }
 0x3e8   : > { %2749 = vmatpush3.xpose.msk.msra.mxu1 %vm1291_vm2, %v1204_v11 }
 0x3e9   : > { %2753 = vmatprep.subr.mxu1 %v3641_v23 }
 0x3eb   : > { %2751 = vmatmul.mubr.msk.f32.vlgmr.msra.gmra.mrb[4].mxu1 %vm1291_vm2, %v1118_v5  ;;  %1630 = vrot.lane.b32.xlu1 %v1118_v5, %s3643_s2 }
 0x3ec   : > { %1806 = vrot.lane.b32.xlu0 %v1204_v11, %s3644_s19  ;;  %2755 = vmatprep.mubr.msk.f32.mxu1 %vm3640_vm1, %v3641_v23 }
 0x3ed   : > { %2754 = vmatpush3.msra.mxu1 %v4335_v17 }
 0x3ee   : > { %2763 = vmatprep.subr.mxu1 %v3641_v23 }
 0x3ef   : > { %1804 = vrot.lane.b32.xlu1 %v1118_v5, %s3644_s19 }
 0x451   : > { %v1456_v18 = vpop.permute.xlu1 %1455 }
 0x459   : > { %v1633_v20 = vpop.permute.xlu1 %1632  ;;  %v1458_v21 = vpop.permute.xlu0 %1457 }
 0x45a   : > { %2759 = vmatpush3.xpose.msk.msra.mxu0 %vm1291_vm2, %v1458_v21  ;;  %v1980_v21 = vld [vmem:[%s4683_s11 + $0x8] sm:$0xff] }
 0x45b   : > { %2768 = vmatprep.subr.mxu0 %v3641_v23 }
 0x45d   : > { %2761 = vmatmul.mubr.msk.f32.vlgmr.msra.gmra.mrb[2].mxu0 %vm1291_vm2, %v1456_v18  ;;  %v1631_v22 = vpop.permute.xlu1 %1630 }
 0x45e   : > { %2769 = vmatpush3.xpose.msk.msra.mxu0 %vm1291_vm2, %v1633_v20  ;;  %2770 = vmatprep.mubr.msk.f32.mxu0 %vm3640_vm1, %v3641_v23  ;;  %v1807_v24 = vpop.permute.xlu0 %1806  ;;  %v1979_v20 = vld [vmem:[%s4682_s4] sm:$0xff] }
 0x45f   : > { %2778 = vmatprep.subr.mxu0 %v3641_v23 }
 0x461   : > { %2771 = vmatmul.mubr.msk.f32.vlgmr.msra.gmra.mrb[4].mxu0 %vm1291_vm2, %v1631_v22  ;;  %v1805_v25 = vpop.permute.xlu1 %1804  ;;  %v2848_v22 = vpack.c.bf16 %v1980_v21, %v1979_v20 }
 0x462   : > { %2779 = vmatpush3.xpose.msk.msra.mxu0 %vm1291_vm2, %v1807_v24  ;;  %2780 = vmatprep.mubr.msk.f32.mxu0 %vm3640_vm1, %v3641_v23  ;;  %v1981_v24 = vld [vmem:[%s4683_s11 + $0x10] sm:$0xff] }
 0x463   : > { %2847 = vmatprep.subr.bf16.mxu0 %v3639_v19 }
 0x465   : > { %2781 = vmatmul.mubr.msk.f32.vlgmr.msra.gmra.mrb[6].mxu0 %vm1291_vm2, %v1805_v25  ;;  %v1982_v25 = vld [vmem:[%s4683_s11 + $0x18] sm:$0xff] }
 0x466   : > { %2796 = vmatprep.mubr.msk.f32.mxu0 %vm3640_vm1, %v3641_v23  ;;  %2849 = vmatpush3.bf16.msra.mxu0 %v2848_v22 }
 0x467   : > { %2850 = vmatprep.subr.bf16.mxu0 %v3639_v19 }
 0x4be   : > { %v1364_v26 = vpop.f32.mrb[4].mxu1 }
 0x4bf   : > { %v1368_v27 = vmul.f32 0.35355338, %v1364_v26  ;;  %v2752_v28 = vpop.f32.mrb[5].mxu1  ;;  %v2851_v26 = vpack.c.bf16 %v1982_v25, %v1981_v24 }
 0x4c1   : > { %v1369_v29 = vsel %vm1291_vm2, %v1368_v27, -inf  ;;  %2852 = vmatpush3.bf16.msra.mxu0 %v2851_v26 }
 0x4c2   : > { %1370 = vmax.xlane.f32.xlu0 %v1369_v29  ;;  %2859 = vmatprep.subr.bf16.mxu0 %v3639_v19 }
 0x530   : > { %v1529_v30 = vpop.f32.mrb[2].mxu0 }
 0x531   : > { %v1533_v31 = vmul.f32 0.35355338, %v1529_v30  ;;  %v2762_v32 = vpop.f32.mrb[3].mxu0 }
 0x533   : > { %v1534_v33 = vsel %vm1291_vm2, %v1533_v31, -inf }
 0x534   : > { %1535 = vmax.xlane.f32.xlu1 %v1534_v33  ;;  %v1704_v34 = vpop.f32.mrb[4].mxu0  ;;  %v2649_v33 = vld [vmem:[#allocation20] ss:$0 sm:$0xff] }
 0x535   : > { %v1708_v35 = vmul.f32 0.35355338, %v1704_v34  ;;  %v2772_v36 = vpop.f32.mrb[5].mxu0 }
 0x537   : > { %v1709_v37 = vsel %vm1291_vm2, %v1708_v35, -inf }
 0x538   : > { %1710 = vmax.xlane.f32.xlu0 %v1709_v37  ;;  %v1878_v38 = vpop.f32.mrb[6].mxu0 }
 0x539   : > { %v1882_v39 = vmul.f32 0.35355338, %v1878_v38  ;;  %v2782_v40 = vpop.f32.mrb[7].mxu0 }
 0x53b   : > { %v1883_v41 = vsel %vm1291_vm2, %v1882_v39, -inf }
 0x53c   : > { %1884 = vmax.xlane.f32.xlu0 %v1883_v41 }
 0x54f   : > { %v1371_v42 = vpop.xlane.xlu0 %1370 }
 0x550   : > { %v1372_v43 = vsub.f32 %v1368_v27, %v1371_v42 }
 0x552   : > { %v1373_v44 = vmul.f32 1.442695, %v1372_v43 }
 0x554   : > { %3072 = vpow2.f32 %v1373_v44 }
 0x55e   : > { %v3073_v45 = vpop.eup %3072 }
 0x55f   : > { %v1375_v46 = vsel %vm1291_vm2, %v3073_v45, 0.0 }
 0x560   : > { %1376 = vadd.xlane.f32.xlu0 %v1375_v46 }
 0x5c1   : > { %v1536_v47 = vpop.xlane.xlu1 %1535 }
 0x5c2   : > { %v1537_v48 = vsub.f32 %v1533_v31, %v1536_v47  ;;  %v2096_v47 = vld [vmem:[#allocation25 + $0x10] sm:$0xff] }
 0x5c4   : > { %v1538_v49 = vmul.f32 1.442695, %v1537_v48  ;;  %v2097_v48 = vld [vmem:[#allocation25 + $0x18] sm:$0xff] }
 0x5c5   : > { %v1711_v50 = vpop.xlane.xlu0 %1710 }
 0x5c6   : > { %3074 = vpow2.f32 %v1538_v49  ;;  %v1712_v51 = vsub.f32 %v1708_v35, %v1711_v50  ;;  %v2063_v35 = vld [vmem:[%s830_s16] sm:$0xff]  ;;  %v2857_v49 = vpack.c.bf16 %v2097_v48, %v2096_v47  ;;  %s2304_s16 = sshll.u32 %s4366_s10, 4  ;;  %s4460_s16 = int_to_ptr.vmem [resolvable:$true] %s2304_s16 }
 0x5c7   : > { %v2179_v50 = vld [vmem:[%s4684_s30] sm:$0xff]  ;;  %s4686_s30 = sld [smem:[#allocation41_spill]] }
 0x5c8   : > { %v1713_v52 = vmul.f32 1.442695, %v1712_v51  ;;  %v2180_v51 = vld [vmem:[%s4685_s14 + $0x8] sm:$0xff] }
 0x5c9   : > { %v1885_v57 = vpop.xlane.xlu0 %1884 }
 0x5ca   : > { %3076 = vpow2.f32 %v1713_v52  ;;  %v1886_v59 = vsub.f32 %v1882_v39, %v1885_v57  ;;  %v2181_v52 = vld [vmem:[%s4685_s14 + $0x10] sm:$0xff]  ;;  %v2184_v57 = vld [vmem:[%s4685_s14 + $0x28] sm:$0xff] }
 0x5cc   : > { %v1887_v60 = vmul.f32 1.442695, %v1886_v59 }
 0x5d0   : > { %v3075_v53 = vpop.eup %3074 }
 0x5d1   : > { %v1540_v54 = vsel %vm1291_vm2, %v3075_v53, 0.0 }
 0x5d2   : > { %1541 = vadd.xlane.f32.xlu1 %v1540_v54  ;;  %v2182_v54 = vld [vmem:[%s4685_s14 + $0x18] sm:$0xff] }
 0x5d4   : > { %v3077_v55 = vpop.eup %3076 }
 0x5d5   : > { %v1715_v56 = vsel %vm1291_vm2, %v3077_v55, 0.0 }
 0x5d6   : > { %1716 = vadd.xlane.f32.xlu0 %v1715_v56  ;;  %v2183_v56 = vld [vmem:[%s4685_s14 + $0x20] sm:$0xff] }
 0x5e3   : > { %1722 = vrot.lane.b32.xlu1 %v4335_v17, %s3643_s2  ;;  %s3475_s2 = scalar_lea.vmem %s4460_s16, 512 }
 0x5e4   : > { %p3476_p5 = scmp.ne.s32.totalorder %s4460_s16, %s3475_s2 }
 0x5e6   : > { %p3477_p4 = pnand %p3476_p5, %p4689_p7 }
 0x5e8   : > { %p3478_p12 = pneg %p3477_p4 }
 0x5ec   : > { %1548 = vrot.lane.b32.xlu0 %v4335_v17, %s3642_s3 }
 0x5ed   : > { %v1377_v58 = vpop.xlane.xlu0 %1376 }
 0x5ee   : > { %3078 = vrcp.f32 %v1377_v58  ;;  %v2866_v58 = vpack.c.bf16 %v2184_v57, %v2183_v56 }
 0x5ef   : > { %3080 = vpow2.f32 %v1887_v60 }
 0x5f8   : > { %v3079_v61 = vpop.eup %3078 }
 0x5f9   : > { %v1379_v62 = vmul.f32 %v3079_v61, %v3073_v45  ;;  %v3081_v63 = vpop.eup %3080  ;;  %v2095_v45 = vld [vmem:[#allocation25 + $0x8] sm:$0xff] }
 0x5fa   : > { %v1889_v0 = vsel %vm1291_vm2, %v3081_v63, 0.0 }
 0x5fb   : > { %1380 = vst.msk [vmem:[%s4366_s10] sm:$0xff] %vm1291_vm2, %v1379_v62  ;;  %2756 = vmatmul.mubr.msk.f32.vlgmr.msra.gmra.mrb[6].mxu1 %vm1291_vm2, %v1379_v62 }
 0x5fc   : > { %2765 = vmatprep.mubr.msk.f32.mxu1 %vm3640_vm1, %v3641_v23 }
 0x607   : > { %1890 = vadd.xlane.f32.xlu1 %v1889_v0 }
 0x618   : > { %1896 = vrot.lane.b32.xlu1 %v4335_v17, %s3644_s19  ;;  %s3648_s19 = smov [#allocation27]  }
 0x65f   : > { %v1542_v1 = vpop.xlane.xlu1 %1541 }
 0x660   : > { %3082 = vrcp.f32 %v1542_v1  ;;  %v2652_v1 = vld [vmem:[#allocation23] ss:$0 sm:$0xff] }
 0x663   : > { %v1717_v2 = vpop.xlane.xlu0 %1716  ;;  %v1723_v6 = vpop.permute.xlu1 %1722 }
 0x664   : > { %3084 = vrcp.f32 %v1717_v2 }
 0x667   : > { %v1549_v3 = vpop.permute.xlu0 %1548 }
 0x668   : > { %2764 = vmatpush3.msra.mxu1 %v1549_v3 }
 0x669   : > { %2773 = vmatprep.subr.mxu1 %v3641_v23 }
 0x66a   : > { %v3083_v4 = vpop.eup %3082 }
 0x66b   : > { %v1544_v5 = vmul.f32 %v3083_v4, %v3075_v53  ;;  %v2860_v53 = vpack.c.bf16 %v2180_v51, %v2179_v50  ;;  %v2185_v4 = vld [vmem:[%s4685_s14 + $0x30] sm:$0xff] }
 0x66d   : > { %2639 = vst.msk [vmem:[%s4366_s10 + $0x8] sm:$0xff] %vm1291_vm2, %v1544_v5  ;;  %2766 = vmatmul.mubr.msk.f32.vlgmr.msra.gmra.mrb[8].mxu1 %vm1291_vm2, %v1544_v5 }
 0x66e   : > { %v3085_v7 = vpop.eup %3084  ;;  %2774 = vmatpush3.msra.mxu1 %v1723_v6  ;;  %2775 = vmatprep.mubr.msk.f32.mxu1 %vm3640_vm1, %v3641_v23  ;;  %v2653_v6 = vld [vmem:[%s4687_s5] ss:$0 sm:$0xff]  ;;  %s3479_s5 = sshll.u32 %s3648_s19, 4  ;;  %s3480_s5 = int_to_ptr.vmem [resolvable:$false] %s3479_s5 }
 0x66f   : > { %v1719_v8 = vmul.f32 %v3085_v7, %v3077_v55  ;;  %2783 = vmatprep.subr.mxu1 %v3641_v23  ;;  %v2863_v55 = vpack.c.bf16 %v2182_v54, %v2181_v52  ;;  %p3482_p13 = scmp.lt.s32.totalorder %s4460_s16, %s3480_s5 }
 0x671   : > { %2643 = vst.msk [vmem:[%s4366_s10 + $0x10] sm:$0xff] %vm1291_vm2, %v1719_v8  ;;  %2776 = vmatmul.mubr.msk.f32.vlgmr.msra.gmra.mrb[10].mxu1 %vm1291_vm2, %v1719_v8 }
 0x672   : > { %2785 = vmatprep.mubr.msk.f32.mxu1 %vm3640_vm1, %v3641_v23 }
 0x694   : > { %v1891_v9 = vpop.xlane.xlu1 %1890 }
 0x695   : > { %3086 = vrcp.f32 %v1891_v9 }
 0x698   : > { %v1897_v10 = vpop.permute.xlu1 %1896 }
 0x699   : > { %2784 = vmatpush3.msra.mxu1 %v1897_v10 }
 0x69a   : > { %2853 = vmatprep.subr.bf16.mxu1 %v3639_v19 }
 0x69f   : > { %v3087_v11 = vpop.eup %3086 }
 0x6a0   : > { %v1893_v12 = vmul.f32 %v3087_v11, %v3081_v63  ;;  %v2651_v63 = vld [vmem:[#allocation22] ss:$0 sm:$0xff] }
 0x6a2   : > { %2647 = vst.msk [vmem:[%s4366_s10 + $0x18] sm:$0xff] %vm1291_vm2, %v1893_v12  ;;  %2786 = vmatmul.mubr.msk.f32.vlgmr.msra.gmra.mrb[12].mxu1 %vm1291_vm2, %v1893_v12  ;;  %s3481_s10 = scalar_lea.vmem %s3480_s5, 1024 }
 0x6a3   : > { %2807 = vmatprep.mubr.msk.f32.mxu1 %vm3640_vm1, %v3641_v23  ;;  %p3483_p1 = scmp.lt.s32.totalorder %s3481_s10, %s3475_s2 }
 0x6a5   : > { %p3484_p0 = por %p3483_p1, %p3482_p13 }
 0x6a7   : > { %p3485_p2 = pnand %p3484_p0, %p3478_p12 }
 0x6ce   : > { %v1450_v13 = vpop.f32.mrb[6].mxu1 }
 0x6cf   : > { %1454 = vst.msk [vmem:[#allocation2] sm:$0xff] %vm1291_vm2, %v1450_v13  ;;  %v2757_v14 = vpop.f32.mrb[7].mxu1 }
 0x740   : > { %v1620_v15 = vpop.f32.mrb[8].mxu1 }
 0x741   : > { %1625 = vrot.lane.b32.xlu1 %v1620_v15, %s3645_s18  ;;  %v2767_v16 = vpop.f32.mrb[9].mxu1 }
 0x744   : > { %v1794_v17 = vpop.f32.mrb[10].mxu1 }
 0x745   : > { %1799 = vrot.lane.b32.xlu0 %v1794_v17, %s3646_s21  ;;  %v2777_v18 = vpop.f32.mrb[11].mxu1 }
 0x775   : > { %v1968_v27 = vpop.f32.mrb[12].mxu1 }
 0x776   : > { %1973 = vrot.lane.b32.xlu1 %v1968_v27, %s3647_s22  ;;  %v2787_v28 = vpop.f32.mrb[13].mxu1  ;;  %s2664_s22 = sshll.u32 %s4686_s30, 9 }
 0x777   : > { %s4458_s13 = scalar_lea.hbm %s4688_s24, %s2664_s22 }
 0x7b3   : > { %v1626_v29 = vpop.permute.xlu1 %1625 }
 0x7b4   : > { %1629 = vst.msk [vmem:[#allocation2] sm:$0xff] %vm1628_vm3, %v1626_v29 }
 0x7b7   : > { %v1800_v30 = vpop.permute.xlu0 %1799 }
 0x7b8   : > { %1803 = vst.msk [vmem:[#allocation2] sm:$0xff] %vm1802_vm4, %v1800_v30 }
 0x7e8   : > { %v1974_v31 = vpop.permute.xlu1 %1973 }
 0x7e9   : > { %1977 = vst.msk [vmem:[#allocation2] sm:$0xff] %vm1976_vm5, %v1974_v31 }
 0x7f0   : > { %v1978_v32 = vld [vmem:[#allocation2] sm:$0xff] }
 0x7f1   : > { %2797 = vmatmul.mubr.msk.f32.vlgmr.msra.gmra.mrb[8].mxu0 %vm969_vm0, %v1978_v32 }
 0x7f2   : > { %2826 = vmatprep.mubr.msk.f32.mxu0 %vm3640_vm1, %v3641_v23  ;;  %v2094_v23 = vld [vmem:[#allocation25] sm:$0xff]  ;;  %2861 = vmatpush3.bf16.msra.mxu0 %v2860_v53 }
 0x7f3   : > { %v2854_v46 = vpack.c.bf16 %v2095_v45, %v2094_v23  ;;  %2862 = vmatprep.subr.bf16.mxu0 %v3639_v19 }
 0x7f5   : > { %2855 = vmatpush3.bf16.msra.mxu1 %v2854_v46 }
 0x7f6   : > { %2856 = vmatprep.subr.bf16.mxu1 %v3639_v19  ;;  %2864 = vmatpush3.bf16.msra.mxu0 %v2863_v55 }
 0x7f7   : > { %2865 = vmatprep.subr.bf16.mxu0 %v3639_v19 }
 0x7f9   : > { %2858 = vmatpush3.bf16.msra.mxu1 %v2857_v49 }
 0x7fa   : > { %2867 = vmatpush3.bf16.msra.mxu0 %v2866_v58 }
 0x7fb   : > { %2868 = vmatprep.subr.bf16.mxu0 %v3639_v19  ;;  %v2186_v19 = vld [vmem:[%s4685_s14 + $0x38] sm:$0xff] }
 0x7fc   : > { %v2869_v5 = vpack.c.bf16 %v2186_v19, %v2185_v4 }
 0x7fe   : > { %2870 = vmatpush3.bf16.msra.mxu0 %v2869_v5 }
 0x8c4   : > { %v2059_v34 = vpop.f32.mrb[8].mxu0 }
 0x8c5   : > { %v2060_v36 = vadd.f32 %v2649_v33, %v2059_v34  ;;  %v2798_v37 = vpop.f32.mrb[9].mxu0 }
 0x8c7   : > { %v4415_v38 = vadd.f32 %v2063_v35, %v2060_v36 }
 0x8c9   : > { %v2067_v39 = vsel %vm969_vm0, %v4415_v38, 0.0 }
 0x8ca   : > { %2068 = vadd.xlane.f32.xlu0 %v2067_v39 }
 0x957   : > { %v2069_v40 = vpop.xlane.xlu0 %2068 }
 0x958   : > { %v2070_v41 = vmul.f32 0.03125, %v2069_v40 }
 0x95a   : > { %v2071_v42 = vsub.f32 %v4415_v38, %v2070_v41 }
 0x95c   : > { %v2072_v43 = vmul.f32 %v2071_v42, %v2071_v42 }
 0x95e   : > { %v2073_v44 = vsel %vm969_vm0, %v2072_v43, 0.0 }
 0x95f   : > { %2074 = vadd.xlane.f32.xlu1 %v2073_v44 }
 0x9ec   : > { %v2075_v59 = vpop.xlane.xlu1 %2074 }
 0x9ed   : > { %v2076_v60 = vmul.f32 0.03125, %v2075_v59 }
 0x9ef   : > { %v2077_v61 = vadd.f32 1e-06, %v2076_v60 }
 0x9f1   : > { %3088 = vrsqrt.f32 %v2077_v61 }
 0x9fb   : > { %v3089_v62 = vpop.eup %3088 }
 0x9fc   : > { %v2079_v0 = vmul.f32 %v3089_v62, %v2071_v42 }
 0x9fe   : > { %v2086_v2 = vmul.f32 %v2651_v63, %v2079_v0 }
 0xa00   : > { %v2093_v3 = vadd.f32 %v2652_v1, %v2086_v2 }
 0xa02   : > { %2808 = vmatmul.mubr.msk.f32.vlgmr.msra.gmra.mrb[14].mxu1 %vm969_vm0, %v2093_v3 }
 0xad5   : > { %v2174_v7 = vpop.f32.mrb[14].mxu1 }
 0xad6   : > { %v2175_v8 = vadd.f32 %v2653_v6, %v2174_v7  ;;  %v2809_v9 = vpop.f32.mrb[15].mxu1 }
 0xad8   : > { %v2178_v10 = vmax.f32 %v2175_v8, 0.0 }
 0xada   : > { %2827 = vmatmul.mubr.msk.f32.vlgmr.msra.gmra.mrb[10].mxu0 %vm2194_vm6, %v2178_v10 }
 0xadb   : > { %3488 = shalt.err (!%p3485_p2)
}
 0xadc   : > { %s3489_s22 = scalar_lea.hbm %s4458_s13, 512  ;;  %s3493_s19 = scalar_lea.hbm %s4688_s24, 1024 }
 0xadd   : > { %p3490_p3 = scmp.ne.s32.totalorder %s4458_s13, %s3489_s22  ;;  %p3494_p9 = scmp.lt.u32.totalorder %s4458_s13, %s4688_s24 }
 0xade   : > { %p3495_p6 = scmp.lt.u32.totalorder %s3493_s19, %s3489_s22  ;;  %p3497_p5 = scmp.lt.u32.totalorder %s3489_s22, %s4458_s13 }
 0xadf   : > { %p3491_p10 = pnand %p3490_p3, %p4689_p7 }
 0xae0   : > { %p3496_p8 = por %p3495_p6, %p3494_p9 }
 0xae1   : > { %p3492_p11 = pneg %p3491_p10 }
 0xae2   : > { %p3498_p4 = por %p3497_p5, %p3496_p8 }
 0xae4   : > { %p3499_p12 = pnand %p3498_p4, %p3492_p11 }
 0xae6   : > { %3502 = shalt.err (!%p3499_p12)
}
 0xae7   : > { %s3649_s2 = smov 128   ;;  %s4690_s10 = scalar_lea.sflag [#allocation28], %s4216_s23 }
 0xae8   : > { %2920 = dma.vmem_to_hbm [thread:$0]  (%p4689_p7), %s4460_s16, 512, %s4458_s13, %s4690_s10, %s3649_s2, %s3649_s2, %s3645_s18  }
 0xae9   : > { %s4691_s4 = sld [smem:[#allocation63_spill]]  ;;  %s2659_s22 = sshll.u32 %s4686_s30, 7 }
 0xaea   : > { %s958_s19 = scalar_lea.vmem [#allocation26], %s4219_s6  ;;  %s4692_s9 = sld [smem:[#allocation64_spill]] }
 0xaeb   : > { %s2290_s5 = sshll.u32 %s958_s19, 4  ;;  %s2271_s18 = scalar_lea.sflag [#allocation5], %s4216_s23  ;;  %s4498_s5 = int_to_ptr.vmem [resolvable:$true] %s2290_s5 }
 0xaec   : > { %s3503_s30 = scalar_lea.vmem %s4498_s5, 128  ;;  %s3650_s6 = smov [#allocation26]  }
 0xaed   : > { %p3504_p13 = scmp.ne.s32.totalorder %s4498_s5, %s3503_s30  ;;  %s3507_s16 = sshll.u32 %s3650_s6, 4  ;;  %s3508_s16 = int_to_ptr.vmem [resolvable:$false] %s3507_s16 }
 0xaee   : > { %s3509_s13 = scalar_lea.vmem %s3508_s16, 256  ;;  %p3510_p2 = scmp.lt.s32.totalorder %s4498_s5, %s3508_s16 }
 0xaef   : > { %v2655_v11 = vld [vmem:[%s4691_s4] ss:$0 sm:$0xff]  ;;  %p3505_p1 = pnand %p3504_p13, %p4689_p7  ;;  %p3511_p3 = scmp.lt.s32.totalorder %s3509_s13, %s3503_s30 }
 0xaf0   : > { %s4496_s11 = scalar_lea.hbm %s4692_s9, %s2659_s22 }
 0xaf1   : > { %p3506_p0 = pneg %p3505_p1  ;;  %p3512_p10 = por %p3511_p3, %p3510_p2 }
 0xaf3   : > { %p3513_p11 = pnand %p3512_p10, %p3506_p0 }
 0xbad   : > { %v2264_v12 = vpop.f32.mrb[10].mxu0 }
 0xbae   : > { %v2265_v13 = vadd.f32 %v2655_v11, %v2264_v12  ;;  %v2828_v14 = vpop.f32.mrb[11].mxu0 }
 0xbb0   : > { %v2268_v15 = vadd.f32 %v2265_v13, %v4415_v38 }
 0xbb2   : > { %2269 = vst.msk [vmem:[%s958_s19] sm:$0xff] %vm969_vm0, %v2268_v15 }
 0xbb3   : > { %3516 = shalt.err (!%p3513_p11)
}
 0xbb4   : > { %s3517_s8 = scalar_lea.hbm %s4496_s11, 128  ;;  %s3521_s2 = scalar_lea.hbm %s4692_s9, 256 }
 0xbb5   : > { %p3518_p9 = scmp.ne.s32.totalorder %s4496_s11, %s3517_s8  ;;  %p3522_p5 = scmp.lt.u32.totalorder %s4496_s11, %s4692_s9 }
 0xbb6   : > { %p3523_p4 = scmp.lt.u32.totalorder %s3521_s2, %s3517_s8  ;;  %p3525_p13 = scmp.lt.u32.totalorder %s3517_s8, %s4496_s11 }
 0xbb7   : > { %p3519_p6 = pnand %p3518_p9, %p4689_p7 }
 0xbb8   : > { %p3524_p12 = por %p3523_p4, %p3522_p5 }
 0xbb9   : > { %p3520_p8 = pneg %p3519_p6 }
 0xbba   : > { %p3526_p1 = por %p3525_p13, %p3524_p12 }
 0xbbc   : > { %p3527_p0 = pnand %p3526_p1, %p3520_p8 }
 0xbbe   : > { %3530 = shalt.err (!%p3527_p0)
}
 0xbbf   : > { %2919 = dma.vmem_to_hbm [thread:$0]  (%p4689_p7), %s4498_s5, 128, %s4496_s11, %s2271_s18  }
 0xbc0 PF: > { %s4693_s21 = sld [smem:[#allocation40_spill]]  ;;  %s4694_s4 = sld [smem:[#allocation45_spill]] }
 0xbc1   : > { %p4696_p3 = scmp.ge.s32.totalorder %s3621_s0, 2 }
 0xbc6   : > { %s2319_s22 = sand.u32 1, %s4693_s21   ;;  %p4695_p2 = scmp.ne.s32.totalorder %s4694_s4, 0 }
 0xbc7   : > { %s2320_s19 = scalar_lea.sflag [#allocation5], %s2319_s22 }
 0xbc8   : > { %p2968_p10 = pnand %p4696_p3, %p4695_p2 }
 0xbca   : > { %3592 = dma.done.wait (!%p2968_p10), %s2320_s19, 128  }
 0xbcb   : > { %3594 = vsyncadd (!%p2968_p10), %s2320_s19, 4294967168  ;;  %s2329_s30 = scalar_lea.sflag [#allocation28], %s2319_s22 }
 0xbcc   : > { %3596 = dma.done.wait (!%p2968_p10), %s2329_s30, 512  }
 0xbcd   : > { %3598 = vsyncadd (!%p2968_p10), %s2329_s30, 4294966784  ;;  %s53_s0 = sadd.s32 1, %s3621_s0   ;;  %s4697_s1 = sld [smem:[#allocation44_spill]] }
 0xbce   : > { %p50_p11 = scmp.ge.s32.totalorder %s53_s0, 4   ;;  %s4698_s30 = sld [smem:[#allocation42_spill]] }
 0xbcf   : > { %s4699_s4 = sld [smem:[#allocation43_spill]]  ;;  %s4700_s3 = smov %s3605_s28 }
 0xbd0   : > { %s4701_s28 = smov %s3609_s29  ;;  %52 = sbr.rel (!%p50_p11) target bundleno = 38 (0x26), region = 247 }
 0xbd3   : > { %s4702_s29 = smov %s4697_s1 }
 0xbd7   :  { %2334 = vsyncpa [#allocation4], 1 }
 0xbd8   :  { %2336 = vsyncpa [#allocation4 + $0x1], 1 }
 0xbd9   :  { %2337 = vsyncpa [#allocation9], 1 }
 0xbda   :  { %2339 = vsyncpa [#allocation9 + $0x1], 1 }
 0xbdb   :  { %2340 = vsyncpa [#allocation12], 1 }
 0xbdc   :  { %2342 = vsyncpa [#allocation12 + $0x1], 1 }
 0xbdd   :  { %2343 = vsyncpa [#allocation15], 1 }
 0xbde   :  { %2344 = vsyncpa [#allocation18], 1 }
 0xbdf   :  { %2345 = vsyncpa [#allocation21], 1 }
 0xbe0   :  { %2346 = vsyncpa [#allocation24], 1 }
 0xbe1   :  { %2347 = vsyncpa [#allocation5], 1 }
 0xbe2   :  { %2349 = vsyncpa [#allocation5 + $0x1], 1 }
 0xbe3   :  { %2350 = vsyncpa [#allocation28], 1 }
 0xbe4   :  { %2352 = vsyncpa [#allocation28 + $0x1], 1 }
 0xbe5   :  { %2353 = vsyncpa [#allocation6], 1 }
 0xbe6   :  { %2355 = vsyncpa [#allocation6 + $0x1], 1 }

</bundles_post_ra>
